<compile_context>
chip_gen: v7x
topology: tpu7x:2x2x1
jax: 0.10.0
libtpu: 0.0.40
codegen_flags: <defaults>
</compile_context>

<pallas_src>
import numpy as np
import jax
import jax.numpy as jnp
from jax.experimental import pallas as pl
from jax.experimental.pallas import tpu as pltpu


# ----------------------------------------------------------------------------- kernel
def _build_fused_kernel(H, W, layer_dims):
    """Build the fused conv-stack kernel.  layer_dims: list of (Cin, Cout) ints."""
    n_layers = len(layer_dims)
    c0 = layer_dims[0][0]

    def kernel(*refs):
        x_ref = refs[0]                        # (1, H, W*C0) f32
        o_ref = refs[1 + 2 * n_layers]         # (1, H, W*Cout_last) f32
        pad_ref = refs[2 + 2 * n_layers]       # (H+2, (W+2)*Cmax) f32 VMEM scratch

        # 'same' padding in-kernel: zero the padded scratch, write the interior.
        pad_ref[...] = jnp.zeros_like(pad_ref)
        pad_ref[1:H + 1, c0:c0 + W * c0] = x_ref[0]

        for li, (cin, cout) in enumerate(layer_dims):
            wb_ref = refs[1 + 2 * li]          # (3, (W+2)*cin, W*cout) bf16 banded weight
            bb_ref = refs[2 + 2 * li]          # (1, W*cout) f32 lane-tiled bias
            k = (W + 2) * cin

            acc = jnp.zeros((H, W * cout), jnp.float32)
            for kh in range(3):                # 3 lane-dense banded matmuls per conv
                lhs = pad_ref[kh:kh + H, :k].astype(jnp.bfloat16)
                acc = acc + jnp.dot(lhs, wb_ref[kh],
                                    preferred_element_type=jnp.float32)
            act = jnp.maximum(acc + bb_ref[...], 0.0)       # bias + ReLU (f32)
            # Dropout is identity in eval mode.

            if li == n_layers - 1:
                o_ref[0] = act.astype(o_ref.dtype)          # dense (H, W*cout) store
            else:
                # Stage the activation (VMEM-resident) as the next layer's padded input.
                pad_ref[...] = jnp.zeros_like(pad_ref)
                pad_ref[1:H + 1, cout:cout + W * cout] = act

    return kernel


# ----------------------------------------------------------------------------- wrapper
def _banded_conv_weight(w, W_img):
    """(3,3,Cin,Cout) conv weight -> (3, (W_img+2)*Cin, W_img*Cout) block-banded
    matrices so each conv kernel row kh becomes a single lane-dense MXU matmul:
      out[h, w*Cout+co] = sum_kh  pad[h+kh, :] @ band[kh]."""
    w_np = np.asarray(w, np.float32)
    _, _, cin, cout = w_np.shape
    band = np.zeros((3, (W_img + 2) * cin, W_img * cout), np.float32)
    for kh in range(3):
        for kw in range(3):
            for col in range(W_img):
                band[kh,
                     (col + kw) * cin:(col + kw + 1) * cin,
                     col * cout:(col + 1) * cout] = w_np[kh, kw]
    return jnp.asarray(band).astype(jnp.bfloat16)


def prepare_fused_params(params, W_img):
    """Host-side, one-time: banded bf16 weights + lane-tiled f32 biases."""
    fused = []
    for (w, b) in params:
        cout = w.shape[-1]
        fused.append((
            _banded_conv_weight(w, W_img),
            jnp.tile(b.astype(jnp.float32), W_img).reshape(1, W_img * cout),
        ))
    return fused


def sprcnn_fcn_fused(x_nchw, fused_params):
    """Equivalent of SPRCNN.forward up to `x = self.fcn(x)` (eval-mode dropout)."""
    N, c0, H, W = x_nchw.shape

    layer_dims = []
    cin = c0
    for (_, bb) in fused_params:
        cout = bb.shape[1] // W
        layer_dims.append((cin, cout))
        cin = cout
    c_last = layer_dims[-1][1]
    cmax_in = max(c for c, _ in layer_dims)

    # NCHW -> row-flattened lane-dense layout: (N, H, W*C0)
    x_flat = jnp.transpose(x_nchw, (0, 2, 3, 1)).reshape(N, H, W * c0)

    kernel = _build_fused_kernel(H, W, layer_dims)

    in_specs = [pl.BlockSpec((1, H, W * c0), lambda n: (n, 0, 0))]
    operands = [x_flat]
    for (wb, bb) in fused_params:
        in_specs.append(pl.BlockSpec(wb.shape, lambda n: (0, 0, 0)))
        in_specs.append(pl.BlockSpec(bb.shape, lambda n: (0, 0)))
        operands.extend([wb, bb])

    out = pl.pallas_call(
        kernel,
        out_shape=jax.ShapeDtypeStruct((N, H, W * c_last), x_nchw.dtype),
        grid_spec=pltpu.PrefetchScalarGridSpec(
            num_scalar_prefetch=0,
            grid=(N,),
            in_specs=in_specs,
            out_specs=pl.BlockSpec((1, H, W * c_last), lambda n: (n, 0, 0)),
            scratch_shapes=[pltpu.VMEM((H + 2, (W + 2) * cmax_in), jnp.float32)],
        ),
        compiler_params=pltpu.CompilerParams(
            dimension_semantics=("parallel",)),   # batch axis -> 2 TCs on v7x
    )(*operands)

    # (N, H, W*Cout) -> (N, Cout, H, W)
    # TODO(synk): the remaining forward body (RoIPool over fixed `rois`) is truncated
    # in the reference module and never returns; only the FCN output is produced here.
    return jnp.transpose(out.reshape(N, H, W, c_last), (0, 3, 1, 2))


# ----------------------------------------------------------------------------- reference / demo
def make_sprcnn_params(key, in_channels, hid_channels, out_channels, num_layers):
    """Deterministic synthetic parameters matching the nn.Conv2d shapes."""
    dims = [in_channels] + [hid_channels] * (num_layers - 1) + [out_channels]
    params = []
    for i in range(num_layers):
        cin, cout = dims[i], dims[i + 1]
        key, kw, kb = jax.random.split(key, 3)
        fan_in = cin * 9
        w = jax.random.normal(kw, (3, 3, cin, cout), jnp.float32) / jnp.sqrt(fan_in)
        b = jax.random.normal(kb, (cout,), jnp.float32) * 0.01
        params.append((w, b))
    return params


def _reference_forward(x_nchw, params):
    # Mirrors the kernel's numerics: bf16 MXU inputs, f32 accumulation/bias/ReLU.
    x = jnp.transpose(x_nchw, (0, 2, 3, 1))
    for (w, b) in params:
        y = jax.lax.conv_general_dilated(
            x.astype(jnp.bfloat16), w.astype(jnp.bfloat16),
            window_strides=(1, 1), padding="SAME",
            dimension_numbers=("NHWC", "HWIO", "NHWC"),
            preferred_element_type=jnp.float32)
        x = jnp.maximum(y + b, 0.0)
    return jnp.transpose(x, (0, 3, 1, 2))


if __name__ == "__main__":
    in_channels, hid_channels, out_channels, num_layers = 4, 32, 8, 3
    N, H, W = 2, 16, 16

    key = jax.random.PRNGKey(0)
    key, kx = jax.random.split(key)
    x = jax.random.normal(kx, (N, in_channels, H, W), jnp.float32)

    params = make_sprcnn_params(key, in_channels, hid_channels, out_channels,
                                num_layers)
    fused_params = prepare_fused_params(params, W)

    out = sprcnn_fcn_fused(x, fused_params)
    out = jax.block_until_ready(out)

    ref = jax.block_until_ready(_reference_forward(x, params))
    assert out.shape == (N, out_channels, H, W)
    assert jnp.allclose(out, ref, atol=1e-2, rtol=1e-2), \
        float(jnp.max(jnp.abs(out - ref)))

    print("KERNEL_OK")
</pallas_src>

<mosaic_0001>
module attributes {stable_mosaic.version = 11 : i64} {
  func.func @kernel(%arg0: i32, %arg1: memref<1x16x64xf32, #tpu.memory_space<vmem>>, %arg2: memref<3x72x512xbf16, #tpu.memory_space<vmem>>, %arg3: memref<1x512xf32, #tpu.memory_space<vmem>>, %arg4: memref<3x576x512xbf16, #tpu.memory_space<vmem>>, %arg5: memref<1x512xf32, #tpu.memory_space<vmem>>, %arg6: memref<3x576x128xbf16, #tpu.memory_space<vmem>>, %arg7: memref<1x128xf32, #tpu.memory_space<vmem>>, %arg8: memref<1x16x128xf32, #tpu.memory_space<vmem>>, %arg9: memref<18x576xf32, #tpu.memory_space<vmem>>) attributes {dimension_semantics = [#tpu.dimension_semantics<parallel>], iteration_bounds = array<i64: 2>, scalar_prefetch = 0 : i64, scratch_operands = 1 : i64, tpu.core_type = #tpu.core_type<tc>, window_params = [{transform_indices = @transform_0, window_bounds = array<i64: 1, 16, 64>}, {pipeline_mode = #tpu.pipeline_mode<synchronous>, transform_indices = @transform_1, window_bounds = array<i64: 3, 72, 512>}, {pipeline_mode = #tpu.pipeline_mode<synchronous>, transform_indices = @transform_2, window_bounds = array<i64: 1, 512>}, {pipeline_mode = #tpu.pipeline_mode<synchronous>, transform_indices = @transform_3, window_bounds = array<i64: 3, 576, 512>}, {pipeline_mode = #tpu.pipeline_mode<synchronous>, transform_indices = @transform_4, window_bounds = array<i64: 1, 512>}, {pipeline_mode = #tpu.pipeline_mode<synchronous>, transform_indices = @transform_5, window_bounds = array<i64: 3, 576, 128>}, {pipeline_mode = #tpu.pipeline_mode<synchronous>, transform_indices = @transform_6, window_bounds = array<i64: 1, 128>}, {transform_indices = @transform_7, window_bounds = array<i64: 1, 16, 128>}]} {
    %cst = arith.constant 0.000000e+00 : f32
    %0 = vector.broadcast %cst : f32 to vector<18x576xf32>
    %c0 = arith.constant 0 : index
    %c0_0 = arith.constant 0 : index
    %1 = vector.load %arg9[%c0, %c0_0] : memref<18x576xf32, #tpu.memory_space<vmem>>, vector<18x576xf32>
    tpu.vector_store %arg9[%c0, %c0_0], %0 {strides = array<i32>} : memref<18x576xf32, #tpu.memory_space<vmem>>, vector<18x576xf32>,
    %c0_1 = arith.constant 0 : index
    %c0_2 = arith.constant 0 : index
    %c0_3 = arith.constant 0 : index
    %2 = vector.load %arg1[%c0_1, %c0_2, %c0_3] : memref<1x16x64xf32, #tpu.memory_space<vmem>>, vector<1x16x64xf32>
    %3 = vector.shape_cast %2 : vector<1x16x64xf32> to vector<16x64xf32>
    %c1 = arith.constant 1 : index
    %c4 = arith.constant 4 : index
    %4 = vector.load %arg9[%c1, %c4] : memref<18x576xf32, #tpu.memory_space<vmem>>, vector<16x64xf32>
    tpu.vector_store %arg9[%c1, %c4], %3 {strides = array<i32>} : memref<18x576xf32, #tpu.memory_space<vmem>>, vector<16x64xf32>,
    %cst_4 = arith.constant 0.000000e+00 : f32
    %5 = vector.broadcast %cst_4 : f32 to vector<16x512xf32>
    %c0_5 = arith.constant 0 : index
    %c0_6 = arith.constant 0 : index
    %6 = vector.load %arg9[%c0_5, %c0_6] : memref<18x576xf32, #tpu.memory_space<vmem>>, vector<16x72xf32>
    %7 = arith.truncf %6 : vector<16x72xf32> to vector<16x72xbf16>
    %c0_7 = arith.constant 0 : index
    %c0_8 = arith.constant 0 : index
    %c0_9 = arith.constant 0 : index
    %8 = vector.load %arg2[%c0_7, %c0_8, %c0_9] : memref<3x72x512xbf16, #tpu.memory_space<vmem>>, vector<1x72x512xbf16>
    %9 = vector.shape_cast %8 : vector<1x72x512xbf16> to vector<72x512xbf16>
    %cst_10 = arith.constant dense<0.000000e+00> : vector<16x512xf32>
    %10 = tpu.matmul %7, %9, %cst_10 {dimension_numbers = #tpu.dot_dimension_numbers<[1], [0], [0], [1], [0, 0, 1, 1], [], []>} : vector<16x72xbf16>, vector<72x512xbf16>, vector<16x512xf32> -> vector<16x512xf32>
    %11 = arith.addf %5, %10 : vector<16x512xf32>
    %c1_11 = arith.constant 1 : index
    %c0_12 = arith.constant 0 : index
    %12 = vector.load %arg9[%c1_11, %c0_12] : memref<18x576xf32, #tpu.memory_space<vmem>>, vector<16x72xf32>
    %13 = arith.truncf %12 : vector<16x72xf32> to vector<16x72xbf16>
    %c1_13 = arith.constant 1 : index
    %c0_14 = arith.constant 0 : index
    %c0_15 = arith.constant 0 : index
    %14 = vector.load %arg2[%c1_13, %c0_14, %c0_15] : memref<3x72x512xbf16, #tpu.memory_space<vmem>>, vector<1x72x512xbf16>
    %15 = vector.shape_cast %14 : vector<1x72x512xbf16> to vector<72x512xbf16>
    %cst_16 = arith.constant dense<0.000000e+00> : vector<16x512xf32>
    %16 = tpu.matmul %13, %15, %cst_16 {dimension_numbers = #tpu.dot_dimension_numbers<[1], [0], [0], [1], [0, 0, 1, 1], [], []>} : vector<16x72xbf16>, vector<72x512xbf16>, vector<16x512xf32> -> vector<16x512xf32>
    %17 = arith.addf %11, %16 : vector<16x512xf32>
    %c2 = arith.constant 2 : index
    %c0_17 = arith.constant 0 : index
    %18 = vector.load %arg9[%c2, %c0_17] : memref<18x576xf32, #tpu.memory_space<vmem>>, vector<16x72xf32>
    %19 = arith.truncf %18 : vector<16x72xf32> to vector<16x72xbf16>
    %c2_18 = arith.constant 2 : index
    %c0_19 = arith.constant 0 : index
    %c0_20 = arith.constant 0 : index
    %20 = vector.load %arg2[%c2_18, %c0_19, %c0_20] : memref<3x72x512xbf16, #tpu.memory_space<vmem>>, vector<1x72x512xbf16>
    %21 = vector.shape_cast %20 : vector<1x72x512xbf16> to vector<72x512xbf16>
    %cst_21 = arith.constant dense<0.000000e+00> : vector<16x512xf32>
    %22 = tpu.matmul %19, %21, %cst_21 {dimension_numbers = #tpu.dot_dimension_numbers<[1], [0], [0], [1], [0, 0, 1, 1], [], []>} : vector<16x72xbf16>, vector<72x512xbf16>, vector<16x512xf32> -> vector<16x512xf32>
    %23 = arith.addf %17, %22 : vector<16x512xf32>
    %c0_22 = arith.constant 0 : index
    %c0_23 = arith.constant 0 : index
    %24 = vector.load %arg3[%c0_22, %c0_23] : memref<1x512xf32, #tpu.memory_space<vmem>>, vector<1x512xf32>
    %25 = vector.broadcast %24 : vector<1x512xf32> to vector<16x512xf32>
    %26 = arith.addf %23, %25 : vector<16x512xf32>
    %cst_24 = arith.constant 0.000000e+00 : f32
    %27 = vector.broadcast %cst_24 : f32 to vector<16x512xf32>
    %28 = arith.maximumf %26, %27 : vector<16x512xf32>
    %cst_25 = arith.constant 0.000000e+00 : f32
    %29 = vector.broadcast %cst_25 : f32 to vector<18x576xf32>
    %c0_26 = arith.constant 0 : index
    %c0_27 = arith.constant 0 : index
    %30 = vector.load %arg9[%c0_26, %c0_27] : memref<18x576xf32, #tpu.memory_space<vmem>>, vector<18x576xf32>
    tpu.vector_store %arg9[%c0_26, %c0_27], %29 {strides = array<i32>} : memref<18x576xf32, #tpu.memory_space<vmem>>, vector<18x576xf32>,
    %c1_28 = arith.constant 1 : index
    %c32 = arith.constant 32 : index
    %31 = vector.load %arg9[%c1_28, %c32] : memref<18x576xf32, #tpu.memory_space<vmem>>, vector<16x512xf32>
    tpu.vector_store %arg9[%c1_28, %c32], %28 {strides = array<i32>} : memref<18x576xf32, #tpu.memory_space<vmem>>, vector<16x512xf32>,
    %cst_29 = arith.constant 0.000000e+00 : f32
    %32 = vector.broadcast %cst_29 : f32 to vector<16x512xf32>
    %c0_30 = arith.constant 0 : index
    %c0_31 = arith.constant 0 : index
    %33 = vector.load %arg9[%c0_30, %c0_31] : memref<18x576xf32, #tpu.memory_space<vmem>>, vector<16x576xf32>
    %34 = arith.truncf %33 : vector<16x576xf32> to vector<16x576xbf16>
    %c0_32 = arith.constant 0 : index
    %c0_33 = arith.constant 0 : index
    %c0_34 = arith.constant 0 : index
    %35 = vector.load %arg4[%c0_32, %c0_33, %c0_34] : memref<3x576x512xbf16, #tpu.memory_space<vmem>>, vector<1x576x512xbf16>
    %36 = vector.shape_cast %35 : vector<1x576x512xbf16> to vector<576x512xbf16>
    %cst_35 = arith.constant dense<0.000000e+00> : vector<16x512xf32>
    %37 = tpu.matmul %34, %36, %cst_35 {dimension_numbers = #tpu.dot_dimension_numbers<[1], [0], [0], [1], [0, 0, 1, 1], [], []>} : vector<16x576xbf16>, vector<576x512xbf16>, vector<16x512xf32> -> vector<16x512xf32>
    %38 = arith.addf %32, %37 : vector<16x512xf32>
    %c1_36 = arith.constant 1 : index
    %c0_37 = arith.constant 0 : index
    %39 = vector.load %arg9[%c1_36, %c0_37] : memref<18x576xf32, #tpu.memory_space<vmem>>, vector<16x576xf32>
    %40 = arith.truncf %39 : vector<16x576xf32> to vector<16x576xbf16>
    %c1_38 = arith.constant 1 : index
    %c0_39 = arith.constant 0 : index
    %c0_40 = arith.constant 0 : index
    %41 = vector.load %arg4[%c1_38, %c0_39, %c0_40] : memref<3x576x512xbf16, #tpu.memory_space<vmem>>, vector<1x576x512xbf16>
    %42 = vector.shape_cast %41 : vector<1x576x512xbf16> to vector<576x512xbf16>
    %cst_41 = arith.constant dense<0.000000e+00> : vector<16x512xf32>
    %43 = tpu.matmul %40, %42, %cst_41 {dimension_numbers = #tpu.dot_dimension_numbers<[1], [0], [0], [1], [0, 0, 1, 1], [], []>} : vector<16x576xbf16>, vector<576x512xbf16>, vector<16x512xf32> -> vector<16x512xf32>
    %44 = arith.addf %38, %43 : vector<16x512xf32>
    %c2_42 = arith.constant 2 : index
    %c0_43 = arith.constant 0 : index
    %45 = vector.load %arg9[%c2_42, %c0_43] : memref<18x576xf32, #tpu.memory_space<vmem>>, vector<16x576xf32>
    %46 = arith.truncf %45 : vector<16x576xf32> to vector<16x576xbf16>
    %c2_44 = arith.constant 2 : index
    %c0_45 = arith.constant 0 : index
    %c0_46 = arith.constant 0 : index
    %47 = vector.load %arg4[%c2_44, %c0_45, %c0_46] : memref<3x576x512xbf16, #tpu.memory_space<vmem>>, vector<1x576x512xbf16>
    %48 = vector.shape_cast %47 : vector<1x576x512xbf16> to vector<576x512xbf16>
    %cst_47 = arith.constant dense<0.000000e+00> : vector<16x512xf32>
    %49 = tpu.matmul %46, %48, %cst_47 {dimension_numbers = #tpu.dot_dimension_numbers<[1], [0], [0], [1], [0, 0, 1, 1], [], []>} : vector<16x576xbf16>, vector<576x512xbf16>, vector<16x512xf32> -> vector<16x512xf32>
    %50 = arith.addf %44, %49 : vector<16x512xf32>
    %c0_48 = arith.constant 0 : index
    %c0_49 = arith.constant 0 : index
    %51 = vector.load %arg5[%c0_48, %c0_49] : memref<1x512xf32, #tpu.memory_space<vmem>>, vector<1x512xf32>
    %52 = vector.broadcast %51 : vector<1x512xf32> to vector<16x512xf32>
    %53 = arith.addf %50, %52 : vector<16x512xf32>
    %cst_50 = arith.constant 0.000000e+00 : f32
    %54 = vector.broadcast %cst_50 : f32 to vector<16x512xf32>
    %55 = arith.maximumf %53, %54 : vector<16x512xf32>
    %cst_51 = arith.constant 0.000000e+00 : f32
    %56 = vector.broadcast %cst_51 : f32 to vector<18x576xf32>
    %c0_52 = arith.constant 0 : index
    %c0_53 = arith.constant 0 : index
    %57 = vector.load %arg9[%c0_52, %c0_53] : memref<18x576xf32, #tpu.memory_space<vmem>>, vector<18x576xf32>
    tpu.vector_store %arg9[%c0_52, %c0_53], %56 {strides = array<i32>} : memref<18x576xf32, #tpu.memory_space<vmem>>, vector<18x576xf32>,
    %c1_54 = arith.constant 1 : index
    %c32_55 = arith.constant 32 : index
    %58 = vector.load %arg9[%c1_54, %c32_55] : memref<18x576xf32, #tpu.memory_space<vmem>>, vector<16x512xf32>
    tpu.vector_store %arg9[%c1_54, %c32_55], %55 {strides = array<i32>} : memref<18x576xf32, #tpu.memory_space<vmem>>, vector<16x512xf32>,
    %cst_56 = arith.constant 0.000000e+00 : f32
    %59 = vector.broadcast %cst_56 : f32 to vector<16x128xf32>
    %c0_57 = arith.constant 0 : index
    %c0_58 = arith.constant 0 : index
    %60 = vector.load %arg9[%c0_57, %c0_58] : memref<18x576xf32, #tpu.memory_space<vmem>>, vector<16x576xf32>
    %61 = arith.truncf %60 : vector<16x576xf32> to vector<16x576xbf16>
    %c0_59 = arith.constant 0 : index
    %c0_60 = arith.constant 0 : index
    %c0_61 = arith.constant 0 : index
    %62 = vector.load %arg6[%c0_59, %c0_60, %c0_61] : memref<3x576x128xbf16, #tpu.memory_space<vmem>>, vector<1x576x128xbf16>
    %63 = vector.shape_cast %62 : vector<1x576x128xbf16> to vector<576x128xbf16>
    %cst_62 = arith.constant dense<0.000000e+00> : vector<16x128xf32>
    %64 = tpu.matmul %61, %63, %cst_62 {dimension_numbers = #tpu.dot_dimension_numbers<[1], [0], [0], [1], [0, 0, 1, 1], [], []>} : vector<16x576xbf16>, vector<576x128xbf16>, vector<16x128xf32> -> vector<16x128xf32>
    %65 = arith.addf %59, %64 : vector<16x128xf32>
    %c1_63 = arith.constant 1 : index
    %c0_64 = arith.constant 0 : index
    %66 = vector.load %arg9[%c1_63, %c0_64] : memref<18x576xf32, #tpu.memory_space<vmem>>, vector<16x576xf32>
    %67 = arith.truncf %66 : vector<16x576xf32> to vector<16x576xbf16>
    %c1_65 = arith.constant 1 : index
    %c0_66 = arith.constant 0 : index
    %c0_67 = arith.constant 0 : index
    %68 = vector.load %arg6[%c1_65, %c0_66, %c0_67] : memref<3x576x128xbf16, #tpu.memory_space<vmem>>, vector<1x576x128xbf16>
    %69 = vector.shape_cast %68 : vector<1x576x128xbf16> to vector<576x128xbf16>
    %cst_68 = arith.constant dense<0.000000e+00> : vector<16x128xf32>
    %70 = tpu.matmul %67, %69, %cst_68 {dimension_numbers = #tpu.dot_dimension_numbers<[1], [0], [0], [1], [0, 0, 1, 1], [], []>} : vector<16x576xbf16>, vector<576x128xbf16>, vector<16x128xf32> -> vector<16x128xf32>
    %71 = arith.addf %65, %70 : vector<16x128xf32>
    %c2_69 = arith.constant 2 : index
    %c0_70 = arith.constant 0 : index
    %72 = vector.load %arg9[%c2_69, %c0_70] : memref<18x576xf32, #tpu.memory_space<vmem>>, vector<16x576xf32>
    %73 = arith.truncf %72 : vector<16x576xf32> to vector<16x576xbf16>
    %c2_71 = arith.constant 2 : index
    %c0_72 = arith.constant 0 : index
    %c0_73 = arith.constant 0 : index
    %74 = vector.load %arg6[%c2_71, %c0_72, %c0_73] : memref<3x576x128xbf16, #tpu.memory_space<vmem>>, vector<1x576x128xbf16>
    %75 = vector.shape_cast %74 : vector<1x576x128xbf16> to vector<576x128xbf16>
    %cst_74 = arith.constant dense<0.000000e+00> : vector<16x128xf32>
    %76 = tpu.matmul %73, %75, %cst_74 {dimension_numbers = #tpu.dot_dimension_numbers<[1], [0], [0], [1], [0, 0, 1, 1], [], []>} : vector<16x576xbf16>, vector<576x128xbf16>, vector<16x128xf32> -> vector<16x128xf32>
    %77 = arith.addf %71, %76 : vector<16x128xf32>
    %c0_75 = arith.constant 0 : index
    %c0_76 = arith.constant 0 : index
    %78 = vector.load %arg7[%c0_75, %c0_76] : memref<1x128xf32, #tpu.memory_space<vmem>>, vector<1x128xf32>
    %79 = vector.broadcast %78 : vector<1x128xf32> to vector<16x128xf32>
    %80 = arith.addf %77, %79 : vector<16x128xf32>
    %cst_77 = arith.constant 0.000000e+00 : f32
    %81 = vector.broadcast %cst_77 : f32 to vector<16x128xf32>
    %82 = arith.maximumf %80, %81 : vector<16x128xf32>
    %c0_78 = arith.constant 0 : index
    %c0_79 = arith.constant 0 : index
    %c0_80 = arith.constant 0 : index
    %83 = vector.load %arg8[%c0_78, %c0_79, %c0_80] : memref<1x16x128xf32, #tpu.memory_space<vmem>>, vector<1x16x128xf32>
    %84 = vector.shape_cast %83 : vector<1x16x128xf32> to vector<16x128xf32>
    %85 = vector.shape_cast %82 : vector<16x128xf32> to vector<1x16x128xf32>
    tpu.vector_store %arg8[%c0_78, %c0_79, %c0_80], %85 {strides = array<i32>} : memref<1x16x128xf32, #tpu.memory_space<vmem>>, vector<1x16x128xf32>,
    return
  }
  func.func @transform_0(%arg0: i32) -> (i32, i32, i32) {
    %c0_i32 = arith.constant 0 : i32
    %c0_i32_0 = arith.constant 0 : i32
    %c0_i32_1 = arith.constant 0 : i32
    return %arg0, %c0_i32, %c0_i32_0 : i32, i32, i32
  }
  func.func @transform_1(%arg0: i32) -> (i32, i32, i32) {
    %c0_i32 = arith.constant 0 : i32
    %c0_i32_0 = arith.constant 0 : i32
    %c0_i32_1 = arith.constant 0 : i32
    %c0_i32_2 = arith.constant 0 : i32
    return %c0_i32, %c0_i32_0, %c0_i32_1 : i32, i32, i32
  }
  func.func @transform_2(%arg0: i32) -> (i32, i32) {
    %c0_i32 = arith.constant 0 : i32
    %c0_i32_0 = arith.constant 0 : i32
    %c0_i32_1 = arith.constant 0 : i32
    return %c0_i32, %c0_i32_0 : i32, i32
  }
  func.func @transform_3(%arg0: i32) -> (i32, i32, i32) {
    %c0_i32 = arith.constant 0 : i32
    %c0_i32_0 = arith.constant 0 : i32
    %c0_i32_1 = arith.constant 0 : i32
    %c0_i32_2 = arith.constant 0 : i32
    return %c0_i32, %c0_i32_0, %c0_i32_1 : i32, i32, i32
  }
  func.func @transform_4(%arg0: i32) -> (i32, i32) {
    %c0_i32 = arith.constant 0 : i32
    %c0_i32_0 = arith.constant 0 : i32
    %c0_i32_1 = arith.constant 0 : i32
    return %c0_i32, %c0_i32_0 : i32, i32
  }
  func.func @transform_5(%arg0: i32) -> (i32, i32, i32) {
    %c0_i32 = arith.constant 0 : i32
    %c0_i32_0 = arith.constant 0 : i32
    %c0_i32_1 = arith.constant 0 : i32
    %c0_i32_2 = arith.constant 0 : i32
    return %c0_i32, %c0_i32_0, %c0_i32_1 : i32, i32, i32
  }
  func.func @transform_6(%arg0: i32) -> (i32, i32) {
    %c0_i32 = arith.constant 0 : i32
    %c0_i32_0 = arith.constant 0 : i32
    %c0_i32_1 = arith.constant 0 : i32
    return %c0_i32, %c0_i32_0 : i32, i32
  }
  func.func @transform_7(%arg0: i32) -> (i32, i32, i32) {
    %c0_i32 = arith.constant 0 : i32
    %c0_i32_0 = arith.constant 0 : i32
    %c0_i32_1 = arith.constant 0 : i32
    return %arg0, %c0_i32, %c0_i32_0 : i32, i32, i32
  }
}

</mosaic_0001>

<bundles_post_ra>
// kernel: tpu_custom_call.1
= control target key start
LH: loop header
LB: loop body
LE: loop exit
PB: predicated region body
PF: predicated region fallthrough
CT: control target
= control target key end

     0   :  { %s9335_s0 = inlined_call_operand.hbm [shape: f32[2,16,64], index: 0, kind: input, shape index: {}]   ;;  %s9336_s1 = inlined_call_operand.hbm [shape: bf16[3,72,512], index: 1, kind: input, shape index: {}]   ;;  %s9337_s2 = inlined_call_operand.hbm [shape: f32[1,512], index: 2, kind: input, shape index: {}]   ;;  %s9338_s3 = inlined_call_operand.hbm [shape: bf16[3,576,512], index: 3, kind: input, shape index: {}]   ;;  %s9339_s4 = inlined_call_operand.hbm [shape: f32[1,512], index: 4, kind: input, shape index: {}]   ;;  %s9340_s5 = inlined_call_operand.hbm [shape: bf16[3,576,128], index: 5, kind: input, shape index: {}]   ;;  %s9341_s6 = inlined_call_operand.hbm [shape: f32[1,128], index: 6, kind: input, shape index: {}]   ;;  %s9342_s7 = inlined_call_operand.hbm [shape: f32[2,16,128], index: 7, kind: output, shape index: {}]  }
   0x1   :  { %9346 = sst [smem:[#allocation21_spill]] %s9336_s1 }
   0x2   :  { %12 = vsyncpa [#allocation4], 0 }
   0x3   :  { %14 = vsyncpa [#allocation4 + $0x1], 0 }
   0x4   :  { %15 = vsyncpa [#allocation7], 0 }
   0x5   :  { %16 = vsyncpa [#allocation10], 0 }
   0x6   :  { %17 = vsyncpa [#allocation13], 0 }
   0x7   :  { %18 = vsyncpa [#allocation5], 0 }
   0x8   :  { %20 = vsyncpa [#allocation5 + $0x1], 0  ;;  %s8664_s24 = smov 0   ;;  %s8666_s25 = smov 0  }
   0x9   :  { %s8668_s26 = smov 0   ;;  %s8670_s27 = smov 0  }
   0xa LB: > { %s8603_s28 = smov [#allocation6]   ;;  %s8685_s30 = sadd.s32 4294967295, %s8601_s27   ;;  %s8601_s27 = sphi %s8670_s27, %s9370_s27   ;;  %s8597_s26 = sphi %s8668_s26, %s9369_s26   ;;  %s8593_s25 = sphi %s8666_s25, %s9368_s25   ;;  %s8589_s24 = sphi %s8664_s24, %s9367_s24  }
   0xb   : > { %s221_s29 = sshll.u32 %s8603_s28, 4  ;;  %p6451_p0 = scmp.ge.s32.totalorder %s8601_s27, 1  ;;  %s8690_s29 = int_to_ptr.vmem [resolvable:$true] %s221_s29 }
   0xc   : > { %p9343_p1 = scmp.eq.s32.totalorder %s8685_s30, 0  ;;  %p209_p2 = scmp.lt.s32.totalorder %s8601_s27, 3 }
   0xd   : > { %s8604_s9 = smov [#allocation9]   ;;  %s8605_s12 = smov [#allocation12]  }
   0xe   : > { %p8692_p3 = pnand %p6451_p0, %p209_p2  ;;  %s245_s10 = sshll.u32 %s8604_s9, 4  ;;  %s8705_s10 = int_to_ptr.vmem [resolvable:$true] %s245_s10 }
   0xf   : > { %s269_s13 = sshll.u32 %s8605_s12, 4  ;;  %s9349_s1 = sld [smem:[#allocation21_spill]]  ;;  %s8707_s13 = int_to_ptr.vmem [resolvable:$true] %s269_s13 }
  0x10   : > { %s9347_s8 = scalar_select %p8692_p3, 1, 0 }
  0x11   : > { %p7391_p5 = pneg %p8692_p3 }
  0x13   : > { %p8701_p6 = pnand %p7391_p5, %p9343_p1 }
  0x15   : > { %s8325_s16 = scalar_lea.hbm %s9349_s1, 6912  ;;  %p8717_p8 = pneg %p8701_p6 }
  0x16   : > { %p8326_p7 = scmp.ne.s32.totalorder %s9349_s1, %s8325_s16  ;;  %p8332_p11 = scmp.lt.u32.totalorder %s8325_s16, %s9349_s1 }
  0x18   : > { %p8328_p9 = pnand %p8717_p8, %p8326_p7 }
  0x1a   : > { %p8329_p10 = pneg %p8328_p9 }
  0x1c   : > { %p8334_p12 = pnand %p8332_p11, %p8329_p10 }
  0x1e   : > { %8337 = shalt.err (!%p8334_p12)
}
  0x1f   : > { %s8338_s22 = scalar_lea.vmem %s8690_s29, 6912  ;;  %p8346_p5 = scmp.lt.s32.totalorder %s8690_s29, %s8690_s29 }
  0x20   : > { %p8339_p13 = scmp.ne.s32.totalorder %s8690_s29, %s8338_s22  ;;  %p8347_p4 = scmp.lt.s32.totalorder %s8338_s22, %s8338_s22 }
  0x22   : > { %p8341_p0 = pnand %p8339_p13, %p8717_p8  ;;  %p8348_p7 = por %p8347_p4, %p8346_p5 }
  0x24   : > { %p8342_p2 = pneg %p8341_p0 }
  0x26   : > { %p8349_p9 = pnand %p8348_p7, %p8342_p2 }
  0x28   : > { %8352 = shalt.err (!%p8349_p9)
}
  0x29   : > { %s8606_s23 = smov 256   ;;  %s8607_s28 = smov 16  }
  0x2a   : > { %7394 = dma.hbm_to_vmem [thread:$0]  (!%p8701_p6), %s9349_s1, 6912, %s8690_s29, [#allocation7], %s8606_s23, %s8606_s23, %s8607_s28  }
  0x2b   : > { %s8353_s16 = scalar_lea.hbm %s9338_s3, 55296 }
  0x2c   : > { %p8354_p4 = scmp.ne.s32.totalorder %s9338_s3, %s8353_s16  ;;  %p8360_p12 = scmp.lt.u32.totalorder %s8353_s16, %s9338_s3 }
  0x2e   : > { %p8356_p10 = pnand %p8354_p4, %p8717_p8 }
  0x30   : > { %p8357_p11 = pneg %p8356_p10 }
  0x32   : > { %p8362_p13 = pnand %p8360_p12, %p8357_p11 }
  0x34   : > { %8365 = shalt.err (!%p8362_p13)
}
  0x35   : > { %s8366_s29 = scalar_lea.vmem %s8705_s10, 55296  ;;  %p8374_p7 = scmp.lt.s32.totalorder %s8705_s10, %s8705_s10 }
  0x36   : > { %p8367_p0 = scmp.ne.s32.totalorder %s8705_s10, %s8366_s29  ;;  %p8375_p9 = scmp.lt.s32.totalorder %s8366_s29, %s8366_s29 }
  0x38   : > { %p8369_p2 = pnand %p8367_p0, %p8717_p8  ;;  %p8376_p4 = por %p8375_p9, %p8374_p7 }
  0x3a   : > { %p8370_p5 = pneg %p8369_p2 }
  0x3c   : > { %p8377_p10 = pnand %p8376_p4, %p8370_p5 }
  0x3e   : > { %8380 = shalt.err (!%p8377_p10)
}
  0x3f   : > { %7400 = dma.hbm_to_vmem [thread:$0]  (!%p8701_p6), %s9338_s3, 55296, %s8705_s10, [#allocation10], %s8606_s23, %s8606_s23, %s8607_s28  }
  0x40   : > { %s8381_s15 = scalar_lea.hbm %s9340_s5, 13824 }
  0x41   : > { %p8382_p11 = scmp.ne.s32.totalorder %s9340_s5, %s8381_s15  ;;  %p8388_p0 = scmp.lt.u32.totalorder %s8381_s15, %s9340_s5 }
  0x43   : > { %p8384_p12 = pnand %p8382_p11, %p8717_p8 }
  0x45   : > { %p8385_p13 = pneg %p8384_p12 }
  0x47   : > { %p8390_p2 = pnand %p8388_p0, %p8385_p13 }
  0x49   : > { %8393 = shalt.err (!%p8390_p2)
}
  0x4a   : > { %s8394_s10 = scalar_lea.vmem %s8707_s13, 13824  ;;  %p8402_p4 = scmp.lt.s32.totalorder %s8707_s13, %s8707_s13 }
  0x4b   : > { %p8395_p5 = scmp.ne.s32.totalorder %s8707_s13, %s8394_s10  ;;  %p8403_p10 = scmp.lt.s32.totalorder %s8394_s10, %s8394_s10 }
  0x4d   : > { %p8397_p7 = pnand %p8395_p5, %p8717_p8  ;;  %p8404_p11 = por %p8403_p10, %p8402_p4 }
  0x4f   : > { %p8398_p9 = pneg %p8397_p7 }
  0x51   : > { %p8405_p12 = pnand %p8404_p11, %p8398_p9 }
  0x53   : > { %8408 = shalt.err (!%p8405_p12)
}
  0x54   : > { %s8608_s23 = smov 64   ;;  %s8609_s28 = smov 4  }
  0x55   : > { %7406 = dma.hbm_to_vmem [thread:$0]  (!%p8701_p6), %s9340_s5, 13824, %s8707_s13, [#allocation13], %s8608_s23, %s8608_s23, %s8609_s28  }
  0x56   : > { %s8610_s22 = smov [#allocation8]   ;;  %s8611_s12 = smov [#allocation11]  }
  0x57   : > { %s235_s9 = sshll.u32 %s8610_s22, 4  ;;  %s259_s14 = sshll.u32 %s8611_s12, 4  ;;  %s236_s9 = int_to_ptr.vmem [resolvable:$true] %s235_s9  ;;  %s260_s14 = int_to_ptr.vmem [resolvable:$true] %s259_s14 }
  0x58   : > { %s8409_s17 = scalar_lea.hbm %s9337_s2, 64 }
  0x59   : > { %p8410_p13 = scmp.ne.s32.totalorder %s9337_s2, %s8409_s17  ;;  %p8416_p5 = scmp.lt.u32.totalorder %s8409_s17, %s9337_s2 }
  0x5b   : > { %p8412_p0 = pnand %p8410_p13, %p8717_p8 }
  0x5d   : > { %p8413_p2 = pneg %p8412_p0 }
  0x5f   : > { %p8418_p7 = pnand %p8416_p5, %p8413_p2 }
  0x61   : > { %8421 = shalt.err (!%p8418_p7)
}
  0x62   : > { %s8422_s13 = scalar_lea.vmem %s236_s9, 64  ;;  %p8430_p11 = scmp.lt.s32.totalorder %s236_s9, %s236_s9 }
  0x63   : > { %p8423_p9 = scmp.ne.s32.totalorder %s236_s9, %s8422_s13  ;;  %p8431_p12 = scmp.lt.s32.totalorder %s8422_s13, %s8422_s13 }
  0x65   : > { %p8425_p4 = pnand %p8423_p9, %p8717_p8  ;;  %p8432_p1 = por %p8431_p12, %p8430_p11 }
  0x67   : > { %p8426_p10 = pneg %p8425_p4 }
  0x69   : > { %p8433_p3 = pnand %p8432_p1, %p8426_p10 }
  0x6b   : > { %8436 = shalt.err (!%p8433_p3)
}
  0x6c   : > { %7397 = dma.hbm_to_vmem [thread:$0]  (!%p8701_p6), %s9337_s2, 64, %s236_s9, [#allocation7]  }
  0x6d   : > { %s8437_s29 = scalar_lea.hbm %s9339_s4, 64 }
  0x6e   : > { %p8438_p13 = scmp.ne.s32.totalorder %s9339_s4, %s8437_s29  ;;  %p8444_p3 = scmp.lt.u32.totalorder %s8437_s29, %s9339_s4 }
  0x70   : > { %p8440_p0 = pnand %p8438_p13, %p8717_p8 }
  0x72   : > { %p8441_p1 = pneg %p8440_p0 }
  0x74   : > { %p8446_p2 = pnand %p8444_p3, %p8441_p1 }
  0x76   : > { %8449 = shalt.err (!%p8446_p2)
}
  0x77   : > { %s8450_s17 = scalar_lea.vmem %s260_s14, 64  ;;  %p8458_p4 = scmp.lt.s32.totalorder %s260_s14, %s260_s14 }
  0x78   : > { %p8451_p5 = scmp.ne.s32.totalorder %s260_s14, %s8450_s17  ;;  %p8459_p10 = scmp.lt.s32.totalorder %s8450_s17, %s8450_s17 }
  0x7a   : > { %p8453_p7 = pnand %p8451_p5, %p8717_p8  ;;  %p8460_p11 = por %p8459_p10, %p8458_p4 }
  0x7c   : > { %p8454_p9 = pneg %p8453_p7 }
  0x7e   : > { %p8461_p12 = pnand %p8460_p11, %p8454_p9 }
  0x80   : > { %8464 = shalt.err (!%p8461_p12)
}
  0x81   : > { %7403 = dma.hbm_to_vmem [thread:$0]  (!%p8701_p6), %s9339_s4, 64, %s260_s14, [#allocation10]  }
  0x82   : > { %s8612_s20 = smov [#allocation14]   ;;  %s8465_s28 = scalar_lea.hbm %s9341_s6, 16 }
  0x83   : > { %s283_s10 = sshll.u32 %s8612_s20, 4  ;;  %p8466_p13 = scmp.ne.s32.totalorder %s9341_s6, %s8465_s28  ;;  %s284_s10 = int_to_ptr.vmem [resolvable:$true] %s283_s10 }
  0x84   : > { %p8472_p3 = scmp.lt.u32.totalorder %s8465_s28, %s9341_s6 }
  0x85   : > { %p8468_p0 = pnand %p8466_p13, %p8717_p8 }
  0x87   : > { %p8469_p1 = pneg %p8468_p0 }
  0x89   : > { %p8474_p2 = pnand %p8472_p3, %p8469_p1 }
  0x8b   : > { %8477 = shalt.err (!%p8474_p2)
}
  0x8c   : > { %s8478_s14 = scalar_lea.vmem %s284_s10, 16  ;;  %s8485_s12 = scalar_lea.vmem %s284_s10, 32 }
  0x8d   : > { %p8479_p5 = scmp.ne.s32.totalorder %s284_s10, %s8478_s14  ;;  %p8486_p4 = scmp.lt.s32.totalorder %s284_s10, %s284_s10 }
  0x8e   : > { %p8487_p10 = scmp.lt.s32.totalorder %s8485_s12, %s8478_s14 }
  0x8f   : > { %p8481_p7 = pnand %p8479_p5, %p8717_p8 }
  0x90   : > { %p8488_p11 = por %p8487_p10, %p8486_p4 }
  0x91   : > { %p8482_p9 = pneg %p8481_p7 }
  0x93   : > { %p8489_p12 = pnand %p8488_p11, %p8482_p9 }
  0x95   : > { %8492 = shalt.err (!%p8489_p12)
}
  0x96   : > { %7409 = dma.hbm_to_vmem [thread:$0]  (!%p8701_p6), %s9341_s6, 16, %s284_s10, [#allocation13]  }
  0x97   : > { %s6450_s19 = sadd.s32 4294967294, %s8601_s27   ;;  %s8840_s11 = sadd.s32 1, %s8601_s27  }
  0x98   : > { %s30_s17 = ssub.s32 %s8601_s27, %s8840_s11  ;;  %s33_s9 = sadd.s32 1, %s8597_s26 }
  0x99   : > { %p31_p8 = scmp.eq.s32.totalorder %s30_s17, 0  ;;  %p40_p13 = scmp.ne.s32.totalorder %s8597_s26, %s8593_s25 }
  0x9a   : > { %p41_p0 = scmp.eq.s32.totalorder %s8601_s27, 0  ;;  %p46_p1 = scmp.ne.s32.totalorder %s8593_s25, %s8589_s24 }
  0x9b   : > { %s8851_s18 = scalar_select %p31_p8, %s8597_s26, %s33_s9  }
  0x9c   : > { %p8853_p3 = por %p41_p0, %p40_p13  ;;  %p9352_p2 = scmp.eq.s32.totalorder %s8685_s30, 0 }
  0x9d   : > { %p196_p5 = scmp.eq.s32.totalorder %s8685_s30, 1  ;;  %p202_p7 = scmp.eq.s32.totalorder %s6450_s19, 1 }
  0x9e   : > { %p8859_p6 = por %p9352_p2, %p46_p1  ;;  %p7424_p9 = scmp.lt.s32.totalorder %s8601_s27, 2 }
  0x9f   : > { %s294_s13 = sand.u32 1, %s8597_s26   ;;  %p8866_p4 = por %p196_p5, %p40_p13 }
  0xa0   : > { %p8870_p10 = por %p202_p7, %p46_p1  ;;  %s6459_s1 = sshll.u32 %s294_s13, 4 }
  0xa1   : > { %s9354_s23 = scalar_select %p8866_p4, 1, 0 }
  0xa2   : > { %s9355_s28 = scalar_select %p8870_p10, 1, 0 }
  0xa3   : > { %s7098_s21 = sshll.u32 %s8601_s27, 8  ;;  %s298_s12 = scalar_lea.vmem [#allocation3], %s6459_s1 }
  0xa4   : > { %s8878_s14 = scalar_lea.hbm %s9335_s0, %s7098_s21  ;;  %s305_s15 = sshll.u32 %s298_s12, 4  ;;  %s8880_s15 = int_to_ptr.vmem [resolvable:$true] %s305_s15 }
  0xa5   : > { %p8884_p11 = pnand %p7424_p9, %p8853_p3  ;;  %s8888_s19 = scalar_lea.sflag [#allocation4], %s294_s13 }
  0xa6   : > { %s8493_s17 = scalar_lea.hbm %s8878_s14, 256  ;;  %s8498_s20 = scalar_lea.hbm %s9335_s0, 512 }
  0xa7   : > { %p8494_p12 = scmp.ne.s32.totalorder %s8878_s14, %s8493_s17  ;;  %p8495_p8 = pneg %p8884_p11 }
  0xa8   : > { %p8499_p1 = scmp.lt.u32.totalorder %s8878_s14, %s9335_s0  ;;  %p8500_p3 = scmp.lt.u32.totalorder %s8498_s20, %s8493_s17 }
  0xa9   : > { %p8496_p13 = pnand %p8495_p8, %p8494_p12  ;;  %p8502_p5 = scmp.lt.u32.totalorder %s8493_s17, %s8878_s14 }
  0xaa   : > { %p8501_p2 = por %p8500_p3, %p8499_p1 }
  0xab   : > { %p8497_p0 = pneg %p8496_p13 }
  0xac   : > { %p8503_p7 = por %p8502_p5, %p8501_p2 }
  0xae   : > { %p8504_p9 = pnand %p8503_p7, %p8497_p0 }
  0xb0   : > { %8507 = shalt.err (!%p8504_p9)
}
  0xb1   : > { %s8508_s13 = scalar_lea.vmem %s8880_s15, 256  ;;  %s8613_s22 = smov [#allocation3]  }
  0xb2   : > { %p8509_p12 = scmp.ne.s32.totalorder %s8880_s15, %s8508_s13  ;;  %s8513_s12 = sshll.u32 %s8613_s22, 4  ;;  %s8514_s12 = int_to_ptr.vmem [resolvable:$false] %s8513_s12 }
  0xb3   : > { %s8515_s9 = scalar_lea.vmem %s8514_s12, 512  ;;  %p8516_p4 = scmp.lt.s32.totalorder %s8880_s15, %s8514_s12 }
  0xb4   : > { %p8511_p13 = pnand %p8509_p12, %p8495_p8  ;;  %p8517_p1 = scmp.lt.s32.totalorder %s8515_s9, %s8508_s13 }
  0xb6   : > { %p8512_p10 = pneg %p8511_p13  ;;  %p8518_p3 = por %p8517_p1, %p8516_p4 }
  0xb8   : > { %p8519_p2 = pnand %p8518_p3, %p8512_p10 }
  0xba   : > { %8522 = shalt.err (!%p8519_p2)
}
  0xbb   : > { %s8614_s17 = smov 128   ;;  %s8615_s1 = smov 8  }
  0xbc   : > { %7413 = dma.hbm_to_vmem [thread:$0]  (!%p8884_p11), %s8878_s14, 256, %s8880_s15, %s8888_s19, %s8614_s17, %s8614_s17, %s8615_s1  }
  0xbd   : > { %p9357_p8 = scmp.ne.s32.totalorder %s9347_s8, 0 }
  0xbe   : > { %s8919_s20 = sand.u32 (!%p9357_p8), 1, %s8593_s25  }
  0xbf   : > { %317 = sbr.rel (%p9357_p8) target bundleno = 1808 (0x710), region = 48  ;;  %s6463_s21 = sshll.u32 (!%p9357_p8), %s8919_s20, 4 }
  0xc0   : > { %s320_s29 = scalar_lea.sflag (!%p9357_p8), [#allocation4], %s8919_s20  ;;  %s323_s13 = scalar_lea.vmem (!%p9357_p8), [#allocation3], %s6463_s21 }
  0xc6   : > { %8568 = dma.done.wait (%p8859_p6), %s320_s29, 256  }
  0xc7   : > { %8570 = vsyncadd (%p8859_p6), %s320_s29, 4294967040  ;;  %p9358_p4 = scmp.eq.s32.totalorder %s8685_s30, 0 }
  0xc9   : > { %8572 = dma.done.wait (%p9358_p4), [#allocation7], 6976   ;;  %p9359_p10 = pmov %p9358_p4 }
  0xca   : > { %p9360_p11 = pmov %p9358_p4 }
  0xcb   : > { %8574 = vsyncadd (%p9359_p10), [#allocation7], 4294960320 }
  0xcc   : > { %8576 = dma.done.wait (%p9360_p11), [#allocation10], 55360   ;;  %p9361_p0 = pmov %p9358_p4 }
  0xce   : > { %8578 = vsyncadd (%p9361_p0), [#allocation10], 4294911936  ;;  %p9362_p5 = pmov %p9361_p0 }
  0xcf   : > { %p9363_p7 = pmov %p9361_p0 }
  0xd0   : > { %8580 = dma.done.wait (%p9362_p5), [#allocation13], 13840  }
  0xd1   : > { %8582 = vsyncadd (%p9363_p7), [#allocation13], 4294953456  ;;  %v8616_v0 = vmov 0.0   ;;  %v8617_v1 = vmov 0   ;;  %v396_v2 = vld [vmem:[%s323_s13] sm:$0xff]  ;;  %v397_v3 = vld [vmem:[%s323_s13 + $0x8] sm:$0xff] }
  0xd2   : > { %379 = vst [vmem:[#allocation2] sm:$0xff] %v8616_v0  ;;  %385 = vst [vmem:[#allocation2 + $0x28] sm:$0xff] %v8616_v0  ;;  %615 = vmatprep.mubr.bf16.mxu0 %v8617_v1  ;;  %658 = vmatprep.mubr.bf16.mxu1 %v8617_v1  ;;  %vm400_vm0 = vcmask 1040384   ;;  %v401_v4 = vrot.slane %v396_v2, 7  ;;  %v402_v5 = vrot.slane %v397_v3, 7  ;;  %s8618_s8 = smov 4  }
  0xd3   : > { %390 = vst [vmem:[#allocation2 + $0x50] sm:$0x3] %v8616_v0  ;;  %391 = vst [vmem:[#allocation2 + $0x58] sm:$0x3] %v8616_v0  ;;  %v7483_v6 = vld [vmem:[#allocation6 + $0x94] ss:$16 sps:$4 sm:$0xff]  }
  0xd4   : > { %392 = vst [vmem:[#allocation2 + $0x60] sm:$0x3] %v8616_v0  ;;  %393 = vst [vmem:[#allocation2 + $0x68] sm:$0x3] %v8616_v0  ;;  %v7485_v7 = vld [vmem:[#allocation6 + $0x9c] ss:$16 sps:$4 sm:$0xff]   ;;  %404 = vrot.lane.b32.xlu0 %v401_v4, %s8618_s8  ;;  %408 = vrot.lane.b32.xlu1 %v402_v5, %s8618_s8  ;;  %v403_v10 = vsel %vm400_vm0, %v401_v4, %v402_v5 }
  0xd5   : > { %1127 = vst [vmem:[#allocation2 + $0x8] sm:$0xff] %v8616_v0  ;;  %1128 = vst [vmem:[#allocation2 + $0x10] sm:$0xff] %v8616_v0  ;;  %v7487_v8 = vld [vmem:[#allocation6 + $0x90] ss:$16 sps:$4 sm:$0xff]   ;;  %v7488_v9 = vld [vmem:[#allocation6 + $0x98] ss:$16 sps:$4 sm:$0xff]   ;;  %583 = vmatprep.subr.bf16.mxu0 %v7483_v6  ;;  %626 = vmatprep.subr.bf16.mxu1 %v7485_v7 }
  0xd6   : > { %1129 = vst [vmem:[#allocation2 + $0x18] sm:$0xff] %v8616_v0  ;;  %1137 = vst [vmem:[#allocation2 + $0x58] sm:$0x3] %v8616_v0  ;;  %v7489_v11 = vld [vmem:[#allocation6 + $0xb4] ss:$16 sps:$4 sm:$0xff]   ;;  %584 = vmatpush1.bf16.msra.mxu0 %v7487_v8  ;;  %627 = vmatpush1.bf16.msra.mxu1 %v7488_v9  ;;  %v462_v22 = vld [vmem:[#allocation6 + $0x118] sm:$0xff] }
  0xd7   : > { %1138 = vst [vmem:[#allocation2 + $0x60] sm:$0x3] %v8616_v0  ;;  %1139 = vst [vmem:[#allocation2 + $0x68] sm:$0x3] %v8616_v0  ;;  %v7491_v12 = vld [vmem:[#allocation6 + $0xbc] ss:$16 sps:$4 sm:$0xff]   ;;  %585 = vmatprep.subr.bf16.mxu0 %v7489_v11  ;;  %v6490_v26 = vcombine.high %v462_v22, %v462_v22  ;;  %v6489_v28 = vcombine.low %v462_v22, %v462_v22 }
  0xd8   : > { %v7493_v13 = vld [vmem:[#allocation6 + $0xb0] ss:$16 sps:$4 sm:$0xff]   ;;  %v7494_v14 = vld [vmem:[#allocation6 + $0xb8] ss:$16 sps:$4 sm:$0xff]   ;;  %v7495_v15 = vld [vmem:[#allocation6 + $0xd4] ss:$16 sps:$4 sm:$0xff]   ;;  %406 = vrot.lane.b32.xlu0 %v403_v10, %s8618_s8  ;;  %628 = vmatprep.subr.bf16.mxu1 %v7491_v12 }
  0xd9   : > { %v7497_v16 = vld [vmem:[#allocation6 + $0xdc] ss:$16 sps:$4 sm:$0xff]   ;;  %v7499_v17 = vld [vmem:[#allocation6 + $0xd0] ss:$16 sps:$4 sm:$0xff]   ;;  %v7500_v18 = vld [vmem:[#allocation6 + $0xd8] ss:$16 sps:$4 sm:$0xff]  }
  0xda   : > { %586 = vmatpush1.bf16.msra.mxu0 %v7493_v13  ;;  %629 = vmatpush1.bf16.msra.mxu1 %v7494_v14  ;;  %v7501_v19 = vld [vmem:[#allocation6 + $0xf4] ss:$16 sps:$4 sm:$0xff]   ;;  %v7503_v20 = vld [vmem:[#allocation6 + $0xfc] ss:$16 sps:$4 sm:$0xff]   ;;  %v7505_v23 = vld [vmem:[#allocation6 + $0xf0] ss:$16 sps:$4 sm:$0xff]  }
  0xdb   : > { %587 = vmatprep.subr.bf16.mxu0 %v7495_v15  ;;  %630 = vmatprep.subr.bf16.mxu1 %v7497_v16  ;;  %v461_v21 = vld [vmem:[#allocation6 + $0x110] sm:$0xff]  ;;  %v7506_v24 = vld [vmem:[#allocation6 + $0xf8] ss:$16 sps:$4 sm:$0xff]   ;;  %vm570_vm1 = vcmask 1043456   ;;  %v7516_v32 = vld [vmem:[#allocation6 + $0xc] ss:$16 sps:$4 sm:$0xff]  }
  0xdc   : > { %v6488_v25 = vcombine.high %v461_v21, %v461_v21  ;;  %v6487_v27 = vcombine.low %v461_v21, %v461_v21  ;;  %v7513_v29 = vld [vmem:[#allocation6 + $0x4] ss:$16 sps:$4 sm:$0xff]   ;;  %v578_v31 = vsel %vm570_vm1, %v6489_v28, 0  ;;  %vm413_vm2 = vcmask 556065   ;;  %v7511_v46 = vld [vmem:[#allocation6] ss:$16 sps:$4 sm:$0xff]  }
  0xdd   : > { %vm417_vm3 = vcmask 548896   ;;  %vm415_vm4 = vcmask 556064   ;;  %v7514_v47 = vld [vmem:[#allocation6 + $0x8] ss:$16 sps:$4 sm:$0xff]   ;;  %vm463_vm5 = vsmask.f32 7424 }
  0xde   : > { %588 = vmatpush1.bf16.msra.mxu0 %v7499_v17  ;;  %631 = vmatpush1.bf16.msra.mxu1 %v7500_v18  ;;  %v572_v30 = vsel %vm570_vm1, %v6487_v27, 0  ;;  %v7519_v51 = vld [vmem:[#allocation6 + $0x24] ss:$16 sps:$4 sm:$0xff]   ;;  %v7522_v52 = vld [vmem:[#allocation6 + $0x2c] ss:$16 sps:$4 sm:$0xff]   ;;  %vm566_vm6 = vcmask 588800  }
  0xdf   : > { %589 = vmatprep.subr.bf16.mxu0 %v7501_v19  ;;  %632 = vmatprep.subr.bf16.mxu1 %v7503_v20  ;;  %v7517_v55 = vld [vmem:[#allocation6 + $0x20] ss:$16 sps:$4 sm:$0xff]   ;;  %v7520_v56 = vld [vmem:[#allocation6 + $0x28] ss:$16 sps:$4 sm:$0xff]   ;;  %v7525_v57 = vld [vmem:[#allocation6 + $0x44] ss:$16 sps:$4 sm:$0xff]  }
  0xe0   : > { %v7528_v58 = vld [vmem:[#allocation6 + $0x4c] ss:$16 sps:$4 sm:$0xff]   ;;  %v7523_v59 = vld [vmem:[#allocation6 + $0x40] ss:$16 sps:$4 sm:$0xff]   ;;  %v7526_v60 = vld [vmem:[#allocation6 + $0x48] ss:$16 sps:$4 sm:$0xff]  }
  0xe1   : > { %v7531_v61 = vld [vmem:[#allocation6 + $0x64] ss:$16 sps:$4 sm:$0xff]   ;;  %v7534_v62 = vld [vmem:[#allocation6 + $0x6c] ss:$16 sps:$4 sm:$0xff]   ;;  %v7529_v2 = vld [vmem:[#allocation6 + $0x60] ss:$16 sps:$4 sm:$0xff]  }
  0xe2   : > { %590 = vmatpush1.bf16.msra.mxu0 %v7505_v23  ;;  %633 = vmatpush1.bf16.msra.mxu1 %v7506_v24  ;;  %v438_v63 = vld [vmem:[#allocation6 + $0x80] sm:$0xff]  ;;  %v7532_v3 = vld [vmem:[#allocation6 + $0x68] ss:$16 sps:$4 sm:$0xff]   ;;  %v7544_v9 = vld [vmem:[#allocation6 + $0x12c] ss:$16 sps:$4 sm:$0xff]   ;;  %vm885_vm7 = vcmask 1046528  }
  0xe3   : > { %6491 = vmatprep.subr.msk.bf16.mxu0 %vm570_vm1, %v6488_v25  ;;  %6493 = vmatprep.subr.msk.bf16.mxu1 %vm570_vm1, %v6490_v26  ;;  %v6512_v4 = vcombine.high %v438_v63, %v438_v63  ;;  %v6511_v6 = vcombine.low %v438_v63, %v438_v63  ;;  %v7541_v8 = vld [vmem:[#allocation6 + $0x124] ss:$16 sps:$4 sm:$0xff]   ;;  %v7539_v12 = vld [vmem:[#allocation6 + $0x120] ss:$16 sps:$4 sm:$0xff]   ;;  %v7542_v13 = vld [vmem:[#allocation6 + $0x128] ss:$16 sps:$4 sm:$0xff]  }
  0xe4   : > { %v7547_v14 = vld [vmem:[#allocation6 + $0x144] ss:$16 sps:$4 sm:$0xff]   ;;  %v7550_v15 = vld [vmem:[#allocation6 + $0x14c] ss:$16 sps:$4 sm:$0xff]   ;;  %v7545_v17 = vld [vmem:[#allocation6 + $0x140] ss:$16 sps:$4 sm:$0xff]  }
  0xe5   : > { %v763_v10 = vsel %vm570_vm1, %v6511_v6, 0  ;;  %v7548_v18 = vld [vmem:[#allocation6 + $0x148] ss:$16 sps:$4 sm:$0xff]   ;;  %v7553_v19 = vld [vmem:[#allocation6 + $0x164] ss:$16 sps:$4 sm:$0xff]   ;;  %s8619_s10 = smov 32  }
  0xe6   : > { %592 = vmatpush1.bf16.msra.mxu0 %v572_v30  ;;  %635 = vmatpush1.bf16.msra.mxu1 %v578_v31  ;;  %v7556_v20 = vld [vmem:[#allocation6 + $0x16c] ss:$16 sps:$4 sm:$0xff]   ;;  %v7551_v21 = vld [vmem:[#allocation6 + $0x160] ss:$16 sps:$4 sm:$0xff]   ;;  %v7554_v22 = vld [vmem:[#allocation6 + $0x168] ss:$16 sps:$4 sm:$0xff]  }
  0xe7   : > { %774 = vmatprep.subr.bf16.mxu0 %v7513_v29  ;;  %817 = vmatprep.subr.bf16.mxu1 %v7516_v32  ;;  %v7559_v23 = vld [vmem:[#allocation6 + $0x184] ss:$16 sps:$4 sm:$0xff]   ;;  %v7562_v24 = vld [vmem:[#allocation6 + $0x18c] ss:$16 sps:$4 sm:$0xff]   ;;  %v7557_v27 = vld [vmem:[#allocation6 + $0x180] ss:$16 sps:$4 sm:$0xff]  }
  0xe8   : > { %v881_v25 = vld [vmem:[#allocation6 + $0x1a0] sm:$0xff]  ;;  %v882_v26 = vld [vmem:[#allocation6 + $0x1a8] sm:$0xff]  ;;  %vm383_vm8 = vcmask 523264   ;;  %vm394_vm9 = vcmask 517120   ;;  %vm1210_vm10 = vcmask 1047809   ;;  %vm1185_vm11 = vcmask 261120  }
  0xe9   : > { %v7560_v28 = vld [vmem:[#allocation6 + $0x188] ss:$16 sps:$4 sm:$0xff]   ;;  %v6536_v29 = vcombine.high %v881_v25, %v881_v25  ;;  %v6538_v30 = vcombine.high %v882_v26, %v882_v26  ;;  %v6535_v31 = vcombine.low %v881_v25, %v881_v25  ;;  %v6537_v32 = vcombine.low %v882_v26, %v882_v26  ;;  %v7600_v63 = vld [vmem:[#allocation9 + $0x528] ss:$16 sps:$4 sm:$0xff]   ;;  %v7614_v6 = vld [vmem:[#allocation9 + $0x56c] ss:$16 sps:$4 sm:$0xff]  }
  0xea   : > { %v7627_v26 = vld [vmem:[#allocation9 + $0x5c0] ss:$16 sps:$4 sm:$0xff]   ;;  %vm1217_vm12 = vcmask 1047808   ;;  %vm1223_vm13 = vcmask 1040640   ;;  %vm1215_vm14 = vcmask 261121   ;;  %vm1228_vm15 = vcmask 253952  }
  0xeb   : > { %s377_s14 = scalar_lea.vmem [#allocation15], %s6463_s21  ;;  %s7099_s16 = sshll.u32 %s8685_s30, 8 }
  0xec   : > { %s6320_s15 = sshll.u32 %s377_s14, 4  ;;  %s9291_s12 = scalar_lea.hbm %s9342_s7, %s7099_s16  ;;  %s9286_s15 = int_to_ptr.vmem [resolvable:$true] %s6320_s15 }
  0xed   : > { %s6307_s9 = scalar_lea.sflag [#allocation5], %s8919_s20  ;;  %s8523_s17 = scalar_lea.vmem %s9286_s15, 256 }
  0xee   : > { %p8524_p6 = scmp.ne.s32.totalorder %s9286_s15, %s8523_s17  ;;  %p9364_p9 = scmp.ne.s32.totalorder %s9354_s23, 0 }
  0xef   : > { %s8621_s30 = smov [#allocation15]  }
  0xf0   : > { %p8525_p12 = pnand %p8524_p6, %p9364_p9  ;;  %s8527_s1 = sshll.u32 %s8621_s30, 4  ;;  %s8528_s1 = int_to_ptr.vmem [resolvable:$false] %s8527_s1 }
  0xf1   : > { %s8529_s21 = scalar_lea.vmem %s8528_s1, 512  ;;  %p8530_p1 = scmp.lt.s32.totalorder %s9286_s15, %s8528_s1 }
  0xf2   : > { %p8526_p13 = pneg %p8525_p12  ;;  %p8531_p3 = scmp.lt.s32.totalorder %s8529_s21, %s8523_s17 }
  0xf4   : > { %p8532_p2 = por %p8531_p3, %p8530_p1 }
  0xf6   : > { %p8533_p8 = pnand %p8532_p2, %p8526_p13 }
 0x146   : > { %v405_v33 = vpop.permute.xlu0 %404  ;;  %v409_v34 = vpop.permute.xlu1 %408 }
 0x147   : > { %414 = vst.msk [vmem:[#allocation2] sm:$0xfe] %vm413_vm2, %v405_v33 }
 0x148   : > { %418 = vst.msk [vmem:[#allocation2 + $0x50] sm:$0x1] %vm417_vm3, %v409_v34 }
 0x14a   : > { %v407_v35 = vpop.permute.xlu0 %406 }
 0x14b   : > { %416 = vst.msk [vmem:[#allocation2 + $0x28] sm:$0xff] %vm415_vm4, %v407_v35  ;;  %v983_v35 = vsel %vm570_vm1, %v6535_v31, 0  ;;  %v7638_v31 = vld [vmem:[#allocation9 + $0x5ec] ss:$16 sps:$4 sm:$0xff]  }
 0x14e   : > { %v440_v38 = vld [vmem:[#allocation2] sm:$0xfe] }
 0x14f   : > { %v441_v36 = vld [vmem:[#allocation2 + $0x50] sm:$0x1]  ;;  %v8963_v40 = vld [vmem:[#allocation2] sm:$0xff] }
 0x150   : > { %v8960_v37 = vld [vmem:[#allocation2 + $0x50] sm:$0x3]  ;;  %v443_v39 = vpack.c.bf16 %v441_v36, %v441_v36  ;;  %v8965_v41 = vld [vmem:[#allocation2] sm:$0xfc]  ;;  %v989_v36 = vsel %vm570_vm1, %v6537_v32, 0 }
 0x151   : > { %1136 = vst [vmem:[#allocation2 + $0x50] sm:$0x3] %v8616_v0  ;;  %1126 = vst [vmem:[#allocation2] sm:$0xff] %v8616_v0  ;;  %v863_v34 = vpack.c.bf16 %v8960_v37, %v8960_v37  ;;  %v7567_v37 = vld [vmem:[#allocation9 + $0x480] ss:$16 sps:$4 sm:$0xff]  }
 0x152   : > { %v8968_v42 = vld [vmem:[#allocation2 + $0x28] sm:$0xff]  ;;  %v472_v44 = vshll.u32 %v443_v39, 16 }
 0x153   : > { %v442_v43 = vpack.c.bf16 %v8968_v42, %v440_v38  ;;  %1131 = vst [vmem:[#allocation2 + $0x28] sm:$0xff] %v8616_v0  ;;  %v439_v0 = vld [vmem:[#allocation6 + $0x88] sm:$0xff]  ;;  %v421_v16 = vpack.c.bf16 %v8968_v42, %v8963_v40  ;;  %v862_v33 = vpack.c.bf16 %v8968_v42, %v8965_v41  ;;  %v887_v39 = vrot.slane %v863_v34, 1  ;;  %v7633_v34 = vld [vmem:[#allocation9 + $0x5e0] ss:$16 sps:$4 sm:$0xff]  }
 0x154   : > { %v474_v50 = vrot.slane %v472_v44, 1  ;;  %v6514_v5 = vcombine.high %v439_v0, %v439_v0  ;;  %v6513_v7 = vcombine.low %v439_v0, %v439_v0  ;;  %v7569_v41 = vld [vmem:[#allocation9 + $0x484] ss:$16 sps:$4 sm:$0xff]   ;;  %v7570_v42 = vld [vmem:[#allocation9 + $0x488] ss:$16 sps:$4 sm:$0xff]  }
 0x155   : > { %v467_v45 = vshll.u32 %v442_v43, 16  ;;  %v465_v48 = vshrl.u32 %v442_v43, 16  ;;  %v886_v38 = vrot.slane %v862_v33, 1  ;;  %v7572_v43 = vld [vmem:[#allocation9 + $0x48c] ss:$16 sps:$4 sm:$0xff]  }
 0x156   : > { %v769_v11 = vsel %vm570_vm1, %v6513_v7, 0  ;;  %v7575_v44 = vld [vmem:[#allocation9 + $0x4a4] ss:$16 sps:$4 sm:$0xff]   ;;  %v7609_v7 = vld [vmem:[#allocation9 + $0x560] ss:$16 sps:$4 sm:$0xff]  }
 0x157   : > { %v469_v49 = vrot.slane %v467_v45, 1  ;;  %v888_v40 = vsel %vm885_vm7, %v886_v38, %v887_v39  ;;  %v7578_v45 = vld [vmem:[#allocation9 + $0x4ac] ss:$16 sps:$4 sm:$0xff]   ;;  %v7605_v0 = vld [vmem:[#allocation9 + $0x544] ss:$16 sps:$4 sm:$0xff]  }
 0x159   : > { %v470_v53 = vor.u32 %v469_v49, %v465_v48  ;;  %v7581_v48 = vld [vmem:[#allocation9 + $0x4c4] ss:$16 sps:$4 sm:$0xff]   ;;  %v7584_v49 = vld [vmem:[#allocation9 + $0x4cc] ss:$16 sps:$4 sm:$0xff]  }
 0x15b   : > { %v475_v54 = vsel %vm463_vm5, %v470_v53, %v474_v50  ;;  %v7579_v50 = vld [vmem:[#allocation9 + $0x4c0] ss:$16 sps:$4 sm:$0xff]   ;;  %v7590_v53 = vld [vmem:[#allocation9 + $0x4ec] ss:$16 sps:$4 sm:$0xff]  }
 0x15c   : > { %6492 = vmatmul.mubr.msk.bf16.vlgmr.msra.gmra.mrb[0].mxu0 %vm566_vm6, %v475_v54  ;;  %6494 = vmatmul.mubr.msk.bf16.vlgmr.msra.gmra.mrb[0].mxu1 %vm566_vm6, %v475_v54  ;;  %v7585_v54 = vld [vmem:[#allocation9 + $0x4e0] ss:$16 sps:$4 sm:$0xff]  }
 0x15d   : > { %775 = vmatpush1.bf16.msra.mxu0 %v7511_v46  ;;  %818 = vmatpush1.bf16.msra.mxu1 %v7514_v47  ;;  %v7573_v46 = vld [vmem:[#allocation9 + $0x4a0] ss:$16 sps:$4 sm:$0xff]   ;;  %v7576_v47 = vld [vmem:[#allocation9 + $0x4a8] ss:$16 sps:$4 sm:$0xff]  }
 0x15e   : > { %776 = vmatprep.subr.bf16.mxu0 %v7519_v51  ;;  %819 = vmatprep.subr.bf16.mxu1 %v7522_v52  ;;  %v7582_v51 = vld [vmem:[#allocation9 + $0x4c8] ss:$16 sps:$4 sm:$0xff]   ;;  %v7587_v52 = vld [vmem:[#allocation9 + $0x4e4] ss:$16 sps:$4 sm:$0xff]  }
 0x15f   : > { %806 = vmatprep.mubr.bf16.mxu0 %v8617_v1  ;;  %849 = vmatprep.mubr.bf16.mxu1 %v8617_v1 }
 0x161   : > { %777 = vmatpush1.bf16.msra.mxu0 %v7517_v55  ;;  %820 = vmatpush1.bf16.msra.mxu1 %v7520_v56  ;;  %v7588_v55 = vld [vmem:[#allocation9 + $0x4e8] ss:$16 sps:$4 sm:$0xff]   ;;  %v7593_v56 = vld [vmem:[#allocation9 + $0x504] ss:$16 sps:$4 sm:$0xff]  }
 0x162   : > { %778 = vmatprep.subr.bf16.mxu0 %v7525_v57  ;;  %821 = vmatprep.subr.bf16.mxu1 %v7528_v58  ;;  %v7596_v57 = vld [vmem:[#allocation9 + $0x50c] ss:$16 sps:$4 sm:$0xff]   ;;  %v7591_v58 = vld [vmem:[#allocation9 + $0x500] ss:$16 sps:$4 sm:$0xff]  }
 0x165   : > { %779 = vmatpush1.bf16.msra.mxu0 %v7523_v59  ;;  %822 = vmatpush1.bf16.msra.mxu1 %v7526_v60  ;;  %v7594_v59 = vld [vmem:[#allocation9 + $0x508] ss:$16 sps:$4 sm:$0xff]   ;;  %v7599_v60 = vld [vmem:[#allocation9 + $0x524] ss:$16 sps:$4 sm:$0xff]  }
 0x166   : > { %780 = vmatprep.subr.bf16.mxu0 %v7531_v61  ;;  %823 = vmatprep.subr.bf16.mxu1 %v7534_v62  ;;  %v7602_v61 = vld [vmem:[#allocation9 + $0x52c] ss:$16 sps:$4 sm:$0xff]   ;;  %v7597_v62 = vld [vmem:[#allocation9 + $0x520] ss:$16 sps:$4 sm:$0xff]  }
 0x169   : > { %781 = vmatpush1.bf16.msra.mxu0 %v7529_v2  ;;  %824 = vmatpush1.bf16.msra.mxu1 %v7532_v3  ;;  %v7608_v2 = vld [vmem:[#allocation9 + $0x54c] ss:$16 sps:$4 sm:$0xff]   ;;  %v7603_v3 = vld [vmem:[#allocation9 + $0x540] ss:$16 sps:$4 sm:$0xff]  }
 0x16a   : > { %6515 = vmatprep.subr.msk.bf16.mxu0 %vm570_vm1, %v6512_v4  ;;  %6517 = vmatprep.subr.msk.bf16.mxu1 %vm570_vm1, %v6514_v5  ;;  %v7606_v4 = vld [vmem:[#allocation9 + $0x548] ss:$16 sps:$4 sm:$0xff]   ;;  %v7611_v5 = vld [vmem:[#allocation9 + $0x564] ss:$16 sps:$4 sm:$0xff]  }
 0x16d   : > { %783 = vmatpush1.bf16.msra.mxu0 %v763_v10  ;;  %826 = vmatpush1.bf16.msra.mxu1 %v769_v11  ;;  %v7620_v10 = vld [vmem:[#allocation9 + $0x58c] ss:$16 sps:$4 sm:$0xff]   ;;  %v7615_v11 = vld [vmem:[#allocation9 + $0x580] ss:$16 sps:$4 sm:$0xff]  }
 0x16e   : > { %994 = vmatprep.subr.bf16.mxu0 %v7541_v8  ;;  %1037 = vmatprep.subr.bf16.mxu1 %v7544_v9  ;;  %v7612_v8 = vld [vmem:[#allocation9 + $0x568] ss:$16 sps:$4 sm:$0xff]   ;;  %v7617_v9 = vld [vmem:[#allocation9 + $0x584] ss:$16 sps:$4 sm:$0xff]  }
 0x170   : > { %6516 = vmatmul.mubr.msk.bf16.vlgmr.msra.gmra.mrb[0].mxu0 %vm566_vm6, %v421_v16  ;;  %6518 = vmatmul.mubr.msk.bf16.vlgmr.msra.gmra.mrb[0].mxu1 %vm566_vm6, %v421_v16  ;;  %v7624_v16 = vld [vmem:[#allocation9 + $0x5a8] ss:$16 sps:$4 sm:$0xff]  }
 0x171   : > { %995 = vmatpush1.bf16.msra.mxu0 %v7539_v12  ;;  %1038 = vmatpush1.bf16.msra.mxu1 %v7542_v13  ;;  %v7618_v12 = vld [vmem:[#allocation9 + $0x588] ss:$16 sps:$4 sm:$0xff]   ;;  %v7623_v13 = vld [vmem:[#allocation9 + $0x5a4] ss:$16 sps:$4 sm:$0xff]  }
 0x172   : > { %996 = vmatprep.subr.bf16.mxu0 %v7547_v14  ;;  %1039 = vmatprep.subr.bf16.mxu1 %v7550_v15  ;;  %v7626_v14 = vld [vmem:[#allocation9 + $0x5ac] ss:$16 sps:$4 sm:$0xff]   ;;  %v7621_v15 = vld [vmem:[#allocation9 + $0x5a0] ss:$16 sps:$4 sm:$0xff]  }
 0x173   : > { %1026 = vmatprep.mubr.bf16.mxu0 %v8617_v1  ;;  %1069 = vmatprep.mubr.bf16.mxu1 %v8617_v1 }
 0x175   : > { %997 = vmatpush1.bf16.msra.mxu0 %v7545_v17  ;;  %1040 = vmatpush1.bf16.msra.mxu1 %v7548_v18  ;;  %v1090_v17 = vlaneseq }
 0x176   : > { %998 = vmatprep.subr.bf16.mxu0 %v7553_v19  ;;  %1041 = vmatprep.subr.bf16.mxu1 %v7556_v20 }
 0x177   : > { %v8998_v18 = vshrl.u32 %v1090_v17, 7  ;;  %v7656_v17 = vld [vmem:[#allocation9 + $0x64c] ss:$16 sps:$4 sm:$0xff]  }
 0x179   : > { %999 = vmatpush1.bf16.msra.mxu0 %v7551_v21  ;;  %1042 = vmatpush1.bf16.msra.mxu1 %v7554_v22  ;;  %v1092_v19 = vsub.s32 0, %v8998_v18  ;;  %v1100_v20 = vsub.s32 2, %v8998_v18  ;;  %v1088_v21 = vld [vmem:[#allocation8] sm:$0xf]  ;;  %v7629_v22 = vld [vmem:[#allocation9 + $0x5c4] ss:$16 sps:$4 sm:$0xff]  }
 0x17a   : > { %1000 = vmatprep.subr.bf16.mxu0 %v7559_v23  ;;  %1043 = vmatprep.subr.bf16.mxu1 %v7562_v24  ;;  %v7632_v23 = vld [vmem:[#allocation9 + $0x5cc] ss:$16 sps:$4 sm:$0xff]   ;;  %v1096_v24 = vsub.s32 1, %v8998_v18  ;;  %v1104_v25 = vsub.s32 3, %v8998_v18 }
 0x17c   : > { %v1097_v32 = vrot.slane %v1088_v21, %v1096_v24  ;;  %v1105_v33 = vrot.slane %v1088_v21, %v1104_v25 }
 0x17d   : > { %1001 = vmatpush1.bf16.msra.mxu0 %v7557_v27  ;;  %1044 = vmatpush1.bf16.msra.mxu1 %v7560_v28  ;;  %v7630_v27 = vld [vmem:[#allocation9 + $0x5c8] ss:$16 sps:$4 sm:$0xff]   ;;  %v1093_v28 = vrot.slane %v1088_v21, %v1092_v19 }
 0x17e   : > { %6539 = vmatprep.subr.msk.bf16.mxu0 %vm570_vm1, %v6536_v29  ;;  %6541 = vmatprep.subr.msk.bf16.mxu1 %vm570_vm1, %v6538_v30  ;;  %v1101_v29 = vrot.slane %v1088_v21, %v1100_v20  ;;  %v7635_v30 = vld [vmem:[#allocation9 + $0x5e4] ss:$16 sps:$4 sm:$0xff]  }
 0x181   : > { %1003 = vmatpush1.bf16.msra.mxu0 %v983_v35  ;;  %1046 = vmatpush1.bf16.msra.mxu1 %v989_v36  ;;  %v7636_v35 = vld [vmem:[#allocation9 + $0x5e8] ss:$16 sps:$4 sm:$0xff]  }
 0x182   : > { %2341 = vmatprep.subr.bf16.mxu0 %v7569_v41  ;;  %2470 = vmatprep.subr.bf16.mxu1 %v7572_v43  ;;  %v7644_v43 = vld [vmem:[#allocation9 + $0x60c] ss:$16 sps:$4 sm:$0xff]  }
 0x184   : > { %6540 = vmatmul.mubr.msk.bf16.vlgmr.msra.gmra.mrb[0].mxu0 %vm566_vm6, %v888_v40  ;;  %6542 = vmatmul.mubr.msk.bf16.vlgmr.msra.gmra.mrb[0].mxu1 %vm566_vm6, %v888_v40 }
 0x185   : > { %2342 = vmatpush1.bf16.msra.mxu0 %v7567_v37  ;;  %2471 = vmatpush1.bf16.msra.mxu1 %v7570_v42  ;;  %v7641_v42 = vld [vmem:[#allocation9 + $0x604] ss:$16 sps:$4 sm:$0xff]  }
 0x186   : > { %2343 = vmatprep.subr.bf16.mxu0 %v7575_v44  ;;  %2472 = vmatprep.subr.bf16.mxu1 %v7578_v45 }
 0x189   : > { %2344 = vmatpush1.bf16.msra.mxu0 %v7573_v46  ;;  %2473 = vmatpush1.bf16.msra.mxu1 %v7576_v47 }
 0x18a   : > { %2345 = vmatprep.subr.bf16.mxu0 %v7581_v48  ;;  %2474 = vmatprep.subr.bf16.mxu1 %v7584_v49  ;;  %v7639_v48 = vld [vmem:[#allocation9 + $0x600] ss:$16 sps:$4 sm:$0xff]   ;;  %v7642_v49 = vld [vmem:[#allocation9 + $0x608] ss:$16 sps:$4 sm:$0xff]  }
 0x18d   : > { %2346 = vmatpush1.bf16.msra.mxu0 %v7579_v50  ;;  %2475 = vmatpush1.bf16.msra.mxu1 %v7582_v51 }
 0x18e   : > { %2347 = vmatprep.subr.bf16.mxu0 %v7587_v52  ;;  %2476 = vmatprep.subr.bf16.mxu1 %v7590_v53 }
 0x191   : > { %2348 = vmatpush1.bf16.msra.mxu0 %v7585_v54  ;;  %2477 = vmatpush1.bf16.msra.mxu1 %v7588_v55 }
 0x192   : > { %2349 = vmatprep.subr.bf16.mxu0 %v7593_v56  ;;  %2478 = vmatprep.subr.bf16.mxu1 %v7596_v57 }
 0x195   : > { %2350 = vmatpush1.bf16.msra.mxu0 %v7591_v58  ;;  %2479 = vmatpush1.bf16.msra.mxu1 %v7594_v59 }
 0x196   : > { %2351 = vmatprep.subr.bf16.mxu0 %v7599_v60  ;;  %2480 = vmatprep.subr.bf16.mxu1 %v7602_v61 }
 0x199   : > { %2352 = vmatpush1.bf16.msra.mxu0 %v7597_v62  ;;  %2481 = vmatpush1.bf16.msra.mxu1 %v7600_v63  ;;  %v7647_v63 = vld [vmem:[#allocation9 + $0x624] ss:$16 sps:$4 sm:$0xff]  }
 0x19a   : > { %2353 = vmatprep.subr.bf16.mxu0 %v7605_v0  ;;  %2482 = vmatprep.subr.bf16.mxu1 %v7608_v2 }
 0x19d   : > { %2354 = vmatpush1.bf16.msra.mxu0 %v7603_v3  ;;  %2483 = vmatpush1.bf16.msra.mxu1 %v7606_v4  ;;  %v7645_v4 = vld [vmem:[#allocation9 + $0x620] ss:$16 sps:$4 sm:$0xff]  }
 0x19e   : > { %2355 = vmatprep.subr.bf16.mxu0 %v7611_v5  ;;  %2484 = vmatprep.subr.bf16.mxu1 %v7614_v6 }
 0x1a1   : > { %2356 = vmatpush1.bf16.msra.mxu0 %v7609_v7  ;;  %2485 = vmatpush1.bf16.msra.mxu1 %v7612_v8  ;;  %v7648_v8 = vld [vmem:[#allocation9 + $0x628] ss:$16 sps:$4 sm:$0xff]  }
 0x1a2   : > { %2357 = vmatprep.subr.bf16.mxu0 %v7617_v9  ;;  %2486 = vmatprep.subr.bf16.mxu1 %v7620_v10 }
 0x1a5   : > { %2358 = vmatpush1.bf16.msra.mxu0 %v7615_v11  ;;  %2487 = vmatpush1.bf16.msra.mxu1 %v7618_v12  ;;  %v9014_v12 = vld [vmem:[#allocation2 + $0x8] sm:$0xff] }
 0x1a6   : > { %2359 = vmatprep.subr.bf16.mxu0 %v7623_v13  ;;  %2488 = vmatprep.subr.bf16.mxu1 %v7626_v14  ;;  %384 = vst.msk [vmem:[#allocation2 + $0x20] sm:$0xff] %vm383_vm8, %v9014_v12  ;;  %389 = vst.msk [vmem:[#allocation2 + $0x48] sm:$0xff] %vm383_vm8, %v9014_v12  ;;  %v7650_v13 = vld [vmem:[#allocation9 + $0x62c] ss:$16 sps:$4 sm:$0xff]  }
 0x1a7   : > { %1130 = vst.msk [vmem:[#allocation2 + $0x20] sm:$0xff] %vm383_vm8, %v9014_v12  ;;  %1135 = vst.msk [vmem:[#allocation2 + $0x48] sm:$0xff] %vm383_vm8, %v9014_v12 }
 0x1a8   : > { %395 = vst.msk [vmem:[#allocation2 + $0x70] sm:$0x3] %vm394_vm9, %v9014_v12 }
 0x1a9   : > { %2360 = vmatpush1.bf16.msra.mxu0 %v7621_v15  ;;  %2489 = vmatpush1.bf16.msra.mxu1 %v7624_v16  ;;  %v7653_v16 = vld [vmem:[#allocation9 + $0x644] ss:$16 sps:$4 sm:$0xff]   ;;  %1140 = vst.msk [vmem:[#allocation2 + $0x70] sm:$0x3] %vm394_vm9, %v9014_v12 }
 0x1aa   : > { %2361 = vmatprep.subr.bf16.mxu0 %v7629_v22  ;;  %2490 = vmatprep.subr.bf16.mxu1 %v7632_v23  ;;  %v7651_v23 = vld [vmem:[#allocation9 + $0x640] ss:$16 sps:$4 sm:$0xff]  }
 0x1ad   : > { %2362 = vmatpush1.bf16.msra.mxu0 %v7627_v26  ;;  %2491 = vmatpush1.bf16.msra.mxu1 %v7630_v27  ;;  %v7654_v26 = vld [vmem:[#allocation9 + $0x648] ss:$16 sps:$4 sm:$0xff]   ;;  %v7659_v27 = vld [vmem:[#allocation9 + $0x664] ss:$16 sps:$4 sm:$0xff]  }
 0x1ae   : > { %2363 = vmatprep.subr.bf16.mxu0 %v7635_v30  ;;  %2492 = vmatprep.subr.bf16.mxu1 %v7638_v31  ;;  %v7660_v30 = vld [vmem:[#allocation9 + $0x668] ss:$16 sps:$4 sm:$0xff]   ;;  %v7665_v31 = vld [vmem:[#allocation9 + $0x684] ss:$16 sps:$4 sm:$0xff]  }
 0x1b1   : > { %2364 = vmatpush1.bf16.msra.mxu0 %v7633_v34  ;;  %2493 = vmatpush1.bf16.msra.mxu1 %v7636_v35 }
 0x1b2   : > { %2365 = vmatprep.subr.bf16.mxu0 %v7641_v42  ;;  %2494 = vmatprep.subr.bf16.mxu1 %v7644_v43 }
 0x1b5   : > { %2366 = vmatpush1.bf16.msra.mxu0 %v7639_v48  ;;  %2495 = vmatpush1.bf16.msra.mxu1 %v7642_v49 }
 0x1b6   : > { %2367 = vmatprep.subr.bf16.mxu0 %v7647_v63  ;;  %2496 = vmatprep.subr.bf16.mxu1 %v7650_v13 }
 0x1b9   : > { %2368 = vmatpush1.bf16.msra.mxu0 %v7645_v4  ;;  %2497 = vmatpush1.bf16.msra.mxu1 %v7648_v8 }
 0x1ba   : > { %2369 = vmatprep.subr.bf16.mxu0 %v7653_v16  ;;  %2498 = vmatprep.subr.bf16.mxu1 %v7656_v17 }
 0x1bd   : > { %2370 = vmatpush1.bf16.msra.mxu0 %v7651_v23  ;;  %2499 = vmatpush1.bf16.msra.mxu1 %v7654_v26  ;;  %v7663_v26 = vld [vmem:[#allocation9 + $0x680] ss:$16 sps:$4 sm:$0xff]  }
 0x1be   : > { %2371 = vmatprep.subr.bf16.mxu0 %v7659_v27 }
 0x257   : > { %v1028_v36 = vpop.f32.mrb[0].mxu0  ;;  %v1071_v38 = vpop.f32.mrb[0].mxu1 }
 0x258   : > { %v1110_v39 = vadd.f32 %v1093_v28, %v1028_v36  ;;  %v1112_v40 = vadd.f32 %v1101_v29, %v1071_v38  ;;  %v1030_v37 = vpop.f32.mrb[1].mxu0  ;;  %v1073_v41 = vpop.f32.mrb[1].mxu1 }
 0x259   : > { %v1111_v44 = vadd.f32 %v1097_v32, %v1030_v37  ;;  %v1113_v45 = vadd.f32 %v1105_v33, %v1073_v41  ;;  %v1032_v46 = vpop.f32.mrb[2].mxu0  ;;  %v1075_v47 = vpop.f32.mrb[2].mxu1 }
 0x25a   : > { %v1118_v50 = vmax.f32 %v1110_v39, 0.0  ;;  %v1120_v51 = vmax.f32 %v1112_v40, 0.0  ;;  %v1114_v52 = vadd.f32 %v1093_v28, %v1032_v46  ;;  %v1116_v53 = vadd.f32 %v1101_v29, %v1075_v47  ;;  %v1034_v54 = vpop.f32.mrb[3].mxu0  ;;  %v1077_v55 = vpop.f32.mrb[3].mxu1  ;;  %v7662_v28 = vld [vmem:[#allocation9 + $0x66c] ss:$16 sps:$4 sm:$0xff]  }
 0x25b   : > { %v1119_v56 = vmax.f32 %v1111_v44, 0.0  ;;  %v1121_v57 = vmax.f32 %v1113_v45, 0.0  ;;  %v1115_v58 = vadd.f32 %v1097_v32, %v1034_v54  ;;  %v1117_v59 = vadd.f32 %v1105_v33, %v1077_v55  ;;  %v7657_v29 = vld [vmem:[#allocation9 + $0x660] ss:$16 sps:$4 sm:$0xff]   ;;  %2500 = vmatprep.subr.bf16.mxu1 %v7662_v28  ;;  %v7668_v32 = vld [vmem:[#allocation9 + $0x68c] ss:$16 sps:$4 sm:$0xff]  }
 0x25c   : > { %v1149_v60 = vrot.slane %v1118_v50, 7  ;;  %v1122_v61 = vmax.f32 %v1114_v52, 0.0  ;;  %v1124_v62 = vmax.f32 %v1116_v53, 0.0  ;;  %v1151_v5 = vrot.slane %v1120_v51, 7  ;;  %2372 = vmatpush1.bf16.msra.mxu0 %v7657_v29  ;;  %2501 = vmatpush1.bf16.msra.mxu1 %v7660_v30  ;;  %v7666_v29 = vld [vmem:[#allocation9 + $0x688] ss:$16 sps:$4 sm:$0xff]  }
 0x25d   : > { %v1150_v0 = vrot.slane %v1119_v56, 7  ;;  %v1123_v2 = vmax.f32 %v1115_v58, 0.0  ;;  %v1125_v3 = vmax.f32 %v1117_v59, 0.0  ;;  %v1152_v9 = vrot.slane %v1121_v57, 7  ;;  %2384 = vmatprep.subr.bf16.mxu0 %v7665_v31  ;;  %2513 = vmatprep.subr.bf16.mxu1 %v7668_v32  ;;  %v7671_v31 = vld [vmem:[#allocation9 + $0x6a4] ss:$16 sps:$4 sm:$0xff]  }
 0x25e   : > { %v1153_v6 = vrot.slane %v1122_v61, 7  ;;  %v1157_v7 = vrot.slane %v1124_v62, 7  ;;  %1161 = vrot.lane.b32.xlu1 %v1149_v60, %s8619_s10 }
 0x25f   : > { %v1155_v10 = vrot.slane %v1123_v2, 7  ;;  %v1159_v11 = vrot.slane %v1125_v3, 7  ;;  %1163 = vrot.lane.b32.xlu0 %v1150_v0, %s8619_s10 }
 0x260   : > { %v1154_v14 = vsel %vm400_vm0, %v1149_v60, %v1153_v6  ;;  %v1158_v15 = vsel %vm400_vm0, %v1151_v5, %v1157_v7 }
 0x261   : > { %v1156_v21 = vsel %vm400_vm0, %v1150_v0, %v1155_v10  ;;  %v1160_v22 = vsel %vm400_vm0, %v1152_v9, %v1159_v11 }
 0x262   : > { %1169 = vrot.lane.b32.xlu1 %v1154_v14, %s8619_s10 }
 0x263   : > { %1171 = vrot.lane.b32.xlu0 %v1156_v21, %s8619_s10 }
 0x266   : > { %1177 = vrot.lane.b32.xlu1 %v1153_v6, %s8619_s10 }
 0x267   : > { %1179 = vrot.lane.b32.xlu0 %v1155_v10, %s8619_s10 }
 0x26a   : > { %1165 = vrot.lane.b32.xlu1 %v1151_v5, %s8619_s10 }
 0x26b   : > { %1167 = vrot.lane.b32.xlu0 %v1152_v9, %s8619_s10 }
 0x26e   : > { %1173 = vrot.lane.b32.xlu1 %v1158_v15, %s8619_s10 }
 0x26f   : > { %1175 = vrot.lane.b32.xlu0 %v1160_v22, %s8619_s10 }
 0x272   : > { %1181 = vrot.lane.b32.xlu1 %v1157_v7, %s8619_s10 }
 0x273   : > { %1183 = vrot.lane.b32.xlu0 %v1159_v11, %s8619_s10 }
 0x2d0   : > { %v1162_v33 = vpop.permute.xlu1 %1161 }
 0x2d1   : > { %1211 = vst.msk [vmem:[#allocation2] sm:$0xfe] %vm1210_vm10, %v1162_v33  ;;  %v1164_v34 = vpop.permute.xlu0 %1163 }
 0x2d2   : > { %v1186_v35 = vsel %vm1185_vm11, %v1162_v33, %v1164_v34 }
 0x2d3   : > { %1212 = vst [vmem:[#allocation2 + $0x8] sm:$0xfe] %v1186_v35  ;;  %v7674_v35 = vld [vmem:[#allocation9 + $0x6ac] ss:$16 sps:$4 sm:$0xff]  }
 0x2d4   : > { %v1170_v36 = vpop.permute.xlu1 %1169 }
 0x2d5   : > { %1218 = vst.msk [vmem:[#allocation2 + $0x28] sm:$0xff] %vm1217_vm12, %v1170_v36  ;;  %v1172_v38 = vpop.permute.xlu0 %1171 }
 0x2d6   : > { %v9050_v43 = vsel %vm1185_vm11, %v1170_v36, %v1172_v38 }
 0x2d8   : > { %v1178_v39 = vpop.permute.xlu1 %1177  ;;  %v1389_v40 = vld [vmem:[#allocation2] sm:$0xfe] }
 0x2d9   : > { %v1230_v37 = vld [vmem:[#allocation2] sm:$0xff]  ;;  %1224 = vst.msk [vmem:[#allocation2 + $0x50] sm:$0x1] %vm1223_vm13, %v1178_v39  ;;  %v1180_v42 = vpop.permute.xlu0 %1179 }
 0x2da   : > { %v9045_v41 = vld [vmem:[#allocation2] sm:$0xfc]  ;;  %v1192_v44 = vsel %vm1185_vm11, %v1178_v39, %v1180_v42  ;;  %v1390_v45 = vld [vmem:[#allocation2 + $0x8] sm:$0xfe] }
 0x2db   : > { %4801 = vst [vmem:[#allocation2] sm:$0xff] %v9014_v12  ;;  %v1231_v46 = vld [vmem:[#allocation2 + $0x8] sm:$0xff]  ;;  %1225 = vst [vmem:[#allocation2 + $0x58] sm:$0x1] %v1192_v44  ;;  %v1400_v47 = vpack.c.bf16 %v9050_v43, %v1390_v45 }
 0x2dc   : > { %v9055_v48 = vpack.c.bf16 %v9050_v43, %v1231_v46  ;;  %v9057_v49 = vld [vmem:[#allocation2 + $0x8] sm:$0xfc]  ;;  %v1166_v50 = vpop.permute.xlu1 %1165 }
 0x2dd   : > { %v9059_v51 = vld [vmem:[#allocation2 + $0x28] sm:$0xff]  ;;  %4802 = vst [vmem:[#allocation2 + $0x8] sm:$0xff] %v9014_v12  ;;  %v1187_v52 = vsel %vm1185_vm11, %v1164_v34, %v1166_v50  ;;  %v1168_v53 = vpop.permute.xlu0 %1167  ;;  %v1569_v57 = vshll.u32 %v1400_v47, 16  ;;  %v1567_v11 = vshrl.u32 %v1400_v47, 16 }
 0x2de   : > { %v1399_v54 = vpack.c.bf16 %v9059_v51, %v1389_v40  ;;  %4806 = vst [vmem:[#allocation2 + $0x28] sm:$0xff] %v9014_v12  ;;  %1213 = vst [vmem:[#allocation2 + $0x10] sm:$0xfe] %v1187_v52  ;;  %v1188_v55 = vsel %vm1185_vm11, %v1166_v50, %v1168_v53  ;;  %v9068_v56 = vpack.c.bf16 %v9059_v51, %v1230_v37  ;;  %v7669_v37 = vld [vmem:[#allocation9 + $0x6a0] ss:$16 sps:$4 sm:$0xff]  }
 0x2df   : > { %1216 = vst.msk [vmem:[#allocation2 + $0x20] sm:$0xfe] %vm1215_vm14, %v1168_v53  ;;  %1214 = vst [vmem:[#allocation2 + $0x18] sm:$0xfe] %v1188_v55  ;;  %v1571_v4 = vrot.slane %v1569_v57, 1 }
 0x2e0   : > { %v1174_v58 = vpop.permute.xlu1 %1173  ;;  %v1394_v59 = vld [vmem:[#allocation2 + $0x50] sm:$0x1]  ;;  %v1557_v60 = vshll.u32 %v1399_v54, 16  ;;  %v1555_v16 = vshrl.u32 %v1399_v54, 16  ;;  %v7680_v55 = vld [vmem:[#allocation9 + $0x6cc] ss:$16 sps:$4 sm:$0xff]  }
 0x2e1   : > { %v9070_v61 = vld [vmem:[#allocation2 + $0x50] sm:$0x3]  ;;  %v9073_v62 = vsel %vm1185_vm11, %v1172_v38, %v1174_v58  ;;  %v1176_v63 = vpop.permute.xlu0 %1175  ;;  %v1404_v0 = vpack.c.bf16 %v1394_v59, %v1394_v59  ;;  %v1572_v22 = vor.u32 %v1571_v4, %v1567_v11  ;;  %v7675_v57 = vld [vmem:[#allocation9 + $0x6c0] ss:$16 sps:$4 sm:$0xff]  }
 0x2e2   : > { %4811 = vst [vmem:[#allocation2 + $0x50] sm:$0x3] %v9014_v12  ;;  %1222 = vst.msk [vmem:[#allocation2 + $0x48] sm:$0xff] %vm1185_vm11, %v1176_v63  ;;  %v1395_v2 = vld [vmem:[#allocation2 + $0x58] sm:$0x1]  ;;  %v1559_v8 = vrot.slane %v1557_v60, 1  ;;  %v9082_v14 = vsel %vm1185_vm11, %v1174_v58, %v1176_v63 }
 0x2e3   : > { %v1405_v3 = vpack.c.bf16 %v1395_v2, %v1395_v2  ;;  %v1562_v5 = vshll.u32 %v1404_v0, 16  ;;  %v9077_v6 = vld [vmem:[#allocation2 + $0x58] sm:$0x3]  ;;  %v7677_v54 = vld [vmem:[#allocation9 + $0x6c4] ss:$16 sps:$4 sm:$0xff]  }
 0x2e4   : > { %v1182_v7 = vpop.permute.xlu1 %1181  ;;  %4812 = vst [vmem:[#allocation2 + $0x58] sm:$0x3] %v9014_v12  ;;  %v1560_v30 = vor.u32 %v1559_v8, %v1555_v16  ;;  %v7678_v58 = vld [vmem:[#allocation9 + $0x6c8] ss:$16 sps:$4 sm:$0xff]  }
 0x2e5   : > { %v1193_v9 = vsel %vm1185_vm11, %v1180_v42, %v1182_v7  ;;  %v1184_v10 = vpop.permute.xlu0 %1183  ;;  %v1574_v13 = vshll.u32 %v1405_v3, 16  ;;  %v1564_v17 = vrot.slane %v1562_v5, 1  ;;  %v1232_v33 = vld [vmem:[#allocation2 + $0x10] sm:$0xff] }
 0x2e6   : > { %1226 = vst [vmem:[#allocation2 + $0x60] sm:$0x1] %v1193_v9  ;;  %v1194_v15 = vsel %vm1185_vm11, %v1182_v7, %v1184_v10  ;;  %1229 = vst.msk [vmem:[#allocation2 + $0x70] sm:$0x1] %vm1228_vm15, %v1184_v10  ;;  %v1392_v21 = vld [vmem:[#allocation2 + $0x18] sm:$0xfe]  ;;  %v9094_v38 = vpack.c.bf16 %v9073_v62, %v1232_v33 }
 0x2e7   : > { %1227 = vst [vmem:[#allocation2 + $0x68] sm:$0x1] %v1194_v15  ;;  %v1576_v23 = vrot.slane %v1574_v13, 1  ;;  %v1402_v27 = vpack.c.bf16 %v9082_v14, %v1392_v21  ;;  %v1233_v28 = vld [vmem:[#allocation2 + $0x18] sm:$0xff]  ;;  %v1234_v39 = vld [vmem:[#allocation2 + $0x20] sm:$0xff]  ;;  %v1565_v40 = vsel %vm463_vm5, %v1560_v30, %v1564_v17 }
 0x2e8   : > { %v9088_v32 = vpack.c.bf16 %v9082_v14, %v1233_v28  ;;  %v7672_v42 = vld [vmem:[#allocation9 + $0x6a8] ss:$16 sps:$4 sm:$0xff]   ;;  %v9104_v47 = vld [vmem:[#allocation2 + $0x18] sm:$0xfc]  ;;  %v7683_v7 = vld [vmem:[#allocation9 + $0x6e4] ss:$16 sps:$4 sm:$0xff]  }
 0x2e9   : > { %v1577_v34 = vsel %vm463_vm5, %v1572_v22, %v1576_v23  ;;  %v9091_v36 = vld [vmem:[#allocation2 + $0x48] sm:$0xff]  ;;  %v1593_v45 = vshll.u32 %v1402_v27, 16  ;;  %v9102_v46 = vld [vmem:[#allocation2 + $0x10] sm:$0xfe]  ;;  %v9106_v50 = vld [vmem:[#allocation2 + $0x20] sm:$0xfe] }
 0x2ea   : > { %2373 = vmatprep.mubr.bf16.mxu0 %v1577_v34  ;;  %2502 = vmatprep.mubr.bf16.mxu1 %v1577_v34  ;;  %4810 = vst.msk [vmem:[#allocation2 + $0x48] sm:$0xff] %vm383_vm8, %v9014_v12  ;;  %v9100_v44 = vpack.c.bf16 %v9091_v36, %v1234_v39  ;;  %4804 = vst [vmem:[#allocation2 + $0x18] sm:$0xff] %v9014_v12  ;;  %v9109_v52 = vld [vmem:[#allocation2 + $0x10] sm:$0xfc]  ;;  %v9111_v53 = vld [vmem:[#allocation2 + $0x20] sm:$0xfc] }
 0x2eb   : > { %2374 = vmatmul.mubr.bf16.vlgmr.msra.gmra.mrb[4].mxu0 %v1565_v40  ;;  %2503 = vmatmul.mubr.bf16.vlgmr.msra.gmra.mrb[4].mxu1 %v1565_v40  ;;  %4803 = vst [vmem:[#allocation2 + $0x10] sm:$0xff] %v9014_v12  ;;  %4805 = vst.msk [vmem:[#allocation2 + $0x20] sm:$0xff] %vm383_vm8, %v9014_v12  ;;  %v1595_v63 = vrot.slane %v1593_v45, 1  ;;  %v1591_v8 = vshrl.u32 %v1402_v27, 16  ;;  %v7686_v10 = vld [vmem:[#allocation9 + $0x6ec] ss:$16 sps:$4 sm:$0xff]  }
 0x2ec   : > { %2385 = vmatpush1.bf16.msra.mxu0 %v7663_v26  ;;  %2514 = vmatpush1.bf16.msra.mxu1 %v7666_v29  ;;  %v7681_v15 = vld [vmem:[#allocation9 + $0x6e0] ss:$16 sps:$4 sm:$0xff]   ;;  %v7684_v16 = vld [vmem:[#allocation9 + $0x6e8] ss:$16 sps:$4 sm:$0xff]   ;;  %v7689_v21 = vld [vmem:[#allocation9 + $0x704] ss:$16 sps:$4 sm:$0xff]  }
 0x2ed   : > { %2386 = vmatprep.subr.bf16.mxu0 %v7671_v31  ;;  %2515 = vmatprep.subr.bf16.mxu1 %v7674_v35  ;;  %v9116_v0 = vld [vmem:[#allocation2 + $0x60] sm:$0x1]  ;;  %v9120_v3 = vld [vmem:[#allocation2 + $0x70] sm:$0x1]  ;;  %v1596_v11 = vor.u32 %v1595_v63, %v1591_v8  ;;  %v7692_v22 = vld [vmem:[#allocation9 + $0x70c] ss:$16 sps:$4 sm:$0xff]  }
 0x2ee   : > { %v1397_v59 = vld [vmem:[#allocation2 + $0x68] sm:$0x1]  ;;  %v9123_v4 = vld [vmem:[#allocation2 + $0x60] sm:$0x3]  ;;  %v9125_v5 = vld [vmem:[#allocation2 + $0x70] sm:$0x3] }
 0x2ef   : > { %v1407_v60 = vpack.c.bf16 %v1397_v59, %v1397_v59  ;;  %v9118_v2 = vld [vmem:[#allocation2 + $0x68] sm:$0x3]  ;;  %4813 = vst [vmem:[#allocation2 + $0x60] sm:$0x3] %v9014_v12  ;;  %4815 = vst.msk [vmem:[#allocation2 + $0x70] sm:$0x3] %vm394_vm9, %v9014_v12 }
 0x2f0   : > { %2387 = vmatpush1.bf16.msra.mxu0 %v7669_v37  ;;  %2516 = vmatpush1.bf16.msra.mxu1 %v7672_v42  ;;  %4814 = vst [vmem:[#allocation2 + $0x68] sm:$0x3] %v9014_v12  ;;  %v7687_v23 = vld [vmem:[#allocation9 + $0x700] ss:$16 sps:$4 sm:$0xff]   ;;  %v7690_v26 = vld [vmem:[#allocation9 + $0x708] ss:$16 sps:$4 sm:$0xff]  }
 0x2f1   : > { %2388 = vmatprep.subr.bf16.mxu0 %v7677_v54  ;;  %2517 = vmatprep.subr.bf16.mxu1 %v7680_v55  ;;  %v1598_v9 = vshll.u32 %v1407_v60, 16  ;;  %v7695_v27 = vld [vmem:[#allocation9 + $0x724] ss:$16 sps:$4 sm:$0xff]   ;;  %v7698_v28 = vld [vmem:[#allocation9 + $0x72c] ss:$16 sps:$4 sm:$0xff]  }
 0x2f2   : > { %v7693_v29 = vld [vmem:[#allocation9 + $0x720] ss:$16 sps:$4 sm:$0xff]   ;;  %v7696_v30 = vld [vmem:[#allocation9 + $0x728] ss:$16 sps:$4 sm:$0xff]   ;;  %v7701_v31 = vld [vmem:[#allocation9 + $0x744] ss:$16 sps:$4 sm:$0xff]  }
 0x2f3   : > { %v1600_v13 = vrot.slane %v1598_v9, 1  ;;  %v7704_v33 = vld [vmem:[#allocation9 + $0x74c] ss:$16 sps:$4 sm:$0xff]   ;;  %v7699_v34 = vld [vmem:[#allocation9 + $0x740] ss:$16 sps:$4 sm:$0xff]  }
 0x2f4   : > { %2389 = vmatpush1.bf16.msra.mxu0 %v7675_v57  ;;  %2518 = vmatpush1.bf16.msra.mxu1 %v7678_v58  ;;  %v7702_v35 = vld [vmem:[#allocation9 + $0x748] ss:$16 sps:$4 sm:$0xff]   ;;  %v7707_v39 = vld [vmem:[#allocation9 + $0x764] ss:$16 sps:$4 sm:$0xff]   ;;  %v7710_v40 = vld [vmem:[#allocation9 + $0x76c] ss:$16 sps:$4 sm:$0xff]  }
 0x2f5   : > { %2390 = vmatprep.subr.bf16.mxu0 %v7683_v7  ;;  %v1601_v17 = vsel %vm463_vm5, %v1596_v11, %v1600_v13  ;;  %2519 = vmatprep.subr.bf16.mxu1 %v7686_v10  ;;  %v7705_v37 = vld [vmem:[#allocation9 + $0x760] ss:$16 sps:$4 sm:$0xff]   ;;  %v7708_v42 = vld [vmem:[#allocation9 + $0x768] ss:$16 sps:$4 sm:$0xff]   ;;  %v7713_v45 = vld [vmem:[#allocation9 + $0x784] ss:$16 sps:$4 sm:$0xff]  }
 0x2f6   : > { %2416 = vmatprep.mubr.bf16.mxu0 %v1601_v17  ;;  %2545 = vmatprep.mubr.bf16.mxu1 %v1601_v17  ;;  %v7716_v54 = vld [vmem:[#allocation9 + $0x78c] ss:$16 sps:$4 sm:$0xff]   ;;  %v7711_v55 = vld [vmem:[#allocation9 + $0x780] ss:$16 sps:$4 sm:$0xff]   ;;  %v7714_v57 = vld [vmem:[#allocation9 + $0x788] ss:$16 sps:$4 sm:$0xff]  }
 0x2f7   : > { %v7719_v58 = vld [vmem:[#allocation9 + $0x7a4] ss:$16 sps:$4 sm:$0xff]   ;;  %v7722_v59 = vld [vmem:[#allocation9 + $0x7ac] ss:$16 sps:$4 sm:$0xff]   ;;  %v7717_v60 = vld [vmem:[#allocation9 + $0x7a0] ss:$16 sps:$4 sm:$0xff]  }
 0x2f8   : > { %2391 = vmatpush1.bf16.msra.mxu0 %v7681_v15  ;;  %2520 = vmatpush1.bf16.msra.mxu1 %v7684_v16  ;;  %v7720_v63 = vld [vmem:[#allocation9 + $0x7a8] ss:$16 sps:$4 sm:$0xff]   ;;  %v7725_v7 = vld [vmem:[#allocation9 + $0x7c4] ss:$16 sps:$4 sm:$0xff]   ;;  %v7728_v8 = vld [vmem:[#allocation9 + $0x7cc] ss:$16 sps:$4 sm:$0xff]  }
 0x2f9   : > { %2392 = vmatprep.subr.bf16.mxu0 %v7689_v21  ;;  %2521 = vmatprep.subr.bf16.mxu1 %v7692_v22  ;;  %v7723_v9 = vld [vmem:[#allocation9 + $0x7c0] ss:$16 sps:$4 sm:$0xff]   ;;  %v7726_v10 = vld [vmem:[#allocation9 + $0x7c8] ss:$16 sps:$4 sm:$0xff]   ;;  %v7731_v11 = vld [vmem:[#allocation9 + $0x7e4] ss:$16 sps:$4 sm:$0xff]  }
 0x2fa   : > { %v7734_v13 = vld [vmem:[#allocation9 + $0x7ec] ss:$16 sps:$4 sm:$0xff]   ;;  %v7729_v15 = vld [vmem:[#allocation9 + $0x7e0] ss:$16 sps:$4 sm:$0xff]   ;;  %v7732_v16 = vld [vmem:[#allocation9 + $0x7e8] ss:$16 sps:$4 sm:$0xff]  }
 0x2fb   : > { %v7737_v17 = vld [vmem:[#allocation9 + $0x804] ss:$16 sps:$4 sm:$0xff]   ;;  %v7740_v21 = vld [vmem:[#allocation9 + $0x80c] ss:$16 sps:$4 sm:$0xff]   ;;  %v7735_v22 = vld [vmem:[#allocation9 + $0x800] ss:$16 sps:$4 sm:$0xff]  }
 0x2fc   : > { %2393 = vmatpush1.bf16.msra.mxu0 %v7687_v23  ;;  %2522 = vmatpush1.bf16.msra.mxu1 %v7690_v26  ;;  %v7738_v23 = vld [vmem:[#allocation9 + $0x808] ss:$16 sps:$4 sm:$0xff]   ;;  %v7743_v26 = vld [vmem:[#allocation9 + $0x824] ss:$16 sps:$4 sm:$0xff]  }
 0x2fd   : > { %2394 = vmatprep.subr.bf16.mxu0 %v7695_v27  ;;  %2523 = vmatprep.subr.bf16.mxu1 %v7698_v28  ;;  %v7746_v27 = vld [vmem:[#allocation9 + $0x82c] ss:$16 sps:$4 sm:$0xff]   ;;  %v7741_v28 = vld [vmem:[#allocation9 + $0x820] ss:$16 sps:$4 sm:$0xff]  }
 0x300   : > { %2395 = vmatpush1.bf16.msra.mxu0 %v7693_v29  ;;  %2524 = vmatpush1.bf16.msra.mxu1 %v7696_v30  ;;  %v7744_v29 = vld [vmem:[#allocation9 + $0x828] ss:$16 sps:$4 sm:$0xff]   ;;  %v1401_v30 = vpack.c.bf16 %v9073_v62, %v9102_v46  ;;  %v7753_v46 = vld [vmem:[#allocation9 + $0x860] ss:$16 sps:$4 sm:$0xff]  }
 0x301   : > { %2396 = vmatprep.subr.bf16.mxu0 %v7701_v31  ;;  %2525 = vmatprep.subr.bf16.mxu1 %v7704_v33  ;;  %v7749_v31 = vld [vmem:[#allocation9 + $0x844] ss:$16 sps:$4 sm:$0xff]   ;;  %v7752_v33 = vld [vmem:[#allocation9 + $0x84c] ss:$16 sps:$4 sm:$0xff]  }
 0x304   : > { %2397 = vmatpush1.bf16.msra.mxu0 %v7699_v34  ;;  %2526 = vmatpush1.bf16.msra.mxu1 %v7702_v35  ;;  %v1406_v34 = vpack.c.bf16 %v9116_v0, %v9116_v0  ;;  %v7747_v35 = vld [vmem:[#allocation9 + $0x840] ss:$16 sps:$4 sm:$0xff]   ;;  %v1579_v0 = vshrl.u32 %v1401_v30, 16 }
 0x305   : > { %2398 = vmatprep.subr.bf16.mxu0 %v7707_v39  ;;  %2527 = vmatprep.subr.bf16.mxu1 %v7710_v40  ;;  %v7750_v39 = vld [vmem:[#allocation9 + $0x848] ss:$16 sps:$4 sm:$0xff]   ;;  %v1581_v40 = vshll.u32 %v1401_v30, 16 }
 0x306   : > { %v7780_v30 = vld [vmem:[#allocation9 + $0x8e8] ss:$16 sps:$4 sm:$0xff]  }
 0x308   : > { %2399 = vmatpush1.bf16.msra.mxu0 %v7705_v37  ;;  %2528 = vmatpush1.bf16.msra.mxu1 %v7708_v42  ;;  %v7755_v37 = vld [vmem:[#allocation9 + $0x864] ss:$16 sps:$4 sm:$0xff]   ;;  %v7758_v42 = vld [vmem:[#allocation9 + $0x86c] ss:$16 sps:$4 sm:$0xff]  }
 0x309   : > { %2400 = vmatprep.subr.bf16.mxu0 %v7713_v45  ;;  %2529 = vmatprep.subr.bf16.mxu1 %v7716_v54  ;;  %v1586_v45 = vshll.u32 %v1406_v34, 16  ;;  %v7756_v54 = vld [vmem:[#allocation9 + $0x868] ss:$16 sps:$4 sm:$0xff]   ;;  %v7788_v34 = vld [vmem:[#allocation9 + $0xc] ss:$16 sps:$4 sm:$0xff]  }
 0x30c   : > { %2401 = vmatpush1.bf16.msra.mxu0 %v7711_v55  ;;  %2530 = vmatpush1.bf16.msra.mxu1 %v7714_v57  ;;  %v1583_v55 = vrot.slane %v1581_v40, 1  ;;  %v7761_v57 = vld [vmem:[#allocation9 + $0x884] ss:$16 sps:$4 sm:$0xff]   ;;  %v7783_v40 = vld [vmem:[#allocation9] ss:$16 sps:$4 sm:$0xff]  }
 0x30d   : > { %2402 = vmatprep.subr.bf16.mxu0 %v7719_v58  ;;  %2531 = vmatprep.subr.bf16.mxu1 %v7722_v59  ;;  %v7764_v58 = vld [vmem:[#allocation9 + $0x88c] ss:$16 sps:$4 sm:$0xff]   ;;  %v1588_v59 = vrot.slane %v1586_v45, 1  ;;  %v7791_v45 = vld [vmem:[#allocation9 + $0x24] ss:$16 sps:$4 sm:$0xff]  }
 0x310   : > { %2403 = vmatpush1.bf16.msra.mxu0 %v7717_v60  ;;  %2532 = vmatpush1.bf16.msra.mxu1 %v7720_v63  ;;  %v1584_v60 = vor.u32 %v1583_v55, %v1579_v0  ;;  %v7759_v63 = vld [vmem:[#allocation9 + $0x880] ss:$16 sps:$4 sm:$0xff]   ;;  %v7792_v55 = vld [vmem:[#allocation9 + $0x28] ss:$16 sps:$4 sm:$0xff]  }
 0x311   : > { %2404 = vmatprep.subr.bf16.mxu0 %v7725_v7  ;;  %2533 = vmatprep.subr.bf16.mxu1 %v7728_v8  ;;  %v7762_v7 = vld [vmem:[#allocation9 + $0x888] ss:$16 sps:$4 sm:$0xff]   ;;  %v7767_v8 = vld [vmem:[#allocation9 + $0x8a4] ss:$16 sps:$4 sm:$0xff]   ;;  %v7795_v0 = vld [vmem:[#allocation9 + $0x40] ss:$16 sps:$4 sm:$0xff]  }
 0x314   : > { %2405 = vmatpush1.bf16.msra.mxu0 %v7723_v9  ;;  %2534 = vmatpush1.bf16.msra.mxu1 %v7726_v10  ;;  %v7770_v9 = vld [vmem:[#allocation9 + $0x8ac] ss:$16 sps:$4 sm:$0xff]   ;;  %v1589_v10 = vsel %vm463_vm5, %v1584_v60, %v1588_v59  ;;  %v7798_v59 = vld [vmem:[#allocation9 + $0x48] ss:$16 sps:$4 sm:$0xff]   ;;  %v7803_v60 = vld [vmem:[#allocation9 + $0x64] ss:$16 sps:$4 sm:$0xff]  }
 0x315   : > { %2406 = vmatprep.subr.bf16.mxu0 %v7731_v11  ;;  %2535 = vmatprep.subr.bf16.mxu1 %v7734_v13  ;;  %v7765_v11 = vld [vmem:[#allocation9 + $0x8a0] ss:$16 sps:$4 sm:$0xff]   ;;  %v7768_v13 = vld [vmem:[#allocation9 + $0x8a8] ss:$16 sps:$4 sm:$0xff]  }
 0x318   : > { %2407 = vmatpush1.bf16.msra.mxu0 %v7729_v15  ;;  %2536 = vmatpush1.bf16.msra.mxu1 %v7732_v16  ;;  %v1403_v15 = vpack.c.bf16 %v9091_v36, %v9106_v50  ;;  %v7773_v16 = vld [vmem:[#allocation9 + $0x8c4] ss:$16 sps:$4 sm:$0xff]   ;;  %v7782_v50 = vld [vmem:[#allocation9 + $0x8ec] ss:$16 sps:$4 sm:$0xff]  }
 0x319   : > { %2408 = vmatprep.subr.bf16.mxu0 %v7737_v17  ;;  %2537 = vmatprep.subr.bf16.mxu1 %v7740_v21  ;;  %v7776_v17 = vld [vmem:[#allocation9 + $0x8cc] ss:$16 sps:$4 sm:$0xff]   ;;  %v1408_v21 = vpack.c.bf16 %v9120_v3, %v9120_v3 }
 0x31a   : > { %v1603_v3 = vshrl.u32 %v1403_v15, 16 }
 0x31c   : > { %2409 = vmatpush1.bf16.msra.mxu0 %v7735_v22  ;;  %2538 = vmatpush1.bf16.msra.mxu1 %v7738_v23  ;;  %v7771_v22 = vld [vmem:[#allocation9 + $0x8c0] ss:$16 sps:$4 sm:$0xff]   ;;  %v7774_v23 = vld [vmem:[#allocation9 + $0x8c8] ss:$16 sps:$4 sm:$0xff]  }
 0x31d   : > { %2410 = vmatprep.subr.bf16.mxu0 %v7743_v26  ;;  %2539 = vmatprep.subr.bf16.mxu1 %v7746_v27  ;;  %v1605_v26 = vshll.u32 %v1403_v15, 16  ;;  %v7779_v27 = vld [vmem:[#allocation9 + $0x8e4] ss:$16 sps:$4 sm:$0xff]   ;;  %v7818_v15 = vld [vmem:[#allocation9 + $0xac] ss:$16 sps:$4 sm:$0xff]  }
 0x320   : > { %2411 = vmatpush1.bf16.msra.mxu0 %v7741_v28  ;;  %2540 = vmatpush1.bf16.msra.mxu1 %v7744_v29  ;;  %v1610_v28 = vshll.u32 %v1408_v21, 16  ;;  %v7777_v29 = vld [vmem:[#allocation9 + $0x8e0] ss:$16 sps:$4 sm:$0xff]   ;;  %v7821_v21 = vld [vmem:[#allocation9 + $0xc4] ss:$16 sps:$4 sm:$0xff]  }
 0x321   : > { %2412 = vmatprep.subr.bf16.mxu0 %v7749_v31  ;;  %2541 = vmatprep.subr.bf16.mxu1 %v7752_v33  ;;  %v1607_v31 = vrot.slane %v1605_v26, 1  ;;  %v7785_v33 = vld [vmem:[#allocation9 + $0x4] ss:$16 sps:$4 sm:$0xff]   ;;  %v7822_v26 = vld [vmem:[#allocation9 + $0xc8] ss:$16 sps:$4 sm:$0xff]  }
 0x324   : > { %2413 = vmatpush1.bf16.msra.mxu0 %v7747_v35  ;;  %2542 = vmatpush1.bf16.msra.mxu1 %v7750_v39  ;;  %v1612_v35 = vrot.slane %v1610_v28, 1  ;;  %v1608_v39 = vor.u32 %v1607_v31, %v1603_v3  ;;  %v7825_v28 = vld [vmem:[#allocation9 + $0xe0] ss:$16 sps:$4 sm:$0xff]   ;;  %v7836_v31 = vld [vmem:[#allocation9 + $0x10c] ss:$16 sps:$4 sm:$0xff]  }
 0x325   : > { %2414 = vmatprep.subr.bf16.mxu0 %v7755_v37  ;;  %2543 = vmatprep.subr.bf16.mxu1 %v7758_v42  ;;  %v7786_v37 = vld [vmem:[#allocation9 + $0x8] ss:$16 sps:$4 sm:$0xff]   ;;  %v7839_v3 = vld [vmem:[#allocation9 + $0x124] ss:$16 sps:$4 sm:$0xff]  }
 0x326   : > { %v1613_v42 = vsel %vm463_vm5, %v1608_v39, %v1612_v35  ;;  %v7842_v35 = vld [vmem:[#allocation9 + $0x12c] ss:$16 sps:$4 sm:$0xff]   ;;  %v7837_v39 = vld [vmem:[#allocation9 + $0x120] ss:$16 sps:$4 sm:$0xff]  }
 0x328   : > { %2415 = vmatpush1.bf16.msra.mxu0 %v7753_v46  ;;  %2544 = vmatpush1.bf16.msra.mxu1 %v7756_v54  ;;  %v7794_v46 = vld [vmem:[#allocation9 + $0x2c] ss:$16 sps:$4 sm:$0xff]   ;;  %v7789_v54 = vld [vmem:[#allocation9 + $0x20] ss:$16 sps:$4 sm:$0xff]  }
 0x329   : > { %2427 = vmatprep.subr.bf16.mxu0 %v7761_v57  ;;  %2556 = vmatprep.subr.bf16.mxu1 %v7764_v58  ;;  %v7797_v57 = vld [vmem:[#allocation9 + $0x44] ss:$16 sps:$4 sm:$0xff]   ;;  %v7800_v58 = vld [vmem:[#allocation9 + $0x4c] ss:$16 sps:$4 sm:$0xff]  }
 0x32b   : > { %2417 = vmatmul.mubr.bf16.vlgmr.msra.gmra.mrb[4].mxu0 %v1589_v10  ;;  %2546 = vmatmul.mubr.bf16.vlgmr.msra.gmra.mrb[4].mxu1 %v1589_v10  ;;  %v7807_v10 = vld [vmem:[#allocation9 + $0x80] ss:$16 sps:$4 sm:$0xff]  }
 0x32c   : > { %2428 = vmatpush1.bf16.msra.mxu0 %v7759_v63  ;;  %2557 = vmatpush1.bf16.msra.mxu1 %v7762_v7  ;;  %v7806_v63 = vld [vmem:[#allocation9 + $0x6c] ss:$16 sps:$4 sm:$0xff]   ;;  %v7801_v7 = vld [vmem:[#allocation9 + $0x60] ss:$16 sps:$4 sm:$0xff]  }
 0x32d   : > { %2429 = vmatprep.subr.bf16.mxu0 %v7767_v8  ;;  %2558 = vmatprep.subr.bf16.mxu1 %v7770_v9  ;;  %v7804_v8 = vld [vmem:[#allocation9 + $0x68] ss:$16 sps:$4 sm:$0xff]   ;;  %v7809_v9 = vld [vmem:[#allocation9 + $0x84] ss:$16 sps:$4 sm:$0xff]  }
 0x32e   : > { %2459 = vmatprep.mubr.bf16.mxu0 %v8617_v1  ;;  %2588 = vmatprep.mubr.bf16.mxu1 %v8617_v1 }
 0x330   : > { %2430 = vmatpush1.bf16.msra.mxu0 %v7765_v11  ;;  %2559 = vmatpush1.bf16.msra.mxu1 %v7768_v13  ;;  %v7810_v11 = vld [vmem:[#allocation9 + $0x88] ss:$16 sps:$4 sm:$0xff]   ;;  %v7815_v13 = vld [vmem:[#allocation9 + $0xa4] ss:$16 sps:$4 sm:$0xff]  }
 0x331   : > { %2431 = vmatprep.subr.bf16.mxu0 %v7773_v16  ;;  %2560 = vmatprep.subr.bf16.mxu1 %v7776_v17  ;;  %v7813_v16 = vld [vmem:[#allocation9 + $0xa0] ss:$16 sps:$4 sm:$0xff]   ;;  %v7816_v17 = vld [vmem:[#allocation9 + $0xa8] ss:$16 sps:$4 sm:$0xff]  }
 0x334   : > { %2432 = vmatpush1.bf16.msra.mxu0 %v7771_v22  ;;  %2561 = vmatpush1.bf16.msra.mxu1 %v7774_v23  ;;  %v7824_v22 = vld [vmem:[#allocation9 + $0xcc] ss:$16 sps:$4 sm:$0xff]   ;;  %v7819_v23 = vld [vmem:[#allocation9 + $0xc0] ss:$16 sps:$4 sm:$0xff]  }
 0x335   : > { %2433 = vmatprep.subr.bf16.mxu0 %v7779_v27  ;;  %2562 = vmatprep.subr.bf16.mxu1 %v7782_v50  ;;  %v7827_v27 = vld [vmem:[#allocation9 + $0xe4] ss:$16 sps:$4 sm:$0xff]   ;;  %v7830_v50 = vld [vmem:[#allocation9 + $0xec] ss:$16 sps:$4 sm:$0xff]  }
 0x338   : > { %2434 = vmatpush1.bf16.msra.mxu0 %v7777_v29  ;;  %2563 = vmatpush1.bf16.msra.mxu1 %v7780_v30  ;;  %v7828_v29 = vld [vmem:[#allocation9 + $0xe8] ss:$16 sps:$4 sm:$0xff]   ;;  %v7833_v30 = vld [vmem:[#allocation9 + $0x104] ss:$16 sps:$4 sm:$0xff]  }
 0x339   : > { %3322 = vmatprep.subr.bf16.mxu0 %v7785_v33  ;;  %3451 = vmatprep.subr.bf16.mxu1 %v7788_v34  ;;  %v7831_v33 = vld [vmem:[#allocation9 + $0x100] ss:$16 sps:$4 sm:$0xff]   ;;  %v7834_v34 = vld [vmem:[#allocation9 + $0x108] ss:$16 sps:$4 sm:$0xff]  }
 0x33b   : > { %6687 = vmatmul.mubr.msk.bf16.vlgmr.msra.gmra.mrb[4].mxu0 %vm383_vm8, %v1613_v42  ;;  %6688 = vmatmul.mubr.msk.bf16.vlgmr.msra.gmra.mrb[4].mxu1 %vm383_vm8, %v1613_v42  ;;  %v7848_v42 = vld [vmem:[#allocation9 + $0x14c] ss:$16 sps:$4 sm:$0xff]  }
 0x33c   : > { %3323 = vmatpush1.bf16.msra.mxu0 %v7783_v40  ;;  %3354 = vmatprep.mubr.bf16.mxu0 %v9055_v48  ;;  %v7840_v40 = vld [vmem:[#allocation9 + $0x128] ss:$16 sps:$4 sm:$0xff]  }
 0x33d   : > { %3452 = vmatpush1.bf16.msra.mxu1 %v7786_v37  ;;  %3483 = vmatprep.mubr.bf16.mxu1 %v9055_v48  ;;  %v7812_v48 = vld [vmem:[#allocation9 + $0x8c] ss:$16 sps:$4 sm:$0xff]   ;;  %v7845_v37 = vld [vmem:[#allocation9 + $0x144] ss:$16 sps:$4 sm:$0xff]  }
 0x33e   : > { %3324 = vmatprep.subr.bf16.mxu0 %v7791_v45  ;;  %3453 = vmatprep.subr.bf16.mxu1 %v7794_v46  ;;  %v7843_v45 = vld [vmem:[#allocation9 + $0x140] ss:$16 sps:$4 sm:$0xff]   ;;  %v7846_v46 = vld [vmem:[#allocation9 + $0x148] ss:$16 sps:$4 sm:$0xff]  }
 0x340   : > { %3325 = vmatpush1.bf16.msra.mxu0 %v7789_v54  ;;  %v7851_v54 = vld [vmem:[#allocation9 + $0x164] ss:$16 sps:$4 sm:$0xff]  }
 0x341   : > { %3454 = vmatpush1.bf16.msra.mxu1 %v7792_v55  ;;  %3326 = vmatprep.subr.bf16.mxu0 %v7797_v57  ;;  %v7854_v55 = vld [vmem:[#allocation9 + $0x16c] ss:$16 sps:$4 sm:$0xff]   ;;  %v7849_v57 = vld [vmem:[#allocation9 + $0x160] ss:$16 sps:$4 sm:$0xff]  }
 0x342   : > { %3455 = vmatprep.subr.bf16.mxu1 %v7800_v58  ;;  %v7852_v58 = vld [vmem:[#allocation9 + $0x168] ss:$16 sps:$4 sm:$0xff]  }
 0x344   : > { %3327 = vmatpush1.bf16.msra.mxu0 %v7795_v0  ;;  %v7857_v0 = vld [vmem:[#allocation9 + $0x184] ss:$16 sps:$4 sm:$0xff]  }
 0x345   : > { %3456 = vmatpush1.bf16.msra.mxu1 %v7798_v59  ;;  %3328 = vmatprep.subr.bf16.mxu0 %v7803_v60  ;;  %v7860_v59 = vld [vmem:[#allocation9 + $0x18c] ss:$16 sps:$4 sm:$0xff]   ;;  %v7855_v60 = vld [vmem:[#allocation9 + $0x180] ss:$16 sps:$4 sm:$0xff]  }
 0x346   : > { %3457 = vmatprep.subr.bf16.mxu1 %v7806_v63  ;;  %v7858_v63 = vld [vmem:[#allocation9 + $0x188] ss:$16 sps:$4 sm:$0xff]  }
 0x348   : > { %3329 = vmatpush1.bf16.msra.mxu0 %v7801_v7  ;;  %v7863_v7 = vld [vmem:[#allocation9 + $0x1a4] ss:$16 sps:$4 sm:$0xff]  }
 0x349   : > { %3458 = vmatpush1.bf16.msra.mxu1 %v7804_v8  ;;  %3330 = vmatprep.subr.bf16.mxu0 %v7809_v9  ;;  %v7866_v8 = vld [vmem:[#allocation9 + $0x1ac] ss:$16 sps:$4 sm:$0xff]   ;;  %v7861_v9 = vld [vmem:[#allocation9 + $0x1a0] ss:$16 sps:$4 sm:$0xff]  }
 0x34a   : > { %3459 = vmatprep.subr.bf16.mxu1 %v7812_v48  ;;  %v7864_v48 = vld [vmem:[#allocation9 + $0x1a8] ss:$16 sps:$4 sm:$0xff]  }
 0x34c   : > { %3331 = vmatpush1.bf16.msra.mxu0 %v7807_v10  ;;  %v7869_v10 = vld [vmem:[#allocation9 + $0x1c4] ss:$16 sps:$4 sm:$0xff]  }
 0x34d   : > { %3460 = vmatpush1.bf16.msra.mxu1 %v7810_v11  ;;  %3332 = vmatprep.subr.bf16.mxu0 %v7815_v13  ;;  %v7872_v11 = vld [vmem:[#allocation9 + $0x1cc] ss:$16 sps:$4 sm:$0xff]   ;;  %v7867_v13 = vld [vmem:[#allocation9 + $0x1c0] ss:$16 sps:$4 sm:$0xff]  }
 0x34e   : > { %3461 = vmatprep.subr.bf16.mxu1 %v7818_v15  ;;  %v7870_v15 = vld [vmem:[#allocation9 + $0x1c8] ss:$16 sps:$4 sm:$0xff]  }
 0x350   : > { %3333 = vmatpush1.bf16.msra.mxu0 %v7813_v16  ;;  %v7875_v16 = vld [vmem:[#allocation9 + $0x1e4] ss:$16 sps:$4 sm:$0xff]  }
 0x351   : > { %3462 = vmatpush1.bf16.msra.mxu1 %v7816_v17  ;;  %3334 = vmatprep.subr.bf16.mxu0 %v7821_v21  ;;  %v7878_v17 = vld [vmem:[#allocation9 + $0x1ec] ss:$16 sps:$4 sm:$0xff]   ;;  %v7873_v21 = vld [vmem:[#allocation9 + $0x1e0] ss:$16 sps:$4 sm:$0xff]  }
 0x352   : > { %3463 = vmatprep.subr.bf16.mxu1 %v7824_v22  ;;  %v7876_v22 = vld [vmem:[#allocation9 + $0x1e8] ss:$16 sps:$4 sm:$0xff]  }
 0x354   : > { %3335 = vmatpush1.bf16.msra.mxu0 %v7819_v23  ;;  %v7881_v23 = vld [vmem:[#allocation9 + $0x204] ss:$16 sps:$4 sm:$0xff]  }
 0x355   : > { %3464 = vmatpush1.bf16.msra.mxu1 %v7822_v26  ;;  %3336 = vmatprep.subr.bf16.mxu0 %v7827_v27  ;;  %v7884_v26 = vld [vmem:[#allocation9 + $0x20c] ss:$16 sps:$4 sm:$0xff]   ;;  %v7879_v27 = vld [vmem:[#allocation9 + $0x200] ss:$16 sps:$4 sm:$0xff]  }
 0x356   : > { %3465 = vmatprep.subr.bf16.mxu1 %v7830_v50  ;;  %v7882_v50 = vld [vmem:[#allocation9 + $0x208] ss:$16 sps:$4 sm:$0xff]  }
 0x358   : > { %3337 = vmatpush1.bf16.msra.mxu0 %v7825_v28  ;;  %v7887_v28 = vld [vmem:[#allocation9 + $0x224] ss:$16 sps:$4 sm:$0xff]  }
 0x359   : > { %3466 = vmatpush1.bf16.msra.mxu1 %v7828_v29  ;;  %3338 = vmatprep.subr.bf16.mxu0 %v7833_v30  ;;  %v7890_v29 = vld [vmem:[#allocation9 + $0x22c] ss:$16 sps:$4 sm:$0xff]   ;;  %v7885_v30 = vld [vmem:[#allocation9 + $0x220] ss:$16 sps:$4 sm:$0xff]  }
 0x35a   : > { %3467 = vmatprep.subr.bf16.mxu1 %v7836_v31  ;;  %v7888_v31 = vld [vmem:[#allocation9 + $0x228] ss:$16 sps:$4 sm:$0xff]  }
 0x35c   : > { %3339 = vmatpush1.bf16.msra.mxu0 %v7831_v33  ;;  %v7893_v33 = vld [vmem:[#allocation9 + $0x244] ss:$16 sps:$4 sm:$0xff]  }
 0x35d   : > { %3468 = vmatpush1.bf16.msra.mxu1 %v7834_v34  ;;  %3340 = vmatprep.subr.bf16.mxu0 %v7839_v3  ;;  %v7896_v34 = vld [vmem:[#allocation9 + $0x24c] ss:$16 sps:$4 sm:$0xff]   ;;  %v7891_v3 = vld [vmem:[#allocation9 + $0x240] ss:$16 sps:$4 sm:$0xff]  }
 0x35e   : > { %3469 = vmatprep.subr.bf16.mxu1 %v7842_v35  ;;  %v7894_v35 = vld [vmem:[#allocation9 + $0x248] ss:$16 sps:$4 sm:$0xff]  }
 0x360   : > { %3341 = vmatpush1.bf16.msra.mxu0 %v7837_v39  ;;  %v7899_v39 = vld [vmem:[#allocation9 + $0x264] ss:$16 sps:$4 sm:$0xff]  }
 0x361   : > { %3470 = vmatpush1.bf16.msra.mxu1 %v7840_v40  ;;  %3342 = vmatprep.subr.bf16.mxu0 %v7845_v37  ;;  %v7897_v40 = vld [vmem:[#allocation9 + $0x260] ss:$16 sps:$4 sm:$0xff]   ;;  %v7900_v37 = vld [vmem:[#allocation9 + $0x268] ss:$16 sps:$4 sm:$0xff]  }
 0x362   : > { %3471 = vmatprep.subr.bf16.mxu1 %v7848_v42  ;;  %v7905_v42 = vld [vmem:[#allocation9 + $0x284] ss:$16 sps:$4 sm:$0xff]  }
 0x364   : > { %3343 = vmatpush1.bf16.msra.mxu0 %v7843_v45  ;;  %v7908_v45 = vld [vmem:[#allocation9 + $0x28c] ss:$16 sps:$4 sm:$0xff]  }
 0x365   : > { %3472 = vmatpush1.bf16.msra.mxu1 %v7846_v46  ;;  %3344 = vmatprep.subr.bf16.mxu0 %v7851_v54  ;;  %v7906_v46 = vld [vmem:[#allocation9 + $0x288] ss:$16 sps:$4 sm:$0xff]   ;;  %v7911_v54 = vld [vmem:[#allocation9 + $0x2a4] ss:$16 sps:$4 sm:$0xff]  }
 0x366   : > { %3473 = vmatprep.subr.bf16.mxu1 %v7854_v55  ;;  %v7914_v55 = vld [vmem:[#allocation9 + $0x2ac] ss:$16 sps:$4 sm:$0xff]  }
 0x368   : > { %3345 = vmatpush1.bf16.msra.mxu0 %v7849_v57  ;;  %v7909_v57 = vld [vmem:[#allocation9 + $0x2a0] ss:$16 sps:$4 sm:$0xff]  }
 0x369   : > { %3474 = vmatpush1.bf16.msra.mxu1 %v7852_v58  ;;  %3346 = vmatprep.subr.bf16.mxu0 %v7857_v0  ;;  %v7912_v58 = vld [vmem:[#allocation9 + $0x2a8] ss:$16 sps:$4 sm:$0xff]   ;;  %v7917_v0 = vld [vmem:[#allocation9 + $0x2c4] ss:$16 sps:$4 sm:$0xff]  }
 0x36a   : > { %3475 = vmatprep.subr.bf16.mxu1 %v7860_v59  ;;  %v7920_v59 = vld [vmem:[#allocation9 + $0x2cc] ss:$16 sps:$4 sm:$0xff]  }
 0x36c   : > { %3347 = vmatpush1.bf16.msra.mxu0 %v7855_v60  ;;  %v7915_v60 = vld [vmem:[#allocation9 + $0x2c0] ss:$16 sps:$4 sm:$0xff]  }
 0x36d   : > { %3476 = vmatpush1.bf16.msra.mxu1 %v7858_v63  ;;  %3348 = vmatprep.subr.bf16.mxu0 %v7863_v7  ;;  %v7918_v63 = vld [vmem:[#allocation9 + $0x2c8] ss:$16 sps:$4 sm:$0xff]   ;;  %v7923_v7 = vld [vmem:[#allocation9 + $0x2e4] ss:$16 sps:$4 sm:$0xff]  }
 0x36e   : > { %3477 = vmatprep.subr.bf16.mxu1 %v7866_v8  ;;  %v7926_v8 = vld [vmem:[#allocation9 + $0x2ec] ss:$16 sps:$4 sm:$0xff]  }
 0x370   : > { %3349 = vmatpush1.bf16.msra.mxu0 %v7861_v9  ;;  %v7921_v9 = vld [vmem:[#allocation9 + $0x2e0] ss:$16 sps:$4 sm:$0xff]  }
 0x371   : > { %3478 = vmatpush1.bf16.msra.mxu1 %v7864_v48  ;;  %3350 = vmatprep.subr.bf16.mxu0 %v7869_v10  ;;  %v7924_v48 = vld [vmem:[#allocation9 + $0x2e8] ss:$16 sps:$4 sm:$0xff]   ;;  %v7929_v10 = vld [vmem:[#allocation9 + $0x304] ss:$16 sps:$4 sm:$0xff]  }
 0x372   : > { %3479 = vmatprep.subr.bf16.mxu1 %v7872_v11  ;;  %v7932_v11 = vld [vmem:[#allocation9 + $0x30c] ss:$16 sps:$4 sm:$0xff]  }
 0x374   : > { %3351 = vmatpush1.bf16.msra.mxu0 %v7867_v13  ;;  %v7927_v13 = vld [vmem:[#allocation9 + $0x300] ss:$16 sps:$4 sm:$0xff]  }
 0x375   : > { %3480 = vmatpush1.bf16.msra.mxu1 %v7870_v15  ;;  %3352 = vmatprep.subr.bf16.mxu0 %v7875_v16  ;;  %v7930_v15 = vld [vmem:[#allocation9 + $0x308] ss:$16 sps:$4 sm:$0xff]   ;;  %v7935_v16 = vld [vmem:[#allocation9 + $0x324] ss:$16 sps:$4 sm:$0xff]  }
 0x376   : > { %3481 = vmatprep.subr.bf16.mxu1 %v7878_v17  ;;  %v7938_v17 = vld [vmem:[#allocation9 + $0x32c] ss:$16 sps:$4 sm:$0xff]  }
 0x378   : > { %3353 = vmatpush1.bf16.msra.mxu0 %v7873_v21  ;;  %v7933_v21 = vld [vmem:[#allocation9 + $0x320] ss:$16 sps:$4 sm:$0xff]  }
 0x379   : > { %3482 = vmatpush1.bf16.msra.mxu1 %v7876_v22  ;;  %3365 = vmatprep.subr.bf16.mxu0 %v7881_v23  ;;  %v7936_v22 = vld [vmem:[#allocation9 + $0x328] ss:$16 sps:$4 sm:$0xff]   ;;  %v7941_v23 = vld [vmem:[#allocation9 + $0x344] ss:$16 sps:$4 sm:$0xff]  }
 0x37a   : > { %3494 = vmatprep.subr.bf16.mxu1 %v7884_v26  ;;  %v7944_v26 = vld [vmem:[#allocation9 + $0x34c] ss:$16 sps:$4 sm:$0xff]  }
 0x37b   : > { %3355 = vmatmul.mubr.bf16.vlgmr.msra.gmra.mrb[4].mxu0 %v9068_v56 }
 0x37c   : > { %3484 = vmatmul.mubr.bf16.vlgmr.msra.gmra.mrb[4].mxu1 %v9068_v56  ;;  %3366 = vmatpush1.bf16.msra.mxu0 %v7879_v27  ;;  %v7902_v56 = vld [vmem:[#allocation9 + $0x26c] ss:$16 sps:$4 sm:$0xff]   ;;  %v7939_v27 = vld [vmem:[#allocation9 + $0x340] ss:$16 sps:$4 sm:$0xff]  }
 0x37d   : > { %3397 = vmatprep.mubr.bf16.mxu0 %v9088_v32  ;;  %3495 = vmatpush1.bf16.msra.mxu1 %v7882_v50  ;;  %v7942_v50 = vld [vmem:[#allocation9 + $0x348] ss:$16 sps:$4 sm:$0xff]  }
 0x37e   : > { %3526 = vmatprep.mubr.bf16.mxu1 %v9088_v32  ;;  %3367 = vmatprep.subr.bf16.mxu0 %v7887_v28  ;;  %v7903_v32 = vld [vmem:[#allocation9 + $0x280] ss:$16 sps:$4 sm:$0xff]   ;;  %v7947_v28 = vld [vmem:[#allocation9 + $0x364] ss:$16 sps:$4 sm:$0xff]  }
 0x37f   : > { %3496 = vmatprep.subr.bf16.mxu1 %v7890_v29  ;;  %v7950_v29 = vld [vmem:[#allocation9 + $0x36c] ss:$16 sps:$4 sm:$0xff]  }
 0x380   : > { %3368 = vmatpush1.bf16.msra.mxu0 %v7885_v30  ;;  %v7945_v30 = vld [vmem:[#allocation9 + $0x360] ss:$16 sps:$4 sm:$0xff]  }
 0x381   : > { %3497 = vmatpush1.bf16.msra.mxu1 %v7888_v31  ;;  %3369 = vmatprep.subr.bf16.mxu0 %v7893_v33  ;;  %v7948_v31 = vld [vmem:[#allocation9 + $0x368] ss:$16 sps:$4 sm:$0xff]   ;;  %v7953_v33 = vld [vmem:[#allocation9 + $0x384] ss:$16 sps:$4 sm:$0xff]  }
 0x382   : > { %3498 = vmatprep.subr.bf16.mxu1 %v7896_v34  ;;  %v7956_v34 = vld [vmem:[#allocation9 + $0x38c] ss:$16 sps:$4 sm:$0xff]  }
 0x384   : > { %3370 = vmatpush1.bf16.msra.mxu0 %v7891_v3  ;;  %v7951_v3 = vld [vmem:[#allocation9 + $0x380] ss:$16 sps:$4 sm:$0xff]  }
 0x385   : > { %3499 = vmatpush1.bf16.msra.mxu1 %v7894_v35  ;;  %3371 = vmatprep.subr.bf16.mxu0 %v7899_v39  ;;  %v7954_v35 = vld [vmem:[#allocation9 + $0x388] ss:$16 sps:$4 sm:$0xff]   ;;  %v7959_v39 = vld [vmem:[#allocation9 + $0x3a4] ss:$16 sps:$4 sm:$0xff]  }
 0x386   : > { %3500 = vmatprep.subr.bf16.mxu1 %v7902_v56  ;;  %v7962_v56 = vld [vmem:[#allocation9 + $0x3ac] ss:$16 sps:$4 sm:$0xff]  }
 0x388   : > { %3372 = vmatpush1.bf16.msra.mxu0 %v7897_v40  ;;  %v7957_v40 = vld [vmem:[#allocation9 + $0x3a0] ss:$16 sps:$4 sm:$0xff]  }
 0x389   : > { %3501 = vmatpush1.bf16.msra.mxu1 %v7900_v37  ;;  %3373 = vmatprep.subr.bf16.mxu0 %v7905_v42  ;;  %v7960_v37 = vld [vmem:[#allocation9 + $0x3a8] ss:$16 sps:$4 sm:$0xff]   ;;  %v7965_v42 = vld [vmem:[#allocation9 + $0x3c4] ss:$16 sps:$4 sm:$0xff]  }
 0x38a   : > { %3502 = vmatprep.subr.bf16.mxu1 %v7908_v45  ;;  %v7968_v45 = vld [vmem:[#allocation9 + $0x3cc] ss:$16 sps:$4 sm:$0xff]  }
 0x38c   : > { %3374 = vmatpush1.bf16.msra.mxu0 %v7903_v32  ;;  %v7963_v32 = vld [vmem:[#allocation9 + $0x3c0] ss:$16 sps:$4 sm:$0xff]  }
 0x38d   : > { %3503 = vmatpush1.bf16.msra.mxu1 %v7906_v46  ;;  %3375 = vmatprep.subr.bf16.mxu0 %v7911_v54  ;;  %v7966_v46 = vld [vmem:[#allocation9 + $0x3c8] ss:$16 sps:$4 sm:$0xff]   ;;  %v7971_v54 = vld [vmem:[#allocation9 + $0x3e4] ss:$16 sps:$4 sm:$0xff]  }
 0x38e   : > { %3504 = vmatprep.subr.bf16.mxu1 %v7914_v55  ;;  %v7974_v55 = vld [vmem:[#allocation9 + $0x3ec] ss:$16 sps:$4 sm:$0xff]  }
 0x390   : > { %3376 = vmatpush1.bf16.msra.mxu0 %v7909_v57  ;;  %v7969_v57 = vld [vmem:[#allocation9 + $0x3e0] ss:$16 sps:$4 sm:$0xff]  }
 0x391   : > { %3505 = vmatpush1.bf16.msra.mxu1 %v7912_v58  ;;  %3377 = vmatprep.subr.bf16.mxu0 %v7917_v0  ;;  %v7972_v58 = vld [vmem:[#allocation9 + $0x3e8] ss:$16 sps:$4 sm:$0xff]   ;;  %v7977_v0 = vld [vmem:[#allocation9 + $0x404] ss:$16 sps:$4 sm:$0xff]  }
 0x392   : > { %3506 = vmatprep.subr.bf16.mxu1 %v7920_v59  ;;  %v7980_v59 = vld [vmem:[#allocation9 + $0x40c] ss:$16 sps:$4 sm:$0xff]  }
 0x394   : > { %3378 = vmatpush1.bf16.msra.mxu0 %v7915_v60  ;;  %v7975_v60 = vld [vmem:[#allocation9 + $0x400] ss:$16 sps:$4 sm:$0xff]  }
 0x395   : > { %3507 = vmatpush1.bf16.msra.mxu1 %v7918_v63  ;;  %3379 = vmatprep.subr.bf16.mxu0 %v7923_v7  ;;  %v7978_v63 = vld [vmem:[#allocation9 + $0x408] ss:$16 sps:$4 sm:$0xff]   ;;  %v7983_v7 = vld [vmem:[#allocation9 + $0x424] ss:$16 sps:$4 sm:$0xff]  }
 0x396   : > { %3508 = vmatprep.subr.bf16.mxu1 %v7926_v8  ;;  %v7986_v8 = vld [vmem:[#allocation9 + $0x42c] ss:$16 sps:$4 sm:$0xff]  }
 0x398   : > { %3380 = vmatpush1.bf16.msra.mxu0 %v7921_v9  ;;  %v7981_v9 = vld [vmem:[#allocation9 + $0x420] ss:$16 sps:$4 sm:$0xff]  }
 0x399   : > { %3509 = vmatpush1.bf16.msra.mxu1 %v7924_v48  ;;  %3381 = vmatprep.subr.bf16.mxu0 %v7929_v10  ;;  %v7984_v48 = vld [vmem:[#allocation9 + $0x428] ss:$16 sps:$4 sm:$0xff]   ;;  %v7989_v10 = vld [vmem:[#allocation9 + $0x444] ss:$16 sps:$4 sm:$0xff]  }
 0x39a   : > { %3510 = vmatprep.subr.bf16.mxu1 %v7932_v11  ;;  %v7992_v11 = vld [vmem:[#allocation9 + $0x44c] ss:$16 sps:$4 sm:$0xff]  }
 0x39c   : > { %3382 = vmatpush1.bf16.msra.mxu0 %v7927_v13  ;;  %v7987_v13 = vld [vmem:[#allocation9 + $0x440] ss:$16 sps:$4 sm:$0xff]  }
 0x39d   : > { %3511 = vmatpush1.bf16.msra.mxu1 %v7930_v15  ;;  %3383 = vmatprep.subr.bf16.mxu0 %v7935_v16  ;;  %v7990_v15 = vld [vmem:[#allocation9 + $0x448] ss:$16 sps:$4 sm:$0xff]   ;;  %v7995_v16 = vld [vmem:[#allocation9 + $0x464] ss:$16 sps:$4 sm:$0xff]  }
 0x39e   : > { %3512 = vmatprep.subr.bf16.mxu1 %v7938_v17  ;;  %v7993_v17 = vld [vmem:[#allocation9 + $0x460] ss:$16 sps:$4 sm:$0xff]  }
 0x3a0   : > { %3384 = vmatpush1.bf16.msra.mxu0 %v7933_v21  ;;  %v3596_v21 = vpack.c.bf16 %v9077_v6, %v9077_v6  ;;  %v8010_v6 = vld [vmem:[#allocation9 + $0x92c] ss:$16 sps:$4 sm:$0xff]  }
 0x3a1   : > { %3513 = vmatpush1.bf16.msra.mxu1 %v7936_v22  ;;  %3385 = vmatprep.subr.bf16.mxu0 %v7941_v23  ;;  %v7996_v22 = vld [vmem:[#allocation9 + $0x468] ss:$16 sps:$4 sm:$0xff]   ;;  %v8001_v23 = vld [vmem:[#allocation9 + $0x904] ss:$16 sps:$4 sm:$0xff]  }
 0x3a2   : > { %3514 = vmatprep.subr.bf16.mxu1 %v7944_v26  ;;  %v8004_v26 = vld [vmem:[#allocation9 + $0x90c] ss:$16 sps:$4 sm:$0xff]  }
 0x3a4   : > { %3386 = vmatpush1.bf16.msra.mxu0 %v7939_v27  ;;  %v3591_v27 = vpack.c.bf16 %v9050_v43, %v9057_v49  ;;  %v8005_v43 = vld [vmem:[#allocation9 + $0x920] ss:$16 sps:$4 sm:$0xff]   ;;  %v8008_v49 = vld [vmem:[#allocation9 + $0x928] ss:$16 sps:$4 sm:$0xff]  }
 0x3a5   : > { %3515 = vmatpush1.bf16.msra.mxu1 %v7942_v50  ;;  %3387 = vmatprep.subr.bf16.mxu0 %v7947_v28  ;;  %v7999_v50 = vld [vmem:[#allocation9 + $0x900] ss:$16 sps:$4 sm:$0xff]   ;;  %v3759_v28 = vrot.slane %v3596_v21, 1  ;;  %v8056_v21 = vld [vmem:[#allocation9 + $0xa28] ss:$16 sps:$4 sm:$0xff]  }
 0x3a6   : > { %3516 = vmatprep.subr.bf16.mxu1 %v7950_v29  ;;  %v8002_v29 = vld [vmem:[#allocation9 + $0x908] ss:$16 sps:$4 sm:$0xff]  }
 0x3a8   : > { %3388 = vmatpush1.bf16.msra.mxu0 %v7945_v30  ;;  %v3758_v30 = vrot.slane %v3591_v27, 1  ;;  %v8062_v27 = vld [vmem:[#allocation9 + $0xa48] ss:$16 sps:$4 sm:$0xff]  }
 0x3a9   : > { %3517 = vmatpush1.bf16.msra.mxu1 %v7948_v31  ;;  %3389 = vmatprep.subr.bf16.mxu0 %v7953_v33  ;;  %v8007_v31 = vld [vmem:[#allocation9 + $0x924] ss:$16 sps:$4 sm:$0xff]  }
 0x3aa   : > { %3518 = vmatprep.subr.bf16.mxu1 %v7956_v34  ;;  %v3760_v33 = vsel %vm885_vm7, %v3758_v30, %v3759_v28  ;;  %v8013_v34 = vld [vmem:[#allocation9 + $0x944] ss:$16 sps:$4 sm:$0xff]   ;;  %v8070_v28 = vld [vmem:[#allocation9 + $0xa6c] ss:$16 sps:$4 sm:$0xff]   ;;  %v8068_v30 = vld [vmem:[#allocation9 + $0xa68] ss:$16 sps:$4 sm:$0xff]  }
 0x3ac   : > { %3390 = vmatpush1.bf16.msra.mxu0 %v7951_v3  ;;  %v8016_v3 = vld [vmem:[#allocation9 + $0x94c] ss:$16 sps:$4 sm:$0xff]  }
 0x3ad   : > { %3519 = vmatpush1.bf16.msra.mxu1 %v7954_v35  ;;  %3391 = vmatprep.subr.bf16.mxu0 %v7959_v39  ;;  %v8011_v35 = vld [vmem:[#allocation9 + $0x940] ss:$16 sps:$4 sm:$0xff]   ;;  %v8014_v39 = vld [vmem:[#allocation9 + $0x948] ss:$16 sps:$4 sm:$0xff]  }
 0x3ae   : > { %3520 = vmatprep.subr.bf16.mxu1 %v7962_v56  ;;  %v8019_v56 = vld [vmem:[#allocation9 + $0x964] ss:$16 sps:$4 sm:$0xff]  }
 0x3b0   : > { %3392 = vmatpush1.bf16.msra.mxu0 %v7957_v40  ;;  %v8017_v40 = vld [vmem:[#allocation9 + $0x960] ss:$16 sps:$4 sm:$0xff]  }
 0x3b1   : > { %3521 = vmatpush1.bf16.msra.mxu1 %v7960_v37  ;;  %3393 = vmatprep.subr.bf16.mxu0 %v7965_v42  ;;  %v8020_v37 = vld [vmem:[#allocation9 + $0x968] ss:$16 sps:$4 sm:$0xff]   ;;  %v8025_v42 = vld [vmem:[#allocation9 + $0x984] ss:$16 sps:$4 sm:$0xff]  }
 0x3b2   : > { %3522 = vmatprep.subr.bf16.mxu1 %v7968_v45  ;;  %v8028_v45 = vld [vmem:[#allocation9 + $0x98c] ss:$16 sps:$4 sm:$0xff]  }
 0x3b4   : > { %3394 = vmatpush1.bf16.msra.mxu0 %v7963_v32  ;;  %v8023_v32 = vld [vmem:[#allocation9 + $0x980] ss:$16 sps:$4 sm:$0xff]  }
 0x3b5   : > { %3523 = vmatpush1.bf16.msra.mxu1 %v7966_v46  ;;  %3395 = vmatprep.subr.bf16.mxu0 %v7971_v54  ;;  %v8026_v46 = vld [vmem:[#allocation9 + $0x988] ss:$16 sps:$4 sm:$0xff]   ;;  %v8031_v54 = vld [vmem:[#allocation9 + $0x9a4] ss:$16 sps:$4 sm:$0xff]  }
 0x3b6   : > { %3524 = vmatprep.subr.bf16.mxu1 %v7974_v55  ;;  %v8034_v55 = vld [vmem:[#allocation9 + $0x9ac] ss:$16 sps:$4 sm:$0xff]  }
 0x3b8   : > { %3396 = vmatpush1.bf16.msra.mxu0 %v7969_v57  ;;  %v8029_v57 = vld [vmem:[#allocation9 + $0x9a0] ss:$16 sps:$4 sm:$0xff]  }
 0x3b9   : > { %3525 = vmatpush1.bf16.msra.mxu1 %v7972_v58  ;;  %3408 = vmatprep.subr.bf16.mxu0 %v7977_v0  ;;  %v8032_v58 = vld [vmem:[#allocation9 + $0x9a8] ss:$16 sps:$4 sm:$0xff]   ;;  %v8037_v0 = vld [vmem:[#allocation9 + $0x9c4] ss:$16 sps:$4 sm:$0xff]  }
 0x3ba   : > { %3537 = vmatprep.subr.bf16.mxu1 %v7980_v59  ;;  %v8040_v59 = vld [vmem:[#allocation9 + $0x9cc] ss:$16 sps:$4 sm:$0xff]  }
 0x3bb   : > { %3398 = vmatmul.mubr.bf16.vlgmr.msra.gmra.mrb[4].mxu0 %v9094_v38 }
 0x3bc   : > { %3527 = vmatmul.mubr.bf16.vlgmr.msra.gmra.mrb[4].mxu1 %v9094_v38  ;;  %3409 = vmatpush1.bf16.msra.mxu0 %v7975_v60  ;;  %v7998_v38 = vld [vmem:[#allocation9 + $0x46c] ss:$16 sps:$4 sm:$0xff]   ;;  %v8035_v60 = vld [vmem:[#allocation9 + $0x9c0] ss:$16 sps:$4 sm:$0xff]  }
 0x3bd   : > { %3538 = vmatpush1.bf16.msra.mxu1 %v7978_v63  ;;  %3410 = vmatprep.subr.bf16.mxu0 %v7983_v7  ;;  %v8038_v63 = vld [vmem:[#allocation9 + $0x9c8] ss:$16 sps:$4 sm:$0xff]   ;;  %v8043_v7 = vld [vmem:[#allocation9 + $0x9e4] ss:$16 sps:$4 sm:$0xff]  }
 0x3be   : > { %3539 = vmatprep.subr.bf16.mxu1 %v7986_v8  ;;  %3440 = vmatprep.mubr.bf16.mxu0 %v8617_v1  ;;  %v8046_v8 = vld [vmem:[#allocation9 + $0x9ec] ss:$16 sps:$4 sm:$0xff]  }
 0x3bf   : > { %3569 = vmatprep.mubr.bf16.mxu1 %v8617_v1 }
 0x3c0   : > { %3411 = vmatpush1.bf16.msra.mxu0 %v7981_v9  ;;  %v8041_v9 = vld [vmem:[#allocation9 + $0x9e0] ss:$16 sps:$4 sm:$0xff]  }
 0x3c1   : > { %3540 = vmatpush1.bf16.msra.mxu1 %v7984_v48  ;;  %3412 = vmatprep.subr.bf16.mxu0 %v7989_v10  ;;  %v8044_v48 = vld [vmem:[#allocation9 + $0x9e8] ss:$16 sps:$4 sm:$0xff]   ;;  %v8049_v10 = vld [vmem:[#allocation9 + $0xa04] ss:$16 sps:$4 sm:$0xff]  }
 0x3c2   : > { %3541 = vmatprep.subr.bf16.mxu1 %v7992_v11  ;;  %v8052_v11 = vld [vmem:[#allocation9 + $0xa0c] ss:$16 sps:$4 sm:$0xff]  }
 0x3c4   : > { %3413 = vmatpush1.bf16.msra.mxu0 %v7987_v13  ;;  %v8047_v13 = vld [vmem:[#allocation9 + $0xa00] ss:$16 sps:$4 sm:$0xff]  }
 0x3c5   : > { %3542 = vmatpush1.bf16.msra.mxu1 %v7990_v15  ;;  %3414 = vmatprep.subr.bf16.mxu0 %v7995_v16  ;;  %v8050_v15 = vld [vmem:[#allocation9 + $0xa08] ss:$16 sps:$4 sm:$0xff]   ;;  %v8055_v16 = vld [vmem:[#allocation9 + $0xa24] ss:$16 sps:$4 sm:$0xff]  }
 0x3c6   : > { %3543 = vmatprep.subr.bf16.mxu1 %v7998_v38  ;;  %v8058_v38 = vld [vmem:[#allocation9 + $0xa2c] ss:$16 sps:$4 sm:$0xff]  }
 0x3c8   : > { %3415 = vmatpush1.bf16.msra.mxu0 %v7993_v17  ;;  %v8053_v17 = vld [vmem:[#allocation9 + $0xa20] ss:$16 sps:$4 sm:$0xff]  }
 0x3c9   : > { %3544 = vmatpush1.bf16.msra.mxu1 %v7996_v22  ;;  %4497 = vmatprep.subr.bf16.mxu0 %v8001_v23  ;;  %v8061_v22 = vld [vmem:[#allocation9 + $0xa44] ss:$16 sps:$4 sm:$0xff]   ;;  %v8064_v23 = vld [vmem:[#allocation9 + $0xa4c] ss:$16 sps:$4 sm:$0xff]  }
 0x3ca   : > { %4626 = vmatprep.subr.bf16.mxu1 %v8004_v26  ;;  %v8059_v26 = vld [vmem:[#allocation9 + $0xa40] ss:$16 sps:$4 sm:$0xff]  }
 0x3cb   : > { %6833 = vmatmul.mubr.msk.bf16.vlgmr.msra.gmra.mrb[4].mxu0 %vm383_vm8, %v9100_v44 }
 0x3cc   : > { %6834 = vmatmul.mubr.msk.bf16.vlgmr.msra.gmra.mrb[4].mxu1 %vm383_vm8, %v9100_v44  ;;  %4498 = vmatpush1.bf16.msra.mxu0 %v7999_v50  ;;  %v8022_v44 = vld [vmem:[#allocation9 + $0x96c] ss:$16 sps:$4 sm:$0xff]   ;;  %v8067_v50 = vld [vmem:[#allocation9 + $0xa64] ss:$16 sps:$4 sm:$0xff]  }
 0x3cd   : > { %4529 = vmatprep.mubr.bf16.mxu0 %v3760_v33  ;;  %4627 = vmatpush1.bf16.msra.mxu1 %v8002_v29  ;;  %v8065_v29 = vld [vmem:[#allocation9 + $0xa60] ss:$16 sps:$4 sm:$0xff]  }
 0x3ce   : > { %4658 = vmatprep.mubr.bf16.mxu1 %v3760_v33  ;;  %4499 = vmatprep.subr.bf16.mxu0 %v8007_v31  ;;  %v8073_v31 = vld [vmem:[#allocation9 + $0xa84] ss:$16 sps:$4 sm:$0xff]   ;;  %v8071_v33 = vld [vmem:[#allocation9 + $0xa80] ss:$16 sps:$4 sm:$0xff]  }
 0x3cf   : > { %4628 = vmatprep.subr.bf16.mxu1 %v8010_v6  ;;  %v8076_v6 = vld [vmem:[#allocation9 + $0xa8c] ss:$16 sps:$4 sm:$0xff]  }
 0x3d0   : > { %4500 = vmatpush1.bf16.msra.mxu0 %v8005_v43  ;;  %v8074_v43 = vld [vmem:[#allocation9 + $0xa88] ss:$16 sps:$4 sm:$0xff]  }
 0x3d1   : > { %4629 = vmatpush1.bf16.msra.mxu1 %v8008_v49  ;;  %4501 = vmatprep.subr.bf16.mxu0 %v8013_v34  ;;  %v8079_v49 = vld [vmem:[#allocation9 + $0xaa4] ss:$16 sps:$4 sm:$0xff]   ;;  %v8082_v34 = vld [vmem:[#allocation9 + $0xaac] ss:$16 sps:$4 sm:$0xff]  }
 0x3d2   : > { %4630 = vmatprep.subr.bf16.mxu1 %v8016_v3  ;;  %v8077_v3 = vld [vmem:[#allocation9 + $0xaa0] ss:$16 sps:$4 sm:$0xff]  }
 0x3d4   : > { %4502 = vmatpush1.bf16.msra.mxu0 %v8011_v35  ;;  %v8080_v35 = vld [vmem:[#allocation9 + $0xaa8] ss:$16 sps:$4 sm:$0xff]  }
 0x3d5   : > { %4631 = vmatpush1.bf16.msra.mxu1 %v8014_v39  ;;  %4503 = vmatprep.subr.bf16.mxu0 %v8019_v56  ;;  %v8085_v39 = vld [vmem:[#allocation9 + $0xac4] ss:$16 sps:$4 sm:$0xff]   ;;  %v8088_v56 = vld [vmem:[#allocation9 + $0xacc] ss:$16 sps:$4 sm:$0xff]  }
 0x3d6   : > { %4632 = vmatprep.subr.bf16.mxu1 %v8022_v44  ;;  %v8083_v44 = vld [vmem:[#allocation9 + $0xac0] ss:$16 sps:$4 sm:$0xff]  }
 0x3d8   : > { %4504 = vmatpush1.bf16.msra.mxu0 %v8017_v40  ;;  %v8086_v40 = vld [vmem:[#allocation9 + $0xac8] ss:$16 sps:$4 sm:$0xff]  }
 0x3d9   : > { %4633 = vmatpush1.bf16.msra.mxu1 %v8020_v37  ;;  %4505 = vmatprep.subr.bf16.mxu0 %v8025_v42  ;;  %v8091_v37 = vld [vmem:[#allocation9 + $0xae4] ss:$16 sps:$4 sm:$0xff]   ;;  %v8094_v42 = vld [vmem:[#allocation9 + $0xaec] ss:$16 sps:$4 sm:$0xff]  }
 0x3da   : > { %4634 = vmatprep.subr.bf16.mxu1 %v8028_v45  ;;  %v3595_v45 = vpack.c.bf16 %v9070_v61, %v9070_v61 }
 0x3dc   : > { %4506 = vmatpush1.bf16.msra.mxu0 %v8023_v32  ;;  %v8089_v32 = vld [vmem:[#allocation9 + $0xae0] ss:$16 sps:$4 sm:$0xff]  }
 0x3dd   : > { %4635 = vmatpush1.bf16.msra.mxu1 %v8026_v46  ;;  %4507 = vmatprep.subr.bf16.mxu0 %v8031_v54  ;;  %v3590_v46 = vpack.c.bf16 %v9059_v51, %v9045_v41  ;;  %v3598_v54 = vpack.c.bf16 %v9118_v2, %v9118_v2  ;;  %v8098_v41 = vld [vmem:[#allocation9 + $0xb08] ss:$16 sps:$4 sm:$0xff]  }
 0x3de   : > { %4636 = vmatprep.subr.bf16.mxu1 %v8034_v55  ;;  %v8092_v55 = vld [vmem:[#allocation9 + $0xae8] ss:$16 sps:$4 sm:$0xff]  }
 0x3df   : > { %v3755_v61 = vrot.slane %v3590_v46, 1  ;;  %v8160_v46 = vld [vmem:[#allocation9 + $0xc4c] ss:$16 sps:$4 sm:$0xff]  }
 0x3e0   : > { %4508 = vmatpush1.bf16.msra.mxu0 %v8029_v57  ;;  %v8097_v57 = vld [vmem:[#allocation9 + $0xb04] ss:$16 sps:$4 sm:$0xff]  }
 0x3e1   : > { %4637 = vmatpush1.bf16.msra.mxu1 %v8032_v58  ;;  %4509 = vmatprep.subr.bf16.mxu0 %v8037_v0  ;;  %v3756_v58 = vrot.slane %v3595_v45, 1  ;;  %v8100_v0 = vld [vmem:[#allocation9 + $0xb0c] ss:$16 sps:$4 sm:$0xff]   ;;  %v8152_v45 = vld [vmem:[#allocation9 + $0xc28] ss:$16 sps:$4 sm:$0xff]  }
 0x3e2   : > { %4638 = vmatprep.subr.bf16.mxu1 %v8040_v59  ;;  %v3593_v59 = vpack.c.bf16 %v9082_v14, %v9104_v47  ;;  %v8104_v14 = vld [vmem:[#allocation9 + $0xb28] ss:$16 sps:$4 sm:$0xff]   ;;  %v8109_v47 = vld [vmem:[#allocation9 + $0xb44] ss:$16 sps:$4 sm:$0xff]  }
 0x3e3   : > { %v3757_v51 = vsel %vm885_vm7, %v3755_v61, %v3756_v58  ;;  %v8166_v58 = vld [vmem:[#allocation9 + $0xc6c] ss:$16 sps:$4 sm:$0xff]   ;;  %v8169_v61 = vld [vmem:[#allocation9 + $0xc84] ss:$16 sps:$4 sm:$0xff]  }
 0x3e4   : > { %4510 = vmatpush1.bf16.msra.mxu0 %v8035_v60  ;;  %v8095_v60 = vld [vmem:[#allocation9 + $0xb00] ss:$16 sps:$4 sm:$0xff]   ;;  %v3764_v2 = vrot.slane %v3593_v59, 1  ;;  %v8164_v59 = vld [vmem:[#allocation9 + $0xc68] ss:$16 sps:$4 sm:$0xff]  }
 0x3e5   : > { %4639 = vmatpush1.bf16.msra.mxu1 %v8038_v63  ;;  %4511 = vmatprep.subr.bf16.mxu0 %v8043_v7  ;;  %v3765_v63 = vrot.slane %v3598_v54, 1  ;;  %v8103_v7 = vld [vmem:[#allocation9 + $0xb24] ss:$16 sps:$4 sm:$0xff]   ;;  %v8155_v54 = vld [vmem:[#allocation9 + $0xc40] ss:$16 sps:$4 sm:$0xff]  }
 0x3e6   : > { %4640 = vmatprep.subr.bf16.mxu1 %v8046_v8  ;;  %v8106_v8 = vld [vmem:[#allocation9 + $0xb2c] ss:$16 sps:$4 sm:$0xff]  }
 0x3e8   : > { %4512 = vmatpush1.bf16.msra.mxu0 %v8041_v9  ;;  %v3766_v9 = vsel %vm885_vm7, %v3764_v2, %v3765_v63  ;;  %v8167_v63 = vld [vmem:[#allocation9 + $0xc80] ss:$16 sps:$4 sm:$0xff]   ;;  %v8178_v2 = vld [vmem:[#allocation9 + $0xcac] ss:$16 sps:$4 sm:$0xff]  }
 0x3e9   : > { %4641 = vmatpush1.bf16.msra.mxu1 %v8044_v48  ;;  %4513 = vmatprep.subr.bf16.mxu0 %v8049_v10  ;;  %v8101_v48 = vld [vmem:[#allocation9 + $0xb20] ss:$16 sps:$4 sm:$0xff]   ;;  %v8112_v10 = vld [vmem:[#allocation9 + $0xb4c] ss:$16 sps:$4 sm:$0xff]  }
 0x3ea   : > { %4642 = vmatprep.subr.bf16.mxu1 %v8052_v11  ;;  %v8107_v11 = vld [vmem:[#allocation9 + $0xb40] ss:$16 sps:$4 sm:$0xff]  }
 0x3ec   : > { %4514 = vmatpush1.bf16.msra.mxu0 %v8047_v13  ;;  %v8110_v13 = vld [vmem:[#allocation9 + $0xb48] ss:$16 sps:$4 sm:$0xff]  }
 0x3ed   : > { %4643 = vmatpush1.bf16.msra.mxu1 %v8050_v15  ;;  %4515 = vmatprep.subr.bf16.mxu0 %v8055_v16  ;;  %v8115_v15 = vld [vmem:[#allocation9 + $0xb64] ss:$16 sps:$4 sm:$0xff]   ;;  %v8118_v16 = vld [vmem:[#allocation9 + $0xb6c] ss:$16 sps:$4 sm:$0xff]  }
 0x3ee   : > { %4644 = vmatprep.subr.bf16.mxu1 %v8058_v38  ;;  %v8113_v38 = vld [vmem:[#allocation9 + $0xb60] ss:$16 sps:$4 sm:$0xff]  }
 0x3f0   : > { %4516 = vmatpush1.bf16.msra.mxu0 %v8053_v17  ;;  %v8116_v17 = vld [vmem:[#allocation9 + $0xb68] ss:$16 sps:$4 sm:$0xff]  }
 0x3f1   : > { %4645 = vmatpush1.bf16.msra.mxu1 %v8056_v21  ;;  %4517 = vmatprep.subr.bf16.mxu0 %v8061_v22  ;;  %v8121_v21 = vld [vmem:[#allocation9 + $0xb84] ss:$16 sps:$4 sm:$0xff]   ;;  %v8124_v22 = vld [vmem:[#allocation9 + $0xb8c] ss:$16 sps:$4 sm:$0xff]  }
 0x3f2   : > { %4646 = vmatprep.subr.bf16.mxu1 %v8064_v23  ;;  %v8119_v23 = vld [vmem:[#allocation9 + $0xb80] ss:$16 sps:$4 sm:$0xff]  }
 0x3f4   : > { %4518 = vmatpush1.bf16.msra.mxu0 %v8059_v26  ;;  %v8122_v26 = vld [vmem:[#allocation9 + $0xb88] ss:$16 sps:$4 sm:$0xff]  }
 0x3f5   : > { %4647 = vmatpush1.bf16.msra.mxu1 %v8062_v27  ;;  %4519 = vmatprep.subr.bf16.mxu0 %v8067_v50  ;;  %v8127_v27 = vld [vmem:[#allocation9 + $0xba4] ss:$16 sps:$4 sm:$0xff]   ;;  %v8130_v50 = vld [vmem:[#allocation9 + $0xbac] ss:$16 sps:$4 sm:$0xff]  }
 0x3f6   : > { %4648 = vmatprep.subr.bf16.mxu1 %v8070_v28  ;;  %v8125_v28 = vld [vmem:[#allocation9 + $0xba0] ss:$16 sps:$4 sm:$0xff]  }
 0x3f8   : > { %4520 = vmatpush1.bf16.msra.mxu0 %v8065_v29  ;;  %v8128_v29 = vld [vmem:[#allocation9 + $0xba8] ss:$16 sps:$4 sm:$0xff]  }
 0x3f9   : > { %4649 = vmatpush1.bf16.msra.mxu1 %v8068_v30  ;;  %4521 = vmatprep.subr.bf16.mxu0 %v8073_v31  ;;  %v8133_v30 = vld [vmem:[#allocation9 + $0xbc4] ss:$16 sps:$4 sm:$0xff]   ;;  %v8136_v31 = vld [vmem:[#allocation9 + $0xbcc] ss:$16 sps:$4 sm:$0xff]  }
 0x3fa   : > { %4650 = vmatprep.subr.bf16.mxu1 %v8076_v6  ;;  %v8131_v6 = vld [vmem:[#allocation9 + $0xbc0] ss:$16 sps:$4 sm:$0xff]  }
 0x3fc   : > { %4522 = vmatpush1.bf16.msra.mxu0 %v8071_v33  ;;  %v8134_v33 = vld [vmem:[#allocation9 + $0xbc8] ss:$16 sps:$4 sm:$0xff]  }
 0x3fd   : > { %4651 = vmatpush1.bf16.msra.mxu1 %v8074_v43  ;;  %4523 = vmatprep.subr.bf16.mxu0 %v8079_v49  ;;  %v8139_v43 = vld [vmem:[#allocation9 + $0xbe4] ss:$16 sps:$4 sm:$0xff]   ;;  %v8142_v49 = vld [vmem:[#allocation9 + $0xbec] ss:$16 sps:$4 sm:$0xff]  }
 0x3fe   : > { %4652 = vmatprep.subr.bf16.mxu1 %v8082_v34  ;;  %v8137_v34 = vld [vmem:[#allocation9 + $0xbe0] ss:$16 sps:$4 sm:$0xff]  }
 0x400   : > { %4524 = vmatpush1.bf16.msra.mxu0 %v8077_v3  ;;  %v8140_v3 = vld [vmem:[#allocation9 + $0xbe8] ss:$16 sps:$4 sm:$0xff]  }
 0x401   : > { %4653 = vmatpush1.bf16.msra.mxu1 %v8080_v35  ;;  %4525 = vmatprep.subr.bf16.mxu0 %v8085_v39  ;;  %v8145_v35 = vld [vmem:[#allocation9 + $0xc04] ss:$16 sps:$4 sm:$0xff]   ;;  %v8148_v39 = vld [vmem:[#allocation9 + $0xc0c] ss:$16 sps:$4 sm:$0xff]  }
 0x402   : > { %4654 = vmatprep.subr.bf16.mxu1 %v8088_v56  ;;  %v8143_v56 = vld [vmem:[#allocation9 + $0xc00] ss:$16 sps:$4 sm:$0xff]  }
 0x404   : > { %4526 = vmatpush1.bf16.msra.mxu0 %v8083_v44  ;;  %v8146_v44 = vld [vmem:[#allocation9 + $0xc08] ss:$16 sps:$4 sm:$0xff]  }
 0x405   : > { %4655 = vmatpush1.bf16.msra.mxu1 %v8086_v40  ;;  %4527 = vmatprep.subr.bf16.mxu0 %v8091_v37  ;;  %v8151_v40 = vld [vmem:[#allocation9 + $0xc24] ss:$16 sps:$4 sm:$0xff]   ;;  %v8154_v37 = vld [vmem:[#allocation9 + $0xc2c] ss:$16 sps:$4 sm:$0xff]  }
 0x406   : > { %4656 = vmatprep.subr.bf16.mxu1 %v8094_v42  ;;  %v8149_v42 = vld [vmem:[#allocation9 + $0xc20] ss:$16 sps:$4 sm:$0xff]  }
 0x408   : > { %4528 = vmatpush1.bf16.msra.mxu0 %v8089_v32  ;;  %v8157_v32 = vld [vmem:[#allocation9 + $0xc44] ss:$16 sps:$4 sm:$0xff]  }
 0x409   : > { %4657 = vmatpush1.bf16.msra.mxu1 %v8092_v55  ;;  %4540 = vmatprep.subr.bf16.mxu0 %v8097_v57  ;;  %v8158_v55 = vld [vmem:[#allocation9 + $0xc48] ss:$16 sps:$4 sm:$0xff]   ;;  %v8163_v57 = vld [vmem:[#allocation9 + $0xc64] ss:$16 sps:$4 sm:$0xff]  }
 0x40a   : > { %4669 = vmatprep.subr.bf16.mxu1 %v8100_v0  ;;  %v8161_v0 = vld [vmem:[#allocation9 + $0xc60] ss:$16 sps:$4 sm:$0xff]  }
 0x40b   : > { %4530 = vmatmul.mubr.bf16.vlgmr.msra.gmra.mrb[4].mxu0 %v3757_v51 }
 0x40c   : > { %4659 = vmatmul.mubr.bf16.vlgmr.msra.gmra.mrb[4].mxu1 %v3757_v51  ;;  %4541 = vmatpush1.bf16.msra.mxu0 %v8095_v60  ;;  %v8172_v60 = vld [vmem:[#allocation9 + $0xc8c] ss:$16 sps:$4 sm:$0xff]   ;;  %v8175_v51 = vld [vmem:[#allocation9 + $0xca4] ss:$16 sps:$4 sm:$0xff]  }
 0x40d   : > { %4572 = vmatprep.mubr.bf16.mxu0 %v3766_v9  ;;  %4670 = vmatpush1.bf16.msra.mxu1 %v8098_v41  ;;  %v8170_v41 = vld [vmem:[#allocation9 + $0xc88] ss:$16 sps:$4 sm:$0xff]  }
 0x40e   : > { %4701 = vmatprep.mubr.bf16.mxu1 %v3766_v9  ;;  %4542 = vmatprep.subr.bf16.mxu0 %v8103_v7  ;;  %v8173_v7 = vld [vmem:[#allocation9 + $0xca0] ss:$16 sps:$4 sm:$0xff]   ;;  %v8181_v9 = vld [vmem:[#allocation9 + $0xcc4] ss:$16 sps:$4 sm:$0xff]  }
 0x40f   : > { %4671 = vmatprep.subr.bf16.mxu1 %v8106_v8  ;;  %v8176_v8 = vld [vmem:[#allocation9 + $0xca8] ss:$16 sps:$4 sm:$0xff]  }
 0x410   : > { %4543 = vmatpush1.bf16.msra.mxu0 %v8101_v48  ;;  %v8184_v48 = vld [vmem:[#allocation9 + $0xccc] ss:$16 sps:$4 sm:$0xff]  }
 0x411   : > { %4672 = vmatpush1.bf16.msra.mxu1 %v8104_v14  ;;  %4544 = vmatprep.subr.bf16.mxu0 %v8109_v47  ;;  %v8179_v14 = vld [vmem:[#allocation9 + $0xcc0] ss:$16 sps:$4 sm:$0xff]   ;;  %v8182_v47 = vld [vmem:[#allocation9 + $0xcc8] ss:$16 sps:$4 sm:$0xff]  }
 0x412   : > { %4673 = vmatprep.subr.bf16.mxu1 %v8112_v10  ;;  %v8187_v10 = vld [vmem:[#allocation9 + $0xce4] ss:$16 sps:$4 sm:$0xff]  }
 0x414   : > { %4545 = vmatpush1.bf16.msra.mxu0 %v8107_v11  ;;  %v8190_v11 = vld [vmem:[#allocation9 + $0xcec] ss:$16 sps:$4 sm:$0xff]  }
 0x415   : > { %4674 = vmatpush1.bf16.msra.mxu1 %v8110_v13  ;;  %4546 = vmatprep.subr.bf16.mxu0 %v8115_v15  ;;  %v3597_v13 = vpack.c.bf16 %v9123_v4, %v9123_v4  ;;  %v8185_v15 = vld [vmem:[#allocation9 + $0xce0] ss:$16 sps:$4 sm:$0xff]  }
 0x416   : > { %4675 = vmatprep.subr.bf16.mxu1 %v8118_v16  ;;  %v3592_v16 = vpack.c.bf16 %v9073_v62, %v9109_v52  ;;  %v8197_v62 = vld [vmem:[#allocation9 + $0xd20] ss:$16 sps:$4 sm:$0xff]   ;;  %v8200_v52 = vld [vmem:[#allocation9 + $0xd28] ss:$16 sps:$4 sm:$0xff]  }
 0x418   : > { %4547 = vmatpush1.bf16.msra.mxu0 %v8113_v38  ;;  %v8188_v38 = vld [vmem:[#allocation9 + $0xce8] ss:$16 sps:$4 sm:$0xff]  }
 0x419   : > { %4676 = vmatpush1.bf16.msra.mxu1 %v8116_v17  ;;  %4548 = vmatprep.subr.bf16.mxu0 %v8121_v21  ;;  %v8193_v17 = vld [vmem:[#allocation9 + $0xd04] ss:$16 sps:$4 sm:$0xff]   ;;  %v3762_v21 = vrot.slane %v3597_v13, 1 }
 0x41a   : > { %4677 = vmatprep.subr.bf16.mxu1 %v8124_v22  ;;  %v8196_v22 = vld [vmem:[#allocation9 + $0xd0c] ss:$16 sps:$4 sm:$0xff]   ;;  %v8227_v13 = vld [vmem:[#allocation12 + $0x140] sm:$0xff]  }
 0x41c   : > { %4549 = vmatpush1.bf16.msra.mxu0 %v8119_v23  ;;  %v3761_v23 = vrot.slane %v3592_v16, 1 }
 0x41d   : > { %4678 = vmatpush1.bf16.msra.mxu1 %v8122_v26  ;;  %4550 = vmatprep.subr.bf16.mxu0 %v8127_v27  ;;  %v8191_v26 = vld [vmem:[#allocation9 + $0xd00] ss:$16 sps:$4 sm:$0xff]   ;;  %v8194_v27 = vld [vmem:[#allocation9 + $0xd08] ss:$16 sps:$4 sm:$0xff]  }
 0x41e   : > { %4679 = vmatprep.subr.bf16.mxu1 %v8130_v50  ;;  %v8199_v50 = vld [vmem:[#allocation9 + $0xd24] ss:$16 sps:$4 sm:$0xff]   ;;  %v3763_v4 = vsel %vm885_vm7, %v3761_v23, %v3762_v21  ;;  %v8228_v21 = vld [vmem:[#allocation12 + $0x1a8] sm:$0xff]  }
 0x420   : > { %4551 = vmatpush1.bf16.msra.mxu0 %v8125_v28  ;;  %v8202_v28 = vld [vmem:[#allocation9 + $0xd2c] ss:$16 sps:$4 sm:$0xff]  }
 0x421   : > { %4680 = vmatpush1.bf16.msra.mxu1 %v8128_v29  ;;  %4552 = vmatprep.subr.bf16.mxu0 %v8133_v30  ;;  %v8205_v29 = vld [vmem:[#allocation9 + $0xd44] ss:$16 sps:$4 sm:$0xff]   ;;  %v8208_v30 = vld [vmem:[#allocation9 + $0xd4c] ss:$16 sps:$4 sm:$0xff]  }
 0x422   : > { %4681 = vmatprep.subr.bf16.mxu1 %v8136_v31  ;;  %v8203_v31 = vld [vmem:[#allocation9 + $0xd40] ss:$16 sps:$4 sm:$0xff]  }
 0x424   : > { %4553 = vmatpush1.bf16.msra.mxu0 %v8131_v6  ;;  %v8206_v6 = vld [vmem:[#allocation9 + $0xd48] ss:$16 sps:$4 sm:$0xff]  }
 0x425   : > { %4682 = vmatpush1.bf16.msra.mxu1 %v8134_v33  ;;  %4554 = vmatprep.subr.bf16.mxu0 %v8139_v43  ;;  %v8211_v33 = vld [vmem:[#allocation9 + $0xd64] ss:$16 sps:$4 sm:$0xff]   ;;  %v8214_v43 = vld [vmem:[#allocation9 + $0xd6c] ss:$16 sps:$4 sm:$0xff]  }
 0x426   : > { %4683 = vmatprep.subr.bf16.mxu1 %v8142_v49  ;;  %v3599_v49 = vpack.c.bf16 %v9125_v5, %v9125_v5  ;;  %v8215_v5 = vld [vmem:[#allocation12 + $0x160] sm:$0xff]  }
 0x428   : > { %4555 = vmatpush1.bf16.msra.mxu0 %v8137_v34  ;;  %v8209_v34 = vld [vmem:[#allocation9 + $0xd60] ss:$16 sps:$4 sm:$0xff]  }
 0x429   : > { %4684 = vmatpush1.bf16.msra.mxu1 %v8140_v3  ;;  %4556 = vmatprep.subr.bf16.mxu0 %v8145_v35  ;;  %v3594_v3 = vpack.c.bf16 %v9091_v36, %v9111_v53  ;;  %v8212_v35 = vld [vmem:[#allocation9 + $0xd68] ss:$16 sps:$4 sm:$0xff]   ;;  %v8218_v36 = vld [vmem:[#allocation12 + $0x128] sm:$0xff]   ;;  %v4763_v53 = vld [vmem:[#allocation11] sm:$0xf] }
 0x42a   : > { %4685 = vmatprep.subr.bf16.mxu1 %v8148_v39 }
 0x42b   : > { %v3767_v39 = vrot.slane %v3594_v3, 1 }
 0x42c   : > { %4557 = vmatpush1.bf16.msra.mxu0 %v8143_v56 }
 0x42d   : > { %4686 = vmatpush1.bf16.msra.mxu1 %v8146_v44  ;;  %4558 = vmatprep.subr.bf16.mxu0 %v8151_v40  ;;  %v8216_v44 = vld [vmem:[#allocation12 + $0x120] sm:$0xff]   ;;  %v8217_v40 = vld [vmem:[#allocation12 + $0x168] sm:$0xff]  }
 0x42e   : > { %4687 = vmatprep.subr.bf16.mxu1 %v8154_v37  ;;  %v8219_v37 = vld [vmem:[#allocation12 + $0x170] sm:$0xff]  }
 0x430   : > { %4559 = vmatpush1.bf16.msra.mxu0 %v8149_v42  ;;  %v8220_v42 = vld [vmem:[#allocation12 + $0x130] sm:$0xff]  }
 0x431   : > { %4688 = vmatpush1.bf16.msra.mxu1 %v8152_v45  ;;  %4560 = vmatprep.subr.bf16.mxu0 %v8157_v32  ;;  %v4768_v45 = vrot.slane %v4763_v53, %v1092_v19  ;;  %v4776_v32 = vrot.slane %v4763_v53, %v1100_v20 }
 0x432   : > { %4689 = vmatprep.subr.bf16.mxu1 %v8160_v46  ;;  %v4772_v46 = vrot.slane %v4763_v53, %v1096_v24 }
 0x434   : > { %4561 = vmatpush1.bf16.msra.mxu0 %v8155_v54  ;;  %v4780_v54 = vrot.slane %v4763_v53, %v1104_v25  ;;  %v8241_v53 = vld [vmem:[#allocation12 + $0x208] sm:$0xff]  }
 0x435   : > { %4690 = vmatpush1.bf16.msra.mxu1 %v8158_v55  ;;  %4562 = vmatprep.subr.bf16.mxu0 %v8163_v57  ;;  %v8221_v57 = vld [vmem:[#allocation12 + $0x178] sm:$0xff]  }
 0x436   : > { %4691 = vmatprep.subr.bf16.mxu1 %v8166_v58  ;;  %v8222_v58 = vld [vmem:[#allocation12 + $0x1e0] sm:$0xff]  }
 0x438   : > { %4563 = vmatpush1.bf16.msra.mxu0 %v8161_v0  ;;  %v8223_v0 = vld [vmem:[#allocation12 + $0x138] sm:$0xff]  }
 0x439   : > { %4692 = vmatpush1.bf16.msra.mxu1 %v8164_v59  ;;  %4564 = vmatprep.subr.bf16.mxu0 %v8169_v61 }
 0x43a   : > { %4693 = vmatprep.subr.bf16.mxu1 %v8172_v60 }
 0x43c   : > { %4565 = vmatpush1.bf16.msra.mxu0 %v8167_v63  ;;  %v8224_v63 = vld [vmem:[#allocation12 + $0x1a0] sm:$0xff]  }
 0x43d   : > { %4694 = vmatpush1.bf16.msra.mxu1 %v8170_v41  ;;  %4566 = vmatprep.subr.bf16.mxu0 %v8175_v51 }
 0x43e   : > { %4695 = vmatprep.subr.bf16.mxu1 %v8178_v2 }
 0x440   : > { %4567 = vmatpush1.bf16.msra.mxu0 %v8173_v7 }
 0x441   : > { %4696 = vmatpush1.bf16.msra.mxu1 %v8176_v8  ;;  %4568 = vmatprep.subr.bf16.mxu0 %v8181_v9 }
 0x442   : > { %4697 = vmatprep.subr.bf16.mxu1 %v8184_v48 }
 0x444   : > { %4569 = vmatpush1.bf16.msra.mxu0 %v8179_v14 }
 0x445   : > { %4698 = vmatpush1.bf16.msra.mxu1 %v8182_v47  ;;  %4570 = vmatprep.subr.bf16.mxu0 %v8187_v10  ;;  %v8225_v10 = vld [vmem:[#allocation12 + $0x180] sm:$0xff]  }
 0x446   : > { %4699 = vmatprep.subr.bf16.mxu1 %v8190_v11  ;;  %v8226_v11 = vld [vmem:[#allocation12 + $0x1e8] sm:$0xff]  }
 0x448   : > { %4571 = vmatpush1.bf16.msra.mxu0 %v8185_v15 }
 0x449   : > { %4700 = vmatpush1.bf16.msra.mxu1 %v8188_v38  ;;  %4583 = vmatprep.subr.bf16.mxu0 %v8193_v17 }
 0x44a   : > { %4712 = vmatprep.subr.bf16.mxu1 %v8196_v22 }
 0x44b   : > { %4573 = vmatmul.mubr.bf16.vlgmr.msra.gmra.mrb[4].mxu0 %v3763_v4 }
 0x44c   : > { %4702 = vmatmul.mubr.bf16.vlgmr.msra.gmra.mrb[4].mxu1 %v3763_v4  ;;  %4584 = vmatpush1.bf16.msra.mxu0 %v8191_v26 }
 0x44d   : > { %4713 = vmatpush1.bf16.msra.mxu1 %v8194_v27  ;;  %4585 = vmatprep.subr.bf16.mxu0 %v8199_v50 }
 0x44e   : > { %4714 = vmatprep.subr.bf16.mxu1 %v8202_v28  ;;  %4615 = vmatprep.mubr.bf16.mxu0 %v8617_v1 }
 0x44f   : > { %4744 = vmatprep.mubr.bf16.mxu1 %v8617_v1  ;;  %v3768_v1 = vrot.slane %v3599_v49, 1 }
 0x450   : > { %4586 = vmatpush1.bf16.msra.mxu0 %v8197_v62 }
 0x451   : > { %4715 = vmatpush1.bf16.msra.mxu1 %v8200_v52  ;;  %4587 = vmatprep.subr.bf16.mxu0 %v8205_v29  ;;  %v3769_v56 = vsel %vm885_vm7, %v3767_v39, %v3768_v1  ;;  %v8229_v52 = vld [vmem:[#allocation12 + $0x188] sm:$0xff]   ;;  %v8230_v29 = vld [vmem:[#allocation12 + $0x1f0] sm:$0xff]   ;;  %v8234_v1 = vld [vmem:[#allocation12 + $0x1f8] sm:$0xff]  }
 0x452   : > { %4716 = vmatprep.subr.bf16.mxu1 %v8208_v30  ;;  %v8231_v30 = vld [vmem:[#allocation12 + $0x148] sm:$0xff]   ;;  %v8235_v39 = vld [vmem:[#allocation12 + $0x150] sm:$0xff]  }
 0x454   : > { %4588 = vmatpush1.bf16.msra.mxu0 %v8203_v31 }
 0x455   : > { %4717 = vmatpush1.bf16.msra.mxu1 %v8206_v6  ;;  %4589 = vmatprep.subr.bf16.mxu0 %v8211_v33 }
 0x456   : > { %4718 = vmatprep.subr.bf16.mxu1 %v8214_v43  ;;  %v8232_v43 = vld [vmem:[#allocation12 + $0x1b0] sm:$0xff]  }
 0x458   : > { %4590 = vmatpush1.bf16.msra.mxu0 %v8209_v34 }
 0x459   : > { %4719 = vmatpush1.bf16.msra.mxu1 %v8212_v35  ;;  %7100 = vmatprep.subr.bf16.mxu0 %v8215_v5  ;;  %v8233_v35 = vld [vmem:[#allocation12 + $0x190] sm:$0xff]   ;;  %v8237_v5 = vld [vmem:[#allocation12 + $0x198] sm:$0xff]  }
 0x45a   : > { %7122 = vmatprep.subr.bf16.mxu1 %v8222_v58 }
 0x45b   : > { %6979 = vmatmul.mubr.msk.bf16.vlgmr.msra.gmra.mrb[4].mxu0 %vm383_vm8, %v3769_v56 }
 0x45c   : > { %6980 = vmatmul.mubr.msk.bf16.vlgmr.msra.gmra.mrb[4].mxu1 %vm383_vm8, %v3769_v56  ;;  %7101 = vmatpush3.bf16.msra.mxu0 %v8216_v44  ;;  %v8236_v56 = vld [vmem:[#allocation12 + $0x1b8] sm:$0xff]   ;;  %v8238_v44 = vld [vmem:[#allocation12 + $0x200] sm:$0xff]  }
 0x45d   : > { %7102 = vmatprep.subr.bf16.mxu0 %v8217_v40  ;;  %7123 = vmatpush3.bf16.msra.mxu1 %v8224_v63  ;;  %v8239_v40 = vld [vmem:[#allocation12 + $0x158] sm:$0xff]  }
 0x45e   : > { %7124 = vmatprep.subr.bf16.mxu1 %v8226_v11 }
 0x460   : > { %7103 = vmatpush3.bf16.msra.mxu0 %v8218_v36  ;;  %v8240_v36 = vld [vmem:[#allocation12 + $0x1c0] sm:$0xff]  }
 0x461   : > { %7104 = vmatprep.subr.bf16.mxu0 %v8219_v37  ;;  %7125 = vmatpush3.bf16.msra.mxu1 %v8228_v21  ;;  %v8242_v37 = vld [vmem:[#allocation12 + $0x1c8] sm:$0xff]  }
 0x462   : > { %7126 = vmatprep.subr.bf16.mxu1 %v8230_v29 }
 0x464   : > { %7105 = vmatpush3.bf16.msra.mxu0 %v8220_v42  ;;  %v8244_v42 = vld [vmem:[#allocation12 + $0x210] sm:$0xff]  }
 0x465   : > { %7106 = vmatprep.subr.bf16.mxu0 %v8221_v57  ;;  %7127 = vmatpush3.bf16.msra.mxu1 %v8232_v43 }
 0x466   : > { %7128 = vmatprep.subr.bf16.mxu1 %v8234_v1 }
 0x468   : > { %7107 = vmatpush3.bf16.msra.mxu0 %v8223_v0 }
 0x469   : > { %7108 = vmatprep.subr.bf16.mxu0 %v8225_v10  ;;  %7129 = vmatpush3.bf16.msra.mxu1 %v8236_v56 }
 0x46a   : > { %7130 = vmatprep.subr.bf16.mxu1 %v8238_v44 }
 0x46c   : > { %7109 = vmatpush3.bf16.msra.mxu0 %v8227_v13 }
 0x46d   : > { %7110 = vmatprep.subr.bf16.mxu0 %v8229_v52  ;;  %7131 = vmatpush3.bf16.msra.mxu1 %v8240_v36 }
 0x46e   : > { %7132 = vmatprep.subr.bf16.mxu1 %v8241_v53 }
 0x470   : > { %7111 = vmatpush3.bf16.msra.mxu0 %v8231_v30 }
 0x471   : > { %7112 = vmatprep.subr.bf16.mxu0 %v8233_v35  ;;  %7133 = vmatpush3.bf16.msra.mxu1 %v8242_v37 }
 0x472   : > { %7134 = vmatprep.subr.bf16.mxu1 %v8244_v42 }
 0x474   : > { %7113 = vmatpush3.bf16.msra.mxu0 %v8235_v39 }
 0x475   : > { %7114 = vmatprep.subr.bf16.mxu0 %v8237_v5  ;;  %v8246_v5 = vld [vmem:[#allocation12 + $0x228] sm:$0xff]  }
 0x478   : > { %7115 = vmatpush3.bf16.msra.mxu0 %v8239_v40 }
 0x479   : > { %7247 = vmatprep.subr.bf16.mxu0 %v9014_v12 }
 0x52e   : > { %v4617_v55 = vpop.f32.mrb[4].mxu0 }
 0x52f   : > { %v4785_v59 = vadd.f32 %v4768_v45, %v4617_v55  ;;  %v4746_v61 = vpop.f32.mrb[4].mxu1  ;;  %v4619_v60 = vpop.f32.mrb[5].mxu0 }
 0x530   : > { %v4787_v19 = vadd.f32 %v4776_v32, %v4746_v61  ;;  %v4786_v41 = vadd.f32 %v4772_v46, %v4619_v60  ;;  %v4748_v51 = vpop.f32.mrb[5].mxu1  ;;  %v4621_v20 = vpop.f32.mrb[6].mxu0 }
 0x531   : > { %v4793_v24 = vmax.f32 %v4785_v59, 0.0  ;;  %v4788_v2 = vadd.f32 %v4780_v54, %v4748_v51  ;;  %v4789_v7 = vadd.f32 %v4768_v45, %v4621_v20  ;;  %v4750_v18 = vpop.f32.mrb[6].mxu1  ;;  %v4623_v25 = vpop.f32.mrb[7].mxu0  ;;  %v8245_v45 = vld [vmem:[#allocation12 + $0x1d0] sm:$0xff]  }
 0x532   : > { %v4795_v8 = vmax.f32 %v4787_v19, 0.0  ;;  %v4794_v9 = vmax.f32 %v4786_v41, 0.0  ;;  %v4791_v48 = vadd.f32 %v4776_v32, %v4750_v18  ;;  %v4790_v14 = vadd.f32 %v4772_v46, %v4623_v25  ;;  %v4752_v47 = vpop.f32.mrb[7].mxu1  ;;  %v8247_v32 = vld [vmem:[#allocation12 + $0x218] sm:$0xff]   ;;  %7135 = vmatpush3.bf16.msra.mxu1 %v8245_v45 }
 0x533   : > { %v4824_v15 = vrot.slane %v4793_v24, 7  ;;  %v4796_v16 = vmax.f32 %v4788_v2, 0.0  ;;  %v4797_v38 = vmax.f32 %v4789_v7, 0.0  ;;  %v4792_v17 = vadd.f32 %v4780_v54, %v4752_v47  ;;  %v8248_v46 = vld [vmem:[#allocation12 + $0x1d8] sm:$0xff]   ;;  %7136 = vmatprep.subr.bf16.mxu1 %v8247_v32  ;;  %v8250_v54 = vld [vmem:[#allocation12 + $0x40] sm:$0xff]  }
 0x534   : > { %v4825_v22 = vrot.slane %v4794_v9, 7  ;;  %v4799_v23 = vmax.f32 %v4791_v48, 0.0  ;;  %v4798_v26 = vmax.f32 %v4790_v14, 0.0  ;;  %v4826_v4 = vrot.slane %v4795_v8, 7 }
 0x535   : > { %v4828_v27 = vrot.slane %v4797_v38, 7  ;;  %v4800_v50 = vmax.f32 %v4792_v17, 0.0  ;;  %4836 = vrot.lane.b32.xlu1 %v4824_v15, %s8619_s10  ;;  %v4827_v31 = vrot.slane %v4796_v16, 7 }
 0x536   : > { %v4832_v28 = vrot.slane %v4799_v23, 7  ;;  %v4830_v62 = vrot.slane %v4798_v26, 7  ;;  %4838 = vrot.lane.b32.xlu0 %v4825_v22, %s8619_s10  ;;  %7137 = vmatpush3.bf16.msra.mxu1 %v8248_v46 }
 0x537   : > { %v4834_v6 = vrot.slane %v4800_v50, 7  ;;  %v4829_v33 = vsel %vm400_vm0, %v4824_v15, %v4828_v27  ;;  %7149 = vmatprep.subr.bf16.mxu1 %v8250_v54  ;;  %v8249_v54 = vld [vmem:[#allocation12 + $0x230] sm:$0xff]  }
 0x538   : > { %v4831_v49 = vsel %vm400_vm0, %v4825_v22, %v4830_v62  ;;  %v4833_v34 = vsel %vm400_vm0, %v4826_v4, %v4832_v28 }
 0x539   : > { %4844 = vrot.lane.b32.xlu1 %v4829_v33, %s8619_s10  ;;  %v4835_v3 = vsel %vm400_vm0, %v4827_v31, %v4834_v6  ;;  %vm8620_vm0 = vmmov 0  }
 0x53a   : > { %4846 = vrot.lane.b32.xlu0 %v4831_v49, %s8619_s10  ;;  %v8243_v49 = vld [vmem:[#allocation12 + $0x220] sm:$0xff]  }
 0x53d   : > { %4852 = vrot.lane.b32.xlu1 %v4828_v27, %s8619_s10 }
 0x53e   : > { %4854 = vrot.lane.b32.xlu0 %v4830_v62, %s8619_s10 }
 0x541   : > { %4840 = vrot.lane.b32.xlu1 %v4826_v4, %s8619_s10 }
 0x542   : > { %4842 = vrot.lane.b32.xlu0 %v4827_v31, %s8619_s10 }
 0x545   : > { %4848 = vrot.lane.b32.xlu1 %v4833_v34, %s8619_s10 }
 0x546   : > { %4850 = vrot.lane.b32.xlu0 %v4835_v3, %s8619_s10 }
 0x549   : > { %4856 = vrot.lane.b32.xlu1 %v4832_v28, %s8619_s10 }
 0x54a   : > { %4858 = vrot.lane.b32.xlu0 %v4834_v6, %s8619_s10 }
 0x5a7   : > { %v4837_v55 = vpop.permute.xlu1 %4836 }
 0x5a8   : > { %4884 = vst.msk [vmem:[#allocation2] sm:$0xfe] %vm1210_vm10, %v4837_v55  ;;  %v4839_v57 = vpop.permute.xlu0 %4838 }
 0x5a9   : > { %v4860_v58 = vsel %vm1185_vm11, %v4837_v55, %v4839_v57 }
 0x5aa   : > { %4885 = vst [vmem:[#allocation2 + $0x8] sm:$0xfe] %v4860_v58 }
 0x5ab   : > { %v4845_v0 = vpop.permute.xlu1 %4844 }
 0x5ac   : > { %4889 = vst.msk [vmem:[#allocation2 + $0x28] sm:$0xff] %vm1217_vm12, %v4845_v0  ;;  %v4847_v59 = vpop.permute.xlu0 %4846 }
 0x5ad   : > { %v9217_v61 = vsel %vm1185_vm11, %v4845_v0, %v4847_v59 }
 0x5af   : > { %v4853_v60 = vpop.permute.xlu1 %4852  ;;  %v4986_v2 = vld [vmem:[#allocation2] sm:$0xfe] }
 0x5b0   : > { %4894 = vst.msk [vmem:[#allocation2 + $0x50] sm:$0x1] %vm1223_vm13, %v4853_v60  ;;  %v4855_v63 = vpop.permute.xlu0 %4854 }
 0x5b1   : > { %v4866_v19 = vsel %vm1185_vm11, %v4853_v60, %v4855_v63  ;;  %v4987_v41 = vld [vmem:[#allocation2 + $0x8] sm:$0xfe] }
 0x5b2   : > { %4895 = vst [vmem:[#allocation2 + $0x58] sm:$0x1] %v4866_v19  ;;  %v4997_v51 = vpack.c.bf16 %v9217_v61, %v4987_v41 }
 0x5b3   : > { %v4841_v20 = vpop.permute.xlu1 %4840  ;;  %v9222_v24 = vld [vmem:[#allocation2 + $0x28] sm:$0xff] }
 0x5b4   : > { %v4861_v7 = vsel %vm1185_vm11, %v4839_v57, %v4841_v20  ;;  %v4843_v18 = vpop.permute.xlu0 %4842  ;;  %v4996_v25 = vpack.c.bf16 %v9222_v24, %v4986_v2  ;;  %v5094_v9 = vshll.u32 %v4997_v51, 16  ;;  %v5092_v50 = vshrl.u32 %v4997_v51, 16  ;;  %v8251_v2 = vld [vmem:[#allocation12 + $0x238] sm:$0xff]  }
 0x5b5   : > { %4886 = vst [vmem:[#allocation2 + $0x10] sm:$0xfe] %v4861_v7  ;;  %v4862_v8 = vsel %vm1185_vm11, %v4841_v20, %v4843_v18  ;;  %4888 = vst.msk [vmem:[#allocation2 + $0x20] sm:$0xfe] %vm1215_vm14, %v4843_v18  ;;  %v8252_v7 = vld [vmem:[#allocation12] sm:$0xff]   ;;  %v4900_v18 = vld [vmem:[#allocation2 + $0x8] sm:$0xff] }
 0x5b6   : > { %4887 = vst [vmem:[#allocation2 + $0x18] sm:$0xfe] %v4862_v8  ;;  %v5082_v47 = vshll.u32 %v4996_v25, 16  ;;  %v5096_v17 = vrot.slane %v5094_v9, 1  ;;  %v5080_v52 = vshrl.u32 %v4996_v25, 16  ;;  %v8253_v9 = vld [vmem:[#allocation12 + $0x48] sm:$0xff]  }
 0x5b7   : > { %v4849_v48 = vpop.permute.xlu1 %4848  ;;  %v4991_v14 = vld [vmem:[#allocation2 + $0x50] sm:$0x1] }
 0x5b8   : > { %v9229_v10 = vsel %vm1185_vm11, %v4847_v59, %v4849_v48  ;;  %v4851_v11 = vpop.permute.xlu0 %4850  ;;  %v5001_v13 = vpack.c.bf16 %v4991_v14, %v4991_v14  ;;  %v5084_v23 = vrot.slane %v5082_v47, 1  ;;  %v5097_v31 = vor.u32 %v5096_v17, %v5092_v50  ;;  %v8256_v17 = vld [vmem:[#allocation12 + $0x80] sm:$0xff]   ;;  %v8259_v50 = vld [vmem:[#allocation12 + $0x10] sm:$0xff]  }
 0x5b9   : > { %v9232_v15 = vsel %vm1185_vm11, %v4849_v48, %v4851_v11  ;;  %4893 = vst.msk [vmem:[#allocation2 + $0x48] sm:$0xff] %vm1185_vm11, %v4851_v11  ;;  %v4992_v16 = vld [vmem:[#allocation2 + $0x58] sm:$0x1]  ;;  %v8254_v11 = vld [vmem:[#allocation12 + $0xc0] sm:$0xff]  }
 0x5ba   : > { %v5002_v38 = vpack.c.bf16 %v4992_v16, %v4992_v16  ;;  %v5087_v21 = vshll.u32 %v5001_v13, 16  ;;  %v5085_v43 = vor.u32 %v5084_v23, %v5080_v52  ;;  %v4910_v13 = vpack.c.bf16 %v9217_v61, %v4900_v18  ;;  %v8263_v52 = vld [vmem:[#allocation12 + $0x18] sm:$0xff]   ;;  %v8290_v18 = vld [vmem:[#allocation12 + $0x290] sm:$0xff]  }
 0x5bb   : > { %v4857_v22 = vpop.permute.xlu1 %4856 }
 0x5bc   : > { %v4867_v26 = vsel %vm1185_vm11, %v4855_v63, %v4857_v22  ;;  %v4859_v27 = vpop.permute.xlu0 %4858  ;;  %v5099_v4 = vshll.u32 %v5002_v38, 16  ;;  %v4988_v28 = vld [vmem:[#allocation2 + $0x10] sm:$0xfe]  ;;  %v5089_v29 = vrot.slane %v5087_v21, 1  ;;  %v4990_v56 = vld [vmem:[#allocation2 + $0x20] sm:$0xfe] }
 0x5bd   : > { %4896 = vst [vmem:[#allocation2 + $0x60] sm:$0x1] %v4867_v26  ;;  %v4868_v62 = vsel %vm1185_vm11, %v4857_v22, %v4859_v27  ;;  %4898 = vst.msk [vmem:[#allocation2 + $0x70] sm:$0x1] %vm1228_vm15, %v4859_v27  ;;  %v4989_v30 = vld [vmem:[#allocation2 + $0x18] sm:$0xfe]  ;;  %v4998_v34 = vpack.c.bf16 %v9229_v10, %v4988_v28 }
 0x5be   : > { %4897 = vst [vmem:[#allocation2 + $0x68] sm:$0x1] %v4868_v62  ;;  %v5101_v6 = vrot.slane %v5099_v4, 1  ;;  %v4999_v33 = vpack.c.bf16 %v9232_v15, %v4989_v30  ;;  %v5090_v1 = vsel %vm463_vm5, %v5085_v43, %v5089_v29  ;;  %v8255_v38 = vld [vmem:[#allocation12 + $0x8] sm:$0xff]   ;;  %v8257_v22 = vld [vmem:[#allocation12 + $0x50] sm:$0xff]   ;;  %v8261_v28 = vld [vmem:[#allocation12 + $0x58] sm:$0xff]  }
 0x5bf   : > { %v5106_v44 = vshll.u32 %v4998_v34, 16  ;;  %v5104_v60 = vshrl.u32 %v4998_v34, 16  ;;  %v4902_v21 = vld [vmem:[#allocation2 + $0x18] sm:$0xff]  ;;  %v8262_v62 = vld [vmem:[#allocation12 + $0xd0] sm:$0xff]   ;;  %v8265_v30 = vld [vmem:[#allocation12 + $0x60] sm:$0xff]  }
 0x5c0   : > { %v5102_v3 = vsel %vm463_vm5, %v5097_v31, %v5101_v6  ;;  %v9241_v35 = vld [vmem:[#allocation2 + $0x48] sm:$0xff]  ;;  %v5118_v39 = vshll.u32 %v4999_v33, 16  ;;  %v5116_v0 = vshrl.u32 %v4999_v33, 16  ;;  %v8258_v26 = vld [vmem:[#allocation12 + $0xc8] sm:$0xff]   ;;  %v4912_v27 = vpack.c.bf16 %v9232_v15, %v4902_v21  ;;  %v8264_v29 = vld [vmem:[#allocation12 + $0x90] sm:$0xff]  }
 0x5c1   : > { %5394 = vmatprep.mubr.bf16.mxu0 %v5102_v3  ;;  %v5000_v40 = vpack.c.bf16 %v9241_v35, %v4990_v56  ;;  %v5108_v55 = vrot.slane %v5106_v44, 1  ;;  %v8260_v4 = vld [vmem:[#allocation12 + $0x88] sm:$0xff]   ;;  %v8266_v31 = vld [vmem:[#allocation12 + $0xd8] sm:$0xff]   ;;  %v8267_v6 = vld [vmem:[#allocation12 + $0x20] sm:$0xff]  }
 0x5c2   : > { %5395 = vmatmul.mubr.bf16.vlgmr.msra.gmra.mrb[8].mxu0 %v5090_v1  ;;  %v5120_v46 = vrot.slane %v5118_v39, 1  ;;  %v8268_v33 = vld [vmem:[#allocation12 + $0x98] sm:$0xff]   ;;  %v8269_v43 = vld [vmem:[#allocation12 + $0x68] sm:$0xff]   ;;  %v8272_v3 = vld [vmem:[#allocation12 + $0xa0] sm:$0xff]  }
 0x5c3   : > { %7248 = vmatpush3.bf16.msra.mxu0 %v8243_v49  ;;  %7255 = vmatprep.mubr.msk.bf16.mxu0 %vm8620_vm0, %v9014_v12  ;;  %v5130_v58 = vshll.u32 %v5000_v40, 16  ;;  %v5109_v20 = vor.u32 %v5108_v55, %v5104_v60  ;;  %v5128_v14 = vshrl.u32 %v5000_v40, 16  ;;  %v8270_v49 = vld [vmem:[#allocation12 + $0xe0] sm:$0xff]   ;;  %v8271_v34 = vld [vmem:[#allocation12 + $0x28] sm:$0xff]   ;;  %v8273_v1 = vld [vmem:[#allocation12 + $0x70] sm:$0xff]  }
 0x5c4   : > { %7249 = vmatprep.subr.bf16.mxu0 %v9014_v12  ;;  %v4993_v36 = vld [vmem:[#allocation2 + $0x60] sm:$0x1]  ;;  %v4995_v53 = vld [vmem:[#allocation2 + $0x70] sm:$0x1]  ;;  %v5121_v41 = vor.u32 %v5120_v46, %v5116_v0  ;;  %v8274_v39 = vld [vmem:[#allocation12 + $0xe8] sm:$0xff]  }
 0x5c5   : > { %v4994_v37 = vld [vmem:[#allocation2 + $0x68] sm:$0x1]  ;;  %v5003_v42 = vpack.c.bf16 %v4993_v36, %v4993_v36  ;;  %v5005_v45 = vpack.c.bf16 %v4995_v53, %v4995_v53  ;;  %v5132_v25 = vrot.slane %v5130_v58, 1  ;;  %v8275_v56 = vld [vmem:[#allocation12 + $0x30] sm:$0xff]   ;;  %v8284_v58 = vld [vmem:[#allocation12 + $0x280] sm:$0xff]  }
 0x5c6   : > { %v5004_v32 = vpack.c.bf16 %v4994_v37, %v4994_v37  ;;  %v8277_v44 = vld [vmem:[#allocation12 + $0x78] sm:$0xff]   ;;  %v8278_v40 = vld [vmem:[#allocation12 + $0xf0] sm:$0xff]   ;;  %v4901_v0 = vld [vmem:[#allocation2 + $0x10] sm:$0xff] }
 0x5c7   : > { %7250 = vmatpush3.bf16.msra.mxu0 %v8246_v5  ;;  %v5111_v57 = vshll.u32 %v5003_v42, 16  ;;  %v5135_v19 = vshll.u32 %v5005_v45, 16  ;;  %v5133_v16 = vor.u32 %v5132_v25, %v5128_v14  ;;  %v8276_v5 = vld [vmem:[#allocation12 + $0xa8] sm:$0xff]   ;;  %v8279_v36 = vld [vmem:[#allocation12 + $0x38] sm:$0xff]   ;;  %v8280_v53 = vld [vmem:[#allocation12 + $0xb0] sm:$0xff]  }
 0x5c8   : > { %7251 = vmatprep.subr.bf16.mxu0 %v9014_v12  ;;  %v5123_v59 = vshll.u32 %v5004_v32, 16  ;;  %v8281_v37 = vld [vmem:[#allocation12 + $0xf8] sm:$0xff]   ;;  %v5833_v42 = vld [vmem:[#allocation2 + $0x58] sm:$0x3]  ;;  %v4899_v32 = vld [vmem:[#allocation2] sm:$0xff] }
 0x5c9   : > { %v5113_v63 = vrot.slane %v5111_v57, 1  ;;  %v5137_v47 = vrot.slane %v5135_v19, 1  ;;  %v5828_v45 = vld [vmem:[#allocation2 + $0x8] sm:$0xfc]  ;;  %v5843_v55 = vpack.c.bf16 %v5833_v42, %v5833_v42  ;;  %v4909_v57 = vpack.c.bf16 %v9222_v24, %v4899_v32  ;;  %v8285_v60 = vld [vmem:[#allocation12 + $0x108] sm:$0xff]   ;;  %v8316_v42 = vld [vmem:[#allocation12 + $0x330] sm:$0xff]  }
 0x5ca   : > { %v5125_v51 = vrot.slane %v5123_v59, 1  ;;  %v8282_v46 = vld [vmem:[#allocation12 + $0xb8] sm:$0xff]   ;;  %v5838_v59 = vpack.c.bf16 %v9217_v61, %v5828_v45  ;;  %v5834_v32 = vld [vmem:[#allocation2 + $0x60] sm:$0x3] }
 0x5cb   : > { %7252 = vmatpush3.bf16.msra.mxu0 %v8249_v54  ;;  %v5114_v48 = vsel %vm463_vm5, %v5109_v20, %v5113_v63  ;;  %v5138_v23 = vsel %vm463_vm5, %v5133_v16, %v5137_v47  ;;  %v8283_v54 = vld [vmem:[#allocation12 + $0x100] sm:$0xff]   ;;  %v5934_v19 = vrot.slane %v5843_v55, 1  ;;  %v8287_v20 = vld [vmem:[#allocation12 + $0x288] sm:$0xff]   ;;  %v5835_v25 = vld [vmem:[#allocation2 + $0x68] sm:$0x3] }
 0x5cc   : > { %v5126_v8 = vsel %vm463_vm5, %v5121_v41, %v5125_v51  ;;  %7253 = vmatprep.subr.bf16.mxu0 %v9014_v12  ;;  %v8286_v63 = vld [vmem:[#allocation12 + $0x240] sm:$0xff]   ;;  %v4911_v41 = vpack.c.bf16 %v9229_v10, %v4901_v0  ;;  %v5933_v51 = vrot.slane %v5838_v59, 1  ;;  %v5845_v14 = vpack.c.bf16 %v5835_v25, %v5835_v25  ;;  %v8293_v47 = vld [vmem:[#allocation12 + $0x298] sm:$0xff]   ;;  %v4903_v16 = vld [vmem:[#allocation2 + $0x20] sm:$0xff] }
 0x5cd   : > { %5435 = vmatprep.mubr.bf16.mxu1 %v5126_v8  ;;  %v5830_v8 = vld [vmem:[#allocation2 + $0x18] sm:$0xfc]  ;;  %v5829_v55 = vld [vmem:[#allocation2 + $0x10] sm:$0xfc]  ;;  %v8320_v0 = vld [vmem:[#allocation12 + $0x2f8] sm:$0xff]  }
 0x5ce   : > { %5436 = vmatmul.mubr.bf16.vlgmr.msra.gmra.mrb[8].mxu1 %v5114_v48  ;;  %v5935_v61 = vsel %vm885_vm7, %v5933_v51, %v5934_v19  ;;  %v8292_v48 = vld [vmem:[#allocation12 + $0x250] sm:$0xff]   ;;  %v5940_v21 = vrot.slane %v5845_v14, 1 }
 0x5cf   : > { %7254 = vmatpush3.bf16.msra.mxu0 %v8251_v2  ;;  %7150 = vmatpush3.bf16.msra.mxu1 %v8252_v7  ;;  %v8288_v2 = vld [vmem:[#allocation12 + $0x110] sm:$0xff]   ;;  %v8289_v7 = vld [vmem:[#allocation12 + $0x248] sm:$0xff]  }
 0x5d0   : > { %5736 = vmatprep.mubr.bf16.mxu1 %v4910_v13  ;;  %7151 = vmatprep.subr.bf16.mxu1 %v8253_v9  ;;  %v8291_v9 = vld [vmem:[#allocation12 + $0x118] sm:$0xff]   ;;  %v5840_v13 = vpack.c.bf16 %v9232_v15, %v5830_v8  ;;  %v8299_v15 = vld [vmem:[#allocation12 + $0x260] sm:$0xff]   ;;  %v8321_v59 = vld [vmem:[#allocation12 + $0x350] sm:$0xff]  }
 0x5d1   : > { %7171 = vmatprep.subr.bf16.mxu0 %v8254_v11  ;;  %v8294_v11 = vld [vmem:[#allocation12 + $0x300] sm:$0xff]  }
 0x5d2   : > { %7256 = vmatmul.mubr.msk.bf16.vlgmr.msra.gmra.mrb[12].mxu0 %vm383_vm8, %v5138_v23  ;;  %v8297_v23 = vld [vmem:[#allocation12 + $0x2a0] sm:$0xff]  }
 0x5d3   : > { %7152 = vmatpush3.bf16.msra.mxu1 %v8255_v38  ;;  %7172 = vmatpush3.bf16.msra.mxu0 %v8256_v17  ;;  %v8295_v38 = vld [vmem:[#allocation12 + $0x258] sm:$0xff]   ;;  %v8296_v17 = vld [vmem:[#allocation12 + $0x2c0] sm:$0xff]  }
 0x5d4   : > { %5777 = vmatprep.mubr.bf16.mxu0 %v4912_v27  ;;  %7153 = vmatprep.subr.bf16.mxu1 %v8257_v22  ;;  %v4913_v22 = vpack.c.bf16 %v9241_v35, %v4903_v16  ;;  %v8298_v27 = vld [vmem:[#allocation12 + $0x308] sm:$0xff]  }
 0x5d5   : > { %7173 = vmatprep.subr.bf16.mxu0 %v8258_v26  ;;  %v5939_v26 = vrot.slane %v5840_v13, 1 }
 0x5d7   : > { %7154 = vmatpush3.bf16.msra.mxu1 %v8259_v50  ;;  %7174 = vmatpush3.bf16.msra.mxu0 %v8260_v4  ;;  %v5941_v50 = vsel %vm885_vm7, %v5939_v26, %v5940_v21  ;;  %v8300_v4 = vld [vmem:[#allocation12 + $0x2c8] sm:$0xff]  }
 0x5d8   : > { %7155 = vmatprep.subr.bf16.mxu1 %v8261_v28  ;;  %7175 = vmatprep.subr.bf16.mxu0 %v8262_v62  ;;  %v8301_v28 = vld [vmem:[#allocation12 + $0x2a8] sm:$0xff]   ;;  %v8302_v62 = vld [vmem:[#allocation12 + $0x310] sm:$0xff]  }
 0x5db   : > { %7156 = vmatpush3.bf16.msra.mxu1 %v8263_v52  ;;  %7176 = vmatpush3.bf16.msra.mxu0 %v8264_v29  ;;  %v8303_v52 = vld [vmem:[#allocation12 + $0x268] sm:$0xff]   ;;  %v8304_v29 = vld [vmem:[#allocation12 + $0x2d0] sm:$0xff]  }
 0x5dc   : > { %7157 = vmatprep.subr.bf16.mxu1 %v8265_v30  ;;  %7177 = vmatprep.subr.bf16.mxu0 %v8266_v31  ;;  %v8305_v30 = vld [vmem:[#allocation12 + $0x2b0] sm:$0xff]   ;;  %v8306_v31 = vld [vmem:[#allocation12 + $0x318] sm:$0xff]  }
 0x5df   : > { %7158 = vmatpush3.bf16.msra.mxu1 %v8267_v6  ;;  %7178 = vmatpush3.bf16.msra.mxu0 %v8268_v33  ;;  %v5832_v6 = vld [vmem:[#allocation2 + $0x50] sm:$0x3]  ;;  %v8307_v33 = vld [vmem:[#allocation12 + $0x270] sm:$0xff]  }
 0x5e0   : > { %7159 = vmatprep.subr.bf16.mxu1 %v8269_v43  ;;  %7179 = vmatprep.subr.bf16.mxu0 %v8270_v49  ;;  %v8308_v43 = vld [vmem:[#allocation12 + $0x2d8] sm:$0xff]  }
 0x5e1   : > { %v8309_v49 = vld [vmem:[#allocation12 + $0x2b8] sm:$0xff]  }
 0x5e3   : > { %7160 = vmatpush3.bf16.msra.mxu1 %v8271_v34  ;;  %7180 = vmatpush3.bf16.msra.mxu0 %v8272_v3  ;;  %v8310_v34 = vld [vmem:[#allocation12 + $0x320] sm:$0xff]   ;;  %v5842_v3 = vpack.c.bf16 %v5832_v6, %v5832_v6 }
 0x5e4   : > { %7161 = vmatprep.subr.bf16.mxu1 %v8273_v1  ;;  %7181 = vmatprep.subr.bf16.mxu0 %v8274_v39  ;;  %v5827_v1 = vld [vmem:[#allocation2] sm:$0xfc]  ;;  %v8311_v39 = vld [vmem:[#allocation12 + $0x278] sm:$0xff]  }
 0x5e7   : > { %7162 = vmatpush3.bf16.msra.mxu1 %v8275_v56  ;;  %7182 = vmatpush3.bf16.msra.mxu0 %v8276_v5  ;;  %v8312_v56 = vld [vmem:[#allocation12 + $0x2e0] sm:$0xff]   ;;  %v5837_v5 = vpack.c.bf16 %v9222_v24, %v5827_v1  ;;  %v8317_v24 = vld [vmem:[#allocation12 + $0x2f0] sm:$0xff]  }
 0x5e8   : > { %7163 = vmatprep.subr.bf16.mxu1 %v8277_v44  ;;  %7183 = vmatprep.subr.bf16.mxu0 %v8278_v40  ;;  %v8313_v44 = vld [vmem:[#allocation12 + $0x328] sm:$0xff]   ;;  %v5931_v40 = vrot.slane %v5842_v3, 1 }
 0x5eb   : > { %7164 = vmatpush3.bf16.msra.mxu1 %v8279_v36  ;;  %7184 = vmatpush3.bf16.msra.mxu0 %v8280_v53  ;;  %v5930_v36 = vrot.slane %v5837_v5, 1  ;;  %v8314_v53 = vld [vmem:[#allocation12 + $0x2e8] sm:$0xff]  }
 0x5ec   : > { %7185 = vmatprep.subr.bf16.mxu0 %v8281_v37  ;;  %7259 = vmatprep.subr.bf16.mxu1 %v9014_v12  ;;  %v8315_v37 = vld [vmem:[#allocation12 + $0x340] sm:$0xff]  }
 0x5ed   : > { %v5932_v45 = vsel %vm885_vm7, %v5930_v36, %v5931_v40 }
 0x5ee   : > { %5737 = vmatmul.mubr.bf16.vlgmr.msra.gmra.mrb[12].mxu1 %v4909_v57  ;;  %v5844_v57 = vpack.c.bf16 %v5834_v32, %v5834_v32 }
 0x5ef   : > { %7186 = vmatpush3.bf16.msra.mxu0 %v8282_v46  ;;  %7260 = vmatpush3.bf16.msra.mxu1 %v8283_v54  ;;  %v8318_v46 = vld [vmem:[#allocation12 + $0x348] sm:$0xff]   ;;  %v8319_v54 = vld [vmem:[#allocation12 + $0x338] sm:$0xff]  }
 0x5f0   : > { %7261 = vmatprep.subr.bf16.mxu1 %v9014_v12  ;;  %7198 = vmatprep.subr.bf16.mxu0 %v8284_v58  ;;  %v5836_v58 = vld [vmem:[#allocation2 + $0x70] sm:$0x3] }
 0x5f1   : > { %7267 = vmatprep.mubr.msk.bf16.mxu1 %vm8620_vm0, %v9014_v12  ;;  %v5846_v19 = vpack.c.bf16 %v5836_v58, %v5836_v58 }
 0x5f2   : > { %5778 = vmatmul.mubr.bf16.vlgmr.msra.gmra.mrb[16].mxu0 %v4911_v41  ;;  %v5831_v41 = vld [vmem:[#allocation2 + $0x20] sm:$0xfc] }
 0x5f3   : > { %7262 = vmatpush3.bf16.msra.mxu1 %v8285_v60  ;;  %7199 = vmatpush3.bf16.msra.mxu0 %v8286_v63  ;;  %v5839_v60 = vpack.c.bf16 %v9229_v10, %v5829_v55  ;;  %v5937_v63 = vrot.slane %v5844_v57, 1 }
 0x5f4   : > { %6200 = vmatprep.mubr.bf16.mxu0 %v5935_v61  ;;  %7263 = vmatprep.subr.bf16.mxu1 %v9014_v12  ;;  %v5841_v61 = vpack.c.bf16 %v9241_v35, %v5831_v41 }
 0x5f5   : > { %7200 = vmatprep.subr.bf16.mxu0 %v8287_v20  ;;  %v5936_v51 = vrot.slane %v5839_v60, 1  ;;  %v8322_v20 = vld [vmem:[#allocation12 + $0x358] sm:$0xff]  }
 0x5f6   : > { %v5942_v10 = vrot.slane %v5841_v61, 1 }
 0x5f7   : > { %7264 = vmatpush3.bf16.msra.mxu1 %v8288_v2  ;;  %7201 = vmatpush3.bf16.msra.mxu0 %v8289_v7  ;;  %v5938_v2 = vsel %vm885_vm7, %v5936_v51, %v5937_v63  ;;  %v5943_v7 = vrot.slane %v5846_v19, 1 }
 0x5f8   : > { %7265 = vmatprep.subr.bf16.mxu1 %v9014_v12  ;;  %7202 = vmatprep.subr.bf16.mxu0 %v8290_v18 }
 0x5f9   : > { %v5944_v18 = vsel %vm885_vm7, %v5942_v10, %v5943_v7 }
 0x5fb   : > { %7266 = vmatpush3.bf16.msra.mxu1 %v8291_v9  ;;  %7203 = vmatpush3.bf16.msra.mxu0 %v8292_v48 }
 0x5fc   : > { %7204 = vmatprep.subr.bf16.mxu0 %v8293_v47  ;;  %7220 = vmatprep.subr.bf16.mxu1 %v8294_v11 }
 0x5fe   : > { %7268 = vmatmul.mubr.msk.bf16.vlgmr.msra.gmra.mrb[16].mxu1 %vm383_vm8, %v4913_v22 }
 0x5ff   : > { %7205 = vmatpush3.bf16.msra.mxu0 %v8295_v38  ;;  %7221 = vmatpush3.bf16.msra.mxu1 %v8296_v17 }
 0x600   : > { %6241 = vmatprep.mubr.bf16.mxu1 %v5941_v50  ;;  %7206 = vmatprep.subr.bf16.mxu0 %v8297_v23 }
 0x601   : > { %7222 = vmatprep.subr.bf16.mxu1 %v8298_v27 }
 0x603   : > { %7207 = vmatpush3.bf16.msra.mxu0 %v8299_v15  ;;  %7223 = vmatpush3.bf16.msra.mxu1 %v8300_v4 }
 0x604   : > { %7208 = vmatprep.subr.bf16.mxu0 %v8301_v28  ;;  %7224 = vmatprep.subr.bf16.mxu1 %v8302_v62 }
 0x607   : > { %7209 = vmatpush3.bf16.msra.mxu0 %v8303_v52  ;;  %7225 = vmatpush3.bf16.msra.mxu1 %v8304_v29 }
 0x608   : > { %7210 = vmatprep.subr.bf16.mxu0 %v8305_v30  ;;  %7226 = vmatprep.subr.bf16.mxu1 %v8306_v31 }
 0x60b   : > { %7211 = vmatpush3.bf16.msra.mxu0 %v8307_v33  ;;  %7227 = vmatpush3.bf16.msra.mxu1 %v8308_v43 }
 0x60c   : > { %7212 = vmatprep.subr.bf16.mxu0 %v8309_v49  ;;  %7228 = vmatprep.subr.bf16.mxu1 %v8310_v34 }
 0x60f   : > { %7213 = vmatpush3.bf16.msra.mxu0 %v8311_v39  ;;  %7229 = vmatpush3.bf16.msra.mxu1 %v8312_v56 }
 0x610   : > { %7230 = vmatprep.subr.bf16.mxu1 %v8313_v44  ;;  %7271 = vmatprep.subr.bf16.mxu0 %v9014_v12 }
 0x612   : > { %6201 = vmatmul.mubr.bf16.vlgmr.msra.gmra.mrb[20].mxu0 %v5932_v45 }
 0x613   : > { %7231 = vmatpush3.bf16.msra.mxu1 %v8314_v53  ;;  %7272 = vmatpush3.bf16.msra.mxu0 %v8315_v37 }
 0x614   : > { %7232 = vmatprep.subr.bf16.mxu1 %v8316_v42  ;;  %7273 = vmatprep.subr.bf16.mxu0 %v9014_v12 }
 0x615   : > { %7279 = vmatprep.mubr.msk.bf16.mxu0 %vm8620_vm0, %v9014_v12 }
 0x617   : > { %7233 = vmatpush3.bf16.msra.mxu1 %v8317_v24  ;;  %7274 = vmatpush3.bf16.msra.mxu0 %v8318_v46 }
 0x618   : > { %7234 = vmatprep.subr.bf16.mxu1 %v8319_v54  ;;  %7275 = vmatprep.subr.bf16.mxu0 %v9014_v12 }
 0x61b   : > { %7235 = vmatpush3.bf16.msra.mxu1 %v8320_v0  ;;  %7276 = vmatpush3.bf16.msra.mxu0 %v8321_v59 }
 0x61c   : > { %7277 = vmatprep.subr.bf16.mxu0 %v9014_v12 }
 0x61e   : > { %6242 = vmatmul.mubr.bf16.vlgmr.msra.gmra.mrb[20].mxu1 %v5938_v2  ;;  %v7092_v2 = vld [vmem:[#allocation14] ss:$0 sm:$0xff] }
 0x61f   : > { %7278 = vmatpush3.bf16.msra.mxu0 %v8322_v20 }
 0x622   : > { %7280 = vmatmul.mubr.msk.bf16.vlgmr.msra.gmra.mrb[24].mxu0 %vm383_vm8, %v5944_v18 }
 0x695   : > { %v7116_v25 = vpop.f32.mrb[8].mxu0 }
 0x696   : > { %v7117_v8 = vpop.f32.mrb[9].mxu0 }
 0x697   : > { %v7118_v9 = vadd.f32 %v7117_v8, %v7116_v25  ;;  %v7119_v48 = vpop.f32.mrb[10].mxu0 }
 0x698   : > { %v7120_v14 = vpop.f32.mrb[11].mxu0 }
 0x699   : > { %v7121_v47 = vadd.f32 %v7120_v14, %v7119_v48 }
 0x6a1   : > { %v7138_v11 = vpop.f32.mrb[8].mxu1 }
 0x6a2   : > { %v7139_v35 = vpop.f32.mrb[9].mxu1 }
 0x6a3   : > { %v7140_v13 = vadd.f32 %v7139_v35, %v7138_v11  ;;  %v7141_v12 = vpop.f32.mrb[10].mxu1 }
 0x6a4   : > { %v7142_v16 = vpop.f32.mrb[11].mxu1 }
 0x6a5   : > { %v7143_v38 = vadd.f32 %v7142_v16, %v7141_v12  ;;  %v5438_v17 = vadd.f32 %v7140_v13, %v7118_v9  ;;  %v5478_v21 = vpop.f32.mrb[12].mxu0 }
 0x6a6   : > { %v7257_v22 = vpop.f32.mrb[13].mxu0 }
 0x6a7   : > { %v5479_v23 = vadd.f32 %v5478_v21, %v5438_v17  ;;  %v5441_v26 = vadd.f32 %v7143_v38, %v7121_v47  ;;  %v5481_v27 = vpop.f32.mrb[14].mxu0 }
 0x6a8   : > { %v7258_v50 = vpop.f32.mrb[15].mxu0 }
 0x6a9   : > { %v5482_v15 = vadd.f32 %v5481_v27, %v5441_v26 }
 0x6c1   : > { %v7165_v4 = vpop.f32.mrb[12].mxu1 }
 0x6c2   : > { %v7166_v28 = vpop.f32.mrb[13].mxu1 }
 0x6c3   : > { %v7167_v62 = vadd.f32 %v7166_v28, %v7165_v4  ;;  %v7168_v52 = vpop.f32.mrb[14].mxu1 }
 0x6c4   : > { %v7169_v29 = vpop.f32.mrb[15].mxu1 }
 0x6c5   : > { %v5739_v30 = vadd.f32 %v7167_v62, %v5479_v23  ;;  %v7170_v31 = vadd.f32 %v7169_v29, %v7168_v52  ;;  %v7187_v6 = vpop.f32.mrb[16].mxu0 }
 0x6c6   : > { %v7188_v33 = vpop.f32.mrb[17].mxu0 }
 0x6c7   : > { %v5742_v43 = vadd.f32 %v7170_v31, %v5482_v15  ;;  %v7189_v49 = vadd.f32 %v7188_v33, %v7187_v6  ;;  %v7190_v34 = vpop.f32.mrb[18].mxu0 }
 0x6c8   : > { %v7191_v3 = vpop.f32.mrb[19].mxu0 }
 0x6c9   : > { %v7192_v1 = vadd.f32 %v7191_v3, %v7190_v34  ;;  %v5780_v39 = vadd.f32 %v7189_v49, %v5739_v30 }
 0x6cb   : > { %v5783_v56 = vadd.f32 %v7192_v1, %v5742_v43 }
 0x6d1   : > { %v5820_v5 = vpop.f32.mrb[16].mxu1 }
 0x6d2   : > { %v5821_v44 = vadd.f32 %v5820_v5, %v5780_v39  ;;  %v7269_v40 = vpop.f32.mrb[17].mxu1 }
 0x6d3   : > { %v5823_v36 = vpop.f32.mrb[18].mxu1 }
 0x6d4   : > { %v5824_v53 = vadd.f32 %v5823_v36, %v5783_v56  ;;  %v7270_v37 = vpop.f32.mrb[19].mxu1 }
 0x6e5   : > { %v7214_v42 = vpop.f32.mrb[20].mxu0 }
 0x6e6   : > { %v7215_v45 = vpop.f32.mrb[21].mxu0 }
 0x6e7   : > { %v7216_v32 = vadd.f32 %v7215_v45, %v7214_v42  ;;  %v7217_v24 = vpop.f32.mrb[22].mxu0 }
 0x6e8   : > { %v7218_v46 = vpop.f32.mrb[23].mxu0 }
 0x6e9   : > { %v7219_v54 = vadd.f32 %v7218_v46, %v7217_v24 }
 0x6f1   : > { %v7236_v55 = vpop.f32.mrb[20].mxu1 }
 0x6f2   : > { %v7237_v57 = vpop.f32.mrb[21].mxu1 }
 0x6f3   : > { %v7238_v58 = vadd.f32 %v7237_v57, %v7236_v55  ;;  %v7239_v0 = vpop.f32.mrb[22].mxu1 }
 0x6f4   : > { %v7240_v59 = vpop.f32.mrb[23].mxu1 }
 0x6f5   : > { %v7241_v60 = vadd.f32 %v7240_v59, %v7239_v0  ;;  %v6244_v63 = vadd.f32 %v7238_v58, %v7216_v32  ;;  %v6284_v19 = vpop.f32.mrb[24].mxu0 }
 0x6f6   : > { %v7281_v41 = vpop.f32.mrb[25].mxu0 }
 0x6f7   : > { %v6285_v51 = vadd.f32 %v6284_v19, %v6244_v63  ;;  %v6247_v20 = vadd.f32 %v7241_v60, %v7219_v54  ;;  %v6287_v61 = vpop.f32.mrb[26].mxu0 }
 0x6f8   : > { %v7282_v7 = vpop.f32.mrb[27].mxu0 }
 0x6f9   : > { %v6291_v10 = vadd.f32 %v6285_v51, %v5821_v44  ;;  %v6288_v18 = vadd.f32 %v6287_v61, %v6247_v20 }
 0x6fb   : > { %v6300_v25 = vadd.f32 %v7092_v2, %v6291_v10  ;;  %v6292_v8 = vadd.f32 %v6288_v18, %v5824_v53 }
 0x6fd   : > { %v6302_v9 = vmax.f32 %v6300_v25, 0.0  ;;  %v6301_v48 = vadd.f32 %v7092_v2, %v6292_v8 }
 0x6ff   : > { %6304 = vst [vmem:[%s377_s14] sm:$0xff] %v6302_v9  ;;  %v6303_v14 = vmax.f32 %v6301_v48, 0.0 }
 0x701   : > { %6305 = vst [vmem:[%s377_s14 + $0x8] sm:$0xff] %v6303_v14 }
 0x702   : > { %8536 = shalt.err (!%p8533_p8)
}
 0x703   : > { %s8537_s29 = scalar_lea.hbm %s9291_s12, 256  ;;  %s8541_s10 = scalar_lea.hbm %s9342_s7, 512 }
 0x704   : > { %p8538_p4 = scmp.ne.s32.totalorder %s9291_s12, %s8537_s29  ;;  %p8542_p0 = scmp.lt.u32.totalorder %s9291_s12, %s9342_s7 }
 0x705   : > { %p8543_p5 = scmp.lt.u32.totalorder %s8541_s10, %s8537_s29  ;;  %p8545_p6 = scmp.lt.u32.totalorder %s8537_s29, %s9291_s12 }
 0x706   : > { %p8539_p10 = pnand %p8538_p4, %p9364_p9 }
 0x707   : > { %p8544_p7 = por %p8543_p5, %p8542_p0 }
 0x708   : > { %p8540_p11 = pneg %p8539_p10 }
 0x709   : > { %p8546_p12 = por %p8545_p6, %p8544_p7 }
 0x70b   : > { %p8547_p13 = pnand %p8546_p12, %p8540_p11 }
 0x70d   : > { %8550 = shalt.err (!%p8547_p13)
}
 0x70e   : > { %s8622_s19 = smov 128   ;;  %s8623_s22 = smov 8  }
 0x70f   : > { %7389 = dma.vmem_to_hbm [thread:$0]  (%p9364_p9), %s9286_s15, 256, %s9291_s12, %s6307_s9, %s8622_s19, %s8622_s19, %s8623_s22  }
 0x710 PF: > { %s6335_s17 = sand.u32 1, %s8589_s24   ;;  %p9365_p1 = scmp.ne.s32.totalorder %s9355_s28, 0 }
 0x711   : > { %p9366_p3 = scmp.ge.s32.totalorder %s8601_s27, 2  ;;  %s6336_s30 = scalar_lea.sflag [#allocation5], %s6335_s17 }
 0x713   : > { %p7415_p2 = pnand %p9366_p3, %p9365_p1 }
 0x715   : > { %8584 = dma.done.wait (!%p7415_p2), %s6336_s30, 256  }
 0x716   : > { %8586 = vsyncadd (!%p7415_p2), %s6336_s30, 4294967040  ;;  %p23_p8 = scmp.ge.s32.totalorder %s8840_s11, 4   ;;  %s9367_s24 = smov %s8593_s25 }
 0x717   : > { %s9368_s25 = smov %s8597_s26  ;;  %s9369_s26 = smov %s8851_s18 }
 0x718   : > { %s9370_s27 = smov %s8840_s11  ;;  %25 = sbr.rel (!%p23_p8) target bundleno = 10 (0xa), region = 123 }
 0x71f   :  { %6341 = vsyncpa [#allocation4], 1 }
 0x720   :  { %6343 = vsyncpa [#allocation4 + $0x1], 1 }
 0x721   :  { %6344 = vsyncpa [#allocation7], 1 }
 0x722   :  { %6345 = vsyncpa [#allocation10], 1 }
 0x723   :  { %6346 = vsyncpa [#allocation13], 1 }
 0x724   :  { %6347 = vsyncpa [#allocation5], 1 }
 0x725   :  { %6349 = vsyncpa [#allocation5 + $0x1], 1 }

</bundles_post_ra>
